<compile_context>
chip_gen: v5e
topology: v5e:2x2
jax: 0.10.0
libtpu: 0.0.40
codegen_flags: <defaults>
</compile_context>

<pallas_src>
import functools

import jax
import jax.numpy as jnp
from jax import lax
from jax.experimental import pallas as pl
from jax.experimental.pallas import tpu as pltpu

# ----- model dims (module defaults) -----
ARCH_DIM = 16          # LSTM input size
DATA_DIM = 2048
HIDDEN_DIM = 256
U_DIM = 16             # LSTM hidden size / attention d
H_ATT = ARCH_DIM // 2  # 8
M_LRL = H_ATT ** 2     # 64
DS_H = 64              # SmallDeepSet hidden
OUT_DIM = 10
LN_EPS = 1e-5
SLAB_W = 64            # lane width of the small-weight slab (max small out-dim)

_VMEM = functools.partial(pl.BlockSpec, memory_space=pltpu.MemorySpace.VMEM)

# Order of the small tensors inside slab_b (everything except data, f1_w1, f1_b1, f1_w2).
SMALL_KEYS = (
    'f1_b2', 'lstm_wih', 'lstm_whh', 'lstm_b',
    'wq', 'wk', 'wv', 'wc',
    'ln1_w', 'ln1_b', 'lrl_w1', 'lrl_b1', 'lrl_w2', 'lrl_b2', 'ln2_w', 'ln2_b',
    'ds_w1', 'ds_b1', 'ds_w2', 'ds_b2', 'ds_w3', 'ds_b3', 'ds_w4', 'ds_b4',
    'ds_d1', 'ds_db1', 'ds_d2', 'ds_db2',
)


# ----------------------------------------------------------------------------
# Single fused kernel: f1 -> LSTM -> attention block -> SmallDeepSet.
# Row layout: time-major flattened (T*B, feat) with row index = t*B + b.
# ----------------------------------------------------------------------------
def fused_kernel(arch_ref, data_ref, f1_w1_ref, slab_a_ref, slab_b_ref,
                 out_ref, u_sc, *, B, T, offsets):
    H = U_DIM
    BT = B * T

    def get(name):
        off, r, c = offsets[name]          # static Python ints -> free ref views
        return slab_b_ref[off:off + r, 0:c]

    def layer_norm(y, w, b):
        mean = jnp.mean(y, axis=-1, keepdims=True)
        var = jnp.mean((y - mean) ** 2, axis=-1, keepdims=True)
        return (y - mean) * lax.rsqrt(var + LN_EPS) * w + b

    # ---- step1a: h0 = f1(data)  (bf16 MXU operands, f32 accumulate) ----
    f1_w2t = slab_a_ref[0:U_DIM, :]              # (16, 256)  == f1_w2^T
    f1_b1 = slab_a_ref[U_DIM:U_DIM + 1, :]       # (1, 256)
    hmid = jnp.dot(data_ref[...].astype(jnp.bfloat16), f1_w1_ref[...],
                   preferred_element_type=jnp.float32) + f1_b1
    hmid = jnp.maximum(hmid, 0.0)
    h0 = lax.dot_general(hmid, f1_w2t, (((1,), (1,)), ((), ())),
                         preferred_element_type=jnp.float32) + get('f1_b2')   # (B, 16)

    # ---- step1b: LSTM over T steps, batched over B, state carried in registers ----
    wih = get('lstm_wih')                        # (16, 64)
    whh = get('lstm_whh')                        # (16, 64)
    b_lstm = get('lstm_b')                       # (1, 64)   (b_ih + b_hh pre-summed)
    # hoisted input projection for all (t, b): one (T*B,16)@(16,64) matmul, kept in vregs
    xg = jnp.dot(arch_ref[...], wih, preferred_element_type=jnp.float32) + b_lstm   # (TB, 4H)

    h = h0
    c = jnp.zeros((B, H), jnp.float32)
    for t in range(T):                           # fully unrolled (T static, small)
        g = jnp.dot(h, whh, preferred_element_type=jnp.float32) + xg[t * B:(t + 1) * B, :]
        i_g = jax.nn.sigmoid(g[:, 0:H])
        f_g = jax.nn.sigmoid(g[:, H:2 * H])
        g_g = jnp.tanh(g[:, 2 * H:3 * H])
        o_g = jax.nn.sigmoid(g[:, 3 * H:4 * H])
        c = f_g * c + i_g * g_g
        h = o_g * jnp.tanh(c)
        u_sc[t * B:(t + 1) * B, :] = h           # one (B,16) store per step
    u = u_sc[...]                                # (TB, 16), row = t*B + b

    # ---- step2: self-attention block on flattened rows ----
    q = jnp.dot(u, get('wq'), preferred_element_type=jnp.float32)              # (TB, 8)
    k = jnp.dot(u, get('wk'), preferred_element_type=jnp.float32)
    v = jnp.dot(u, get('wv'), preferred_element_type=jnp.float32)
    s = lax.dot_general(q, k, (((1,), (1,)), ((), ())),
                        preferred_element_type=jnp.float32)                    # (TB, TB)
    # per-sample mask: rows may only attend within their own sample (row % B == col % B)
    row_s = lax.broadcasted_iota(jnp.int32, (BT, BT), 0) % B
    col_s = lax.broadcasted_iota(jnp.int32, (BT, BT), 1) % B
    s = jnp.where(row_s == col_s, s, -1e30)
    s = s - jnp.max(s, axis=-1, keepdims=True)
    e = jnp.exp(s)
    alpha = e * pl.reciprocal(jnp.sum(e, axis=-1, keepdims=True), approx=True)
    av = jnp.dot(alpha, v, preferred_element_type=jnp.float32)                 # (TB, 8)
    u_prime = jnp.dot(av, get('wc'), preferred_element_type=jnp.float32)       # (TB, 16)
    u1 = layer_norm(u + u_prime, get('ln1_w'), get('ln1_b'))
    hm = jnp.maximum(
        jnp.dot(u1, get('lrl_w1'), preferred_element_type=jnp.float32) + get('lrl_b1'), 0.0)
    z_prime = jnp.dot(hm, get('lrl_w2'), preferred_element_type=jnp.float32) + get('lrl_b2')
    z = layer_norm(z_prime + u1, get('ln2_w'), get('ln2_b'))                   # (TB, 16)

    # ---- step3: SmallDeepSet (encoder on all rows, per-sample max pool, decoder) ----
    e1 = jnp.maximum(jnp.dot(z, get('ds_w1'), preferred_element_type=jnp.float32) + get('ds_b1'), 0.0)
    e2 = jnp.maximum(jnp.dot(e1, get('ds_w2'), preferred_element_type=jnp.float32) + get('ds_b2'), 0.0)
    e3 = jnp.maximum(jnp.dot(e2, get('ds_w3'), preferred_element_type=jnp.float32) + get('ds_b3'), 0.0)
    enc = jnp.dot(e3, get('ds_w4'), preferred_element_type=jnp.float32) + get('ds_b4')   # (TB, 64)
    pooled = enc[0:B, :]
    for t in range(1, T):
        pooled = jnp.maximum(pooled, enc[t * B:(t + 1) * B, :])               # (B, 64)
    d = jnp.maximum(
        jnp.dot(pooled, get('ds_d1'), preferred_element_type=jnp.float32) + get('ds_db1'), 0.0)
    out_ref[...] = jnp.dot(d, get('ds_d2'), preferred_element_type=jnp.float32) + get('ds_db2')


# ----------------------------------------------------------------------------
# Host-side (once, outside jit) packing of all small params into two slabs.
# ----------------------------------------------------------------------------
def pack_params(params):
    # slab_a (width 256): rows 0:16 = f1_w2^T, row 16 = f1_b1
    slab_a = jnp.concatenate([params['f1_w2'].T, params['f1_b1']], axis=0)    # (17, 256)

    pieces, offsets, off = [], {}, 0
    for k in SMALL_KEYS:
        w = params[k]
        r, c = w.shape
        rp = ((r + 7) // 8) * 8               # 8-row align each entry -> aligned slices
        pieces.append(jnp.pad(w, ((0, rp - r), (0, SLAB_W - c))))
        offsets[k] = (off, r, c)
        off += rp
    slab_b = jnp.concatenate(pieces, axis=0)  # (rows, 64)

    packed = {
        'f1_w1': params['f1_w1'].astype(jnp.bfloat16),   # one-time bf16 cast (only big weight)
        'slab_a': slab_a,
        'slab_b': slab_b,
    }
    return packed, offsets


# ----------------------------------------------------------------------------
# Wrapper: single gridless pallas_call, everything resident in VMEM.
# ----------------------------------------------------------------------------
def make_forward(offsets, B, T):
    kernel = functools.partial(fused_kernel, B=B, T=T, offsets=offsets)
    call = pl.pallas_call(
        kernel,
        out_shape=jax.ShapeDtypeStruct((B, OUT_DIM), jnp.float32),
        in_specs=[_VMEM()] * 5,
        out_specs=_VMEM(),
        scratch_shapes=[pltpu.VMEM((B * T, U_DIM), jnp.float32)],   # u (LSTM outputs)
    )

    @jax.jit
    def fwd(packed, arch, data):
        # time-major rows: row = t*B + b (tiny transpose, done by XLA outside the kernel)
        arch_tm = jnp.transpose(arch, (1, 0, 2)).reshape(T * B, ARCH_DIM)
        return call(arch_tm, data, packed['f1_w1'], packed['slab_a'], packed['slab_b'])

    return fwd


# ----------------------------------------------------------------------------
# Pure-JAX f32 reference (same params) for correctness checking
# ----------------------------------------------------------------------------
def reference(params, arch, data):
    h = jnp.maximum(data @ params['f1_w1'] + params['f1_b1'], 0.0)
    h0 = h @ params['f1_w2'] + params['f1_b2']
    H = U_DIM

    def step(carry, x_t):
        hh, cc = carry
        gates = x_t @ params['lstm_wih'] + hh @ params['lstm_whh'] + params['lstm_b']
        i = jax.nn.sigmoid(gates[:, :H])
        f = jax.nn.sigmoid(gates[:, H:2 * H])
        g = jnp.tanh(gates[:, 2 * H:3 * H])
        o = jax.nn.sigmoid(gates[:, 3 * H:])
        cc = f * cc + i * g
        hh = o * jnp.tanh(cc)
        return (hh, cc), hh

    _, us = lax.scan(step, (h0, jnp.zeros_like(h0)), jnp.transpose(arch, (1, 0, 2)))
    u = jnp.transpose(us, (1, 0, 2))

    q = u @ params['wq']
    k = u @ params['wk']
    v = u @ params['wv']
    s = jnp.einsum('bth,bsh->bts', q, k)
    alpha = jax.nn.softmax(s, axis=-1)
    av = jnp.einsum('bts,bsh->bth', alpha, v)
    up = av @ params['wc']

    def ln(y, w, b):
        m = y.mean(-1, keepdims=True)
        var = ((y - m) ** 2).mean(-1, keepdims=True)
        return (y - m) / jnp.sqrt(var + LN_EPS) * w + b

    uu = ln(u + up, params['ln1_w'], params['ln1_b'])
    hm = jnp.maximum(uu @ params['lrl_w1'] + params['lrl_b1'], 0.0)
    zp = hm @ params['lrl_w2'] + params['lrl_b2']
    z = ln(zp + uu, params['ln2_w'], params['ln2_b'])

    e = jnp.maximum(z @ params['ds_w1'] + params['ds_b1'], 0.0)
    e = jnp.maximum(e @ params['ds_w2'] + params['ds_b2'], 0.0)
    e = jnp.maximum(e @ params['ds_w3'] + params['ds_b3'], 0.0)
    e = e @ params['ds_w4'] + params['ds_b4']
    pooled = e.max(axis=1)
    d = jnp.maximum(pooled @ params['ds_d1'] + params['ds_db1'], 0.0)
    return d @ params['ds_d2'] + params['ds_db2']


# ----------------------------------------------------------------------------
# Deterministic parameter init (PyTorch-style uniform(-1/sqrt(fan_in), +1/sqrt(fan_in))).
# Weights are stored transposed as (in, out); biases as (1, out).
# ----------------------------------------------------------------------------
def init_params(seed=42):
    keys = iter(jax.random.split(jax.random.PRNGKey(seed), 64))

    def lin_w(fan_in, fan_out, bound=None):
        bound = (1.0 / (fan_in ** 0.5)) if bound is None else bound
        return jax.random.uniform(next(keys), (fan_in, fan_out), jnp.float32, -bound, bound)

    def lin_b(fan_in, fan_out, bound=None):
        bound = (1.0 / (fan_in ** 0.5)) if bound is None else bound
        return jax.random.uniform(next(keys), (1, fan_out), jnp.float32, -bound, bound)

    p = {}
    p['f1_w1'] = lin_w(DATA_DIM, HIDDEN_DIM)
    p['f1_b1'] = lin_b(DATA_DIM, HIDDEN_DIM)
    p['f1_w2'] = lin_w(HIDDEN_DIM, U_DIM)
    p['f1_b2'] = lin_b(HIDDEN_DIM, U_DIM)

    lstm_bound = 1.0 / (U_DIM ** 0.5)
    p['lstm_wih'] = lin_w(ARCH_DIM, 4 * U_DIM, bound=lstm_bound)
    p['lstm_whh'] = lin_w(U_DIM, 4 * U_DIM, bound=lstm_bound)
    p['lstm_b'] = lin_b(U_DIM, 4 * U_DIM, bound=lstm_bound)   # (b_ih + b_hh) pre-summed

    p['wq'] = lin_w(U_DIM, H_ATT)
    p['wk'] = lin_w(U_DIM, H_ATT)
    p['wv'] = lin_w(U_DIM, H_ATT)
    p['wc'] = lin_w(H_ATT, U_DIM)
    p['ln1_w'] = jnp.ones((1, U_DIM), jnp.float32)
    p['ln1_b'] = jnp.zeros((1, U_DIM), jnp.float32)
    p['lrl_w1'] = lin_w(U_DIM, M_LRL)
    p['lrl_b1'] = lin_b(U_DIM, M_LRL)
    p['lrl_w2'] = lin_w(M_LRL, U_DIM)
    p['lrl_b2'] = lin_b(M_LRL, U_DIM)
    p['ln2_w'] = jnp.ones((1, U_DIM), jnp.float32)
    p['ln2_b'] = jnp.zeros((1, U_DIM), jnp.float32)

    p['ds_w1'] = lin_w(U_DIM, DS_H)
    p['ds_b1'] = lin_b(U_DIM, DS_H)
    p['ds_w2'] = lin_w(DS_H, DS_H)
    p['ds_b2'] = lin_b(DS_H, DS_H)
    p['ds_w3'] = lin_w(DS_H, DS_H)
    p['ds_b3'] = lin_b(DS_H, DS_H)
    p['ds_w4'] = lin_w(DS_H, DS_H)
    p['ds_b4'] = lin_b(DS_H, DS_H)
    p['ds_d1'] = lin_w(DS_H, OUT_DIM)
    p['ds_db1'] = lin_b(DS_H, OUT_DIM)
    p['ds_d2'] = lin_w(OUT_DIM, OUT_DIM)
    p['ds_db2'] = lin_b(OUT_DIM, OUT_DIM)
    return p


if __name__ == "__main__":
    B, T = 2, 8
    key = jax.random.PRNGKey(0)
    k1, k2 = jax.random.split(key)
    arch = jax.random.normal(k1, (B, T, ARCH_DIM), jnp.float32)
    data = jax.random.normal(k2, (B, DATA_DIM), jnp.float32)
    params = init_params(seed=42)

    packed, offsets = pack_params(params)        # once, host-side, outside jit
    forward = make_forward(offsets, B, T)

    logits = jax.block_until_ready(forward(packed, arch, data))

    ref = reference(params, arch, data)
    assert logits.shape == (B, OUT_DIM), logits.shape
    assert jnp.allclose(logits, ref, rtol=2e-2, atol=2e-2), (logits, ref)
    print("KERNEL_OK")
</pallas_src>

<mosaic_0001>
module attributes {stable_mosaic.version = 11 : i64} {
  func.func @fused_kernel(%arg0: memref<16x16xf32, #tpu.memory_space<vmem>>, %arg1: memref<2x2048xf32, #tpu.memory_space<vmem>>, %arg2: memref<2048x256xbf16, #tpu.memory_space<vmem>>, %arg3: memref<17x256xf32, #tpu.memory_space<vmem>>, %arg4: memref<568x64xf32, #tpu.memory_space<vmem>>, %arg5: memref<2x10xf32, #tpu.memory_space<vmem>>, %arg6: memref<16x16xf32, #tpu.memory_space<vmem>>) attributes {dimension_semantics = [], scalar_prefetch = 0 : i64, scratch_operands = 1 : i64, tpu.core_type = #tpu.core_type<tc>} {
    %c0 = arith.constant 0 : index
    %c0_0 = arith.constant 0 : index
    %0 = vector.load %arg3[%c0, %c0_0] : memref<17x256xf32, #tpu.memory_space<vmem>>, vector<16x256xf32>
    %c16 = arith.constant 16 : index
    %c0_1 = arith.constant 0 : index
    %1 = vector.load %arg3[%c16, %c0_1] : memref<17x256xf32, #tpu.memory_space<vmem>>, vector<1x256xf32>
    %c0_2 = arith.constant 0 : index
    %c0_3 = arith.constant 0 : index
    %2 = vector.load %arg1[%c0_2, %c0_3] : memref<2x2048xf32, #tpu.memory_space<vmem>>, vector<2x2048xf32>
    %3 = arith.truncf %2 : vector<2x2048xf32> to vector<2x2048xbf16>
    %c0_4 = arith.constant 0 : index
    %c0_5 = arith.constant 0 : index
    %4 = vector.load %arg2[%c0_4, %c0_5] : memref<2048x256xbf16, #tpu.memory_space<vmem>>, vector<2048x256xbf16>
    %cst = arith.constant dense<0.000000e+00> : vector<2x256xf32>
    %5 = tpu.matmul %3, %4, %cst {dimension_numbers = #tpu.dot_dimension_numbers<[1], [0], [0], [1], [0, 0, 1, 1], [], []>} : vector<2x2048xbf16>, vector<2048x256xbf16>, vector<2x256xf32> -> vector<2x256xf32>
    %6 = vector.broadcast %1 : vector<1x256xf32> to vector<2x256xf32>
    %7 = arith.addf %5, %6 : vector<2x256xf32>
    %cst_6 = arith.constant 0.000000e+00 : f32
    %8 = vector.broadcast %cst_6 : f32 to vector<2x256xf32>
    %9 = arith.maximumf %7, %8 : vector<2x256xf32>
    %cst_7 = arith.constant dense<0.000000e+00> : vector<2x16xf32>
    %10 = tpu.matmul %9, %0, %cst_7 {dimension_numbers = #tpu.dot_dimension_numbers<[1], [1], [0], [0], [0, 0, 1, 0], [], []>} : vector<2x256xf32>, vector<16x256xf32>, vector<2x16xf32> -> vector<2x16xf32>
    %c0_8 = arith.constant 0 : index
    %c0_9 = arith.constant 0 : index
    %11 = vector.load %arg4[%c0_8, %c0_9] : memref<568x64xf32, #tpu.memory_space<vmem>>, vector<1x16xf32>
    %12 = vector.broadcast %11 : vector<1x16xf32> to vector<2x16xf32>
    %13 = arith.addf %10, %12 : vector<2x16xf32>
    %c8 = arith.constant 8 : index
    %c0_10 = arith.constant 0 : index
    %14 = vector.load %arg4[%c8, %c0_10] : memref<568x64xf32, #tpu.memory_space<vmem>>, vector<16x64xf32>
    %c24 = arith.constant 24 : index
    %c0_11 = arith.constant 0 : index
    %15 = vector.load %arg4[%c24, %c0_11] : memref<568x64xf32, #tpu.memory_space<vmem>>, vector<16x64xf32>
    %c40 = arith.constant 40 : index
    %c0_12 = arith.constant 0 : index
    %16 = vector.load %arg4[%c40, %c0_12] : memref<568x64xf32, #tpu.memory_space<vmem>>, vector<1x64xf32>
    %c0_13 = arith.constant 0 : index
    %c0_14 = arith.constant 0 : index
    %17 = vector.load %arg0[%c0_13, %c0_14] : memref<16x16xf32, #tpu.memory_space<vmem>>, vector<16x16xf32>
    %cst_15 = arith.constant dense<0.000000e+00> : vector<16x64xf32>
    %18 = tpu.matmul %17, %14, %cst_15 {dimension_numbers = #tpu.dot_dimension_numbers<[1], [0], [0], [1], [0, 0, 1, 1], [], []>} : vector<16x16xf32>, vector<16x64xf32>, vector<16x64xf32> -> vector<16x64xf32>
    %19 = vector.broadcast %16 : vector<1x64xf32> to vector<16x64xf32>
    %20 = arith.addf %18, %19 : vector<16x64xf32>
    %cst_16 = arith.constant 0.000000e+00 : f32
    %21 = vector.broadcast %cst_16 : f32 to vector<2x16xf32>
    %cst_17 = arith.constant dense<0.000000e+00> : vector<2x64xf32>
    %22 = tpu.matmul %13, %15, %cst_17 {dimension_numbers = #tpu.dot_dimension_numbers<[1], [0], [0], [1], [0, 0, 1, 1], [], []>} : vector<2x16xf32>, vector<16x64xf32>, vector<2x64xf32> -> vector<2x64xf32>
    %23 = vector.extract_strided_slice %20 {offsets = [0, 0], sizes = [2, 64], strides = [1, 1]} : vector<16x64xf32> to vector<2x64xf32>
    %24 = arith.addf %22, %23 : vector<2x64xf32>
    %25 = vector.extract_strided_slice %24 {offsets = [0, 0], sizes = [2, 16], strides = [1, 1]} : vector<2x64xf32> to vector<2x16xf32>
    %26 = arith.negf %25 : vector<2x16xf32>
    %27 = math.exp %26 : vector<2x16xf32>
    %cst_18 = arith.constant 1.000000e+00 : f32
    %28 = vector.broadcast %cst_18 : f32 to vector<2x16xf32>
    %29 = arith.addf %28, %27 : vector<2x16xf32>
    %30 = arith.divf %28, %29 : vector<2x16xf32>
    %31 = vector.extract_strided_slice %24 {offsets = [0, 16], sizes = [2, 16], strides = [1, 1]} : vector<2x64xf32> to vector<2x16xf32>
    %32 = arith.negf %31 : vector<2x16xf32>
    %33 = math.exp %32 : vector<2x16xf32>
    %cst_19 = arith.constant 1.000000e+00 : f32
    %34 = vector.broadcast %cst_19 : f32 to vector<2x16xf32>
    %35 = arith.addf %34, %33 : vector<2x16xf32>
    %36 = arith.divf %34, %35 : vector<2x16xf32>
    %37 = vector.extract_strided_slice %24 {offsets = [0, 32], sizes = [2, 16], strides = [1, 1]} : vector<2x64xf32> to vector<2x16xf32>
    %38 = math.tanh %37 : vector<2x16xf32>
    %39 = vector.extract_strided_slice %24 {offsets = [0, 48], sizes = [2, 16], strides = [1, 1]} : vector<2x64xf32> to vector<2x16xf32>
    %40 = arith.negf %39 : vector<2x16xf32>
    %41 = math.exp %40 : vector<2x16xf32>
    %cst_20 = arith.constant 1.000000e+00 : f32
    %42 = vector.broadcast %cst_20 : f32 to vector<2x16xf32>
    %43 = arith.addf %42, %41 : vector<2x16xf32>
    %44 = arith.divf %42, %43 : vector<2x16xf32>
    %45 = arith.mulf %36, %21 : vector<2x16xf32>
    %46 = arith.mulf %30, %38 : vector<2x16xf32>
    %47 = arith.addf %45, %46 : vector<2x16xf32>
    %48 = math.tanh %47 : vector<2x16xf32>
    %49 = arith.mulf %44, %48 : vector<2x16xf32>
    %c0_21 = arith.constant 0 : index
    %c0_22 = arith.constant 0 : index
    %50 = vector.load %arg6[%c0_21, %c0_22] : memref<16x16xf32, #tpu.memory_space<vmem>>, vector<2x16xf32>
    tpu.vector_store %arg6[%c0_21, %c0_22], %49 {strides = array<i32>} : memref<16x16xf32, #tpu.memory_space<vmem>>, vector<2x16xf32>,
    %cst_23 = arith.constant dense<0.000000e+00> : vector<2x64xf32>
    %51 = tpu.matmul %49, %15, %cst_23 {dimension_numbers = #tpu.dot_dimension_numbers<[1], [0], [0], [1], [0, 0, 1, 1], [], []>} : vector<2x16xf32>, vector<16x64xf32>, vector<2x64xf32> -> vector<2x64xf32>
    %52 = vector.extract_strided_slice %20 {offsets = [2, 0], sizes = [2, 64], strides = [1, 1]} : vector<16x64xf32> to vector<2x64xf32>
    %53 = arith.addf %51, %52 : vector<2x64xf32>
    %54 = vector.extract_strided_slice %53 {offsets = [0, 0], sizes = [2, 16], strides = [1, 1]} : vector<2x64xf32> to vector<2x16xf32>
    %55 = arith.negf %54 : vector<2x16xf32>
    %56 = math.exp %55 : vector<2x16xf32>
    %cst_24 = arith.constant 1.000000e+00 : f32
    %57 = vector.broadcast %cst_24 : f32 to vector<2x16xf32>
    %58 = arith.addf %57, %56 : vector<2x16xf32>
    %59 = arith.divf %57, %58 : vector<2x16xf32>
    %60 = vector.extract_strided_slice %53 {offsets = [0, 16], sizes = [2, 16], strides = [1, 1]} : vector<2x64xf32> to vector<2x16xf32>
    %61 = arith.negf %60 : vector<2x16xf32>
    %62 = math.exp %61 : vector<2x16xf32>
    %cst_25 = arith.constant 1.000000e+00 : f32
    %63 = vector.broadcast %cst_25 : f32 to vector<2x16xf32>
    %64 = arith.addf %63, %62 : vector<2x16xf32>
    %65 = arith.divf %63, %64 : vector<2x16xf32>
    %66 = vector.extract_strided_slice %53 {offsets = [0, 32], sizes = [2, 16], strides = [1, 1]} : vector<2x64xf32> to vector<2x16xf32>
    %67 = math.tanh %66 : vector<2x16xf32>
    %68 = vector.extract_strided_slice %53 {offsets = [0, 48], sizes = [2, 16], strides = [1, 1]} : vector<2x64xf32> to vector<2x16xf32>
    %69 = arith.negf %68 : vector<2x16xf32>
    %70 = math.exp %69 : vector<2x16xf32>
    %cst_26 = arith.constant 1.000000e+00 : f32
    %71 = vector.broadcast %cst_26 : f32 to vector<2x16xf32>
    %72 = arith.addf %71, %70 : vector<2x16xf32>
    %73 = arith.divf %71, %72 : vector<2x16xf32>
    %74 = arith.mulf %65, %47 : vector<2x16xf32>
    %75 = arith.mulf %59, %67 : vector<2x16xf32>
    %76 = arith.addf %74, %75 : vector<2x16xf32>
    %77 = math.tanh %76 : vector<2x16xf32>
    %78 = arith.mulf %73, %77 : vector<2x16xf32>
    %c2 = arith.constant 2 : index
    %c0_27 = arith.constant 0 : index
    %79 = vector.load %arg6[%c2, %c0_27] : memref<16x16xf32, #tpu.memory_space<vmem>>, vector<2x16xf32>
    tpu.vector_store %arg6[%c2, %c0_27], %78 {strides = array<i32>} : memref<16x16xf32, #tpu.memory_space<vmem>>, vector<2x16xf32>,
    %cst_28 = arith.constant dense<0.000000e+00> : vector<2x64xf32>
    %80 = tpu.matmul %78, %15, %cst_28 {dimension_numbers = #tpu.dot_dimension_numbers<[1], [0], [0], [1], [0, 0, 1, 1], [], []>} : vector<2x16xf32>, vector<16x64xf32>, vector<2x64xf32> -> vector<2x64xf32>
    %81 = vector.extract_strided_slice %20 {offsets = [4, 0], sizes = [2, 64], strides = [1, 1]} : vector<16x64xf32> to vector<2x64xf32>
    %82 = arith.addf %80, %81 : vector<2x64xf32>
    %83 = vector.extract_strided_slice %82 {offsets = [0, 0], sizes = [2, 16], strides = [1, 1]} : vector<2x64xf32> to vector<2x16xf32>
    %84 = arith.negf %83 : vector<2x16xf32>
    %85 = math.exp %84 : vector<2x16xf32>
    %cst_29 = arith.constant 1.000000e+00 : f32
    %86 = vector.broadcast %cst_29 : f32 to vector<2x16xf32>
    %87 = arith.addf %86, %85 : vector<2x16xf32>
    %88 = arith.divf %86, %87 : vector<2x16xf32>
    %89 = vector.extract_strided_slice %82 {offsets = [0, 16], sizes = [2, 16], strides = [1, 1]} : vector<2x64xf32> to vector<2x16xf32>
    %90 = arith.negf %89 : vector<2x16xf32>
    %91 = math.exp %90 : vector<2x16xf32>
    %cst_30 = arith.constant 1.000000e+00 : f32
    %92 = vector.broadcast %cst_30 : f32 to vector<2x16xf32>
    %93 = arith.addf %92, %91 : vector<2x16xf32>
    %94 = arith.divf %92, %93 : vector<2x16xf32>
    %95 = vector.extract_strided_slice %82 {offsets = [0, 32], sizes = [2, 16], strides = [1, 1]} : vector<2x64xf32> to vector<2x16xf32>
    %96 = math.tanh %95 : vector<2x16xf32>
    %97 = vector.extract_strided_slice %82 {offsets = [0, 48], sizes = [2, 16], strides = [1, 1]} : vector<2x64xf32> to vector<2x16xf32>
    %98 = arith.negf %97 : vector<2x16xf32>
    %99 = math.exp %98 : vector<2x16xf32>
    %cst_31 = arith.constant 1.000000e+00 : f32
    %100 = vector.broadcast %cst_31 : f32 to vector<2x16xf32>
    %101 = arith.addf %100, %99 : vector<2x16xf32>
    %102 = arith.divf %100, %101 : vector<2x16xf32>
    %103 = arith.mulf %94, %76 : vector<2x16xf32>
    %104 = arith.mulf %88, %96 : vector<2x16xf32>
    %105 = arith.addf %103, %104 : vector<2x16xf32>
    %106 = math.tanh %105 : vector<2x16xf32>
    %107 = arith.mulf %102, %106 : vector<2x16xf32>
    %c4 = arith.constant 4 : index
    %c0_32 = arith.constant 0 : index
    %108 = vector.load %arg6[%c4, %c0_32] : memref<16x16xf32, #tpu.memory_space<vmem>>, vector<2x16xf32>
    tpu.vector_store %arg6[%c4, %c0_32], %107 {strides = array<i32>} : memref<16x16xf32, #tpu.memory_space<vmem>>, vector<2x16xf32>,
    %cst_33 = arith.constant dense<0.000000e+00> : vector<2x64xf32>
    %109 = tpu.matmul %107, %15, %cst_33 {dimension_numbers = #tpu.dot_dimension_numbers<[1], [0], [0], [1], [0, 0, 1, 1], [], []>} : vector<2x16xf32>, vector<16x64xf32>, vector<2x64xf32> -> vector<2x64xf32>
    %110 = vector.extract_strided_slice %20 {offsets = [6, 0], sizes = [2, 64], strides = [1, 1]} : vector<16x64xf32> to vector<2x64xf32>
    %111 = arith.addf %109, %110 : vector<2x64xf32>
    %112 = vector.extract_strided_slice %111 {offsets = [0, 0], sizes = [2, 16], strides = [1, 1]} : vector<2x64xf32> to vector<2x16xf32>
    %113 = arith.negf %112 : vector<2x16xf32>
    %114 = math.exp %113 : vector<2x16xf32>
    %cst_34 = arith.constant 1.000000e+00 : f32
    %115 = vector.broadcast %cst_34 : f32 to vector<2x16xf32>
    %116 = arith.addf %115, %114 : vector<2x16xf32>
    %117 = arith.divf %115, %116 : vector<2x16xf32>
    %118 = vector.extract_strided_slice %111 {offsets = [0, 16], sizes = [2, 16], strides = [1, 1]} : vector<2x64xf32> to vector<2x16xf32>
    %119 = arith.negf %118 : vector<2x16xf32>
    %120 = math.exp %119 : vector<2x16xf32>
    %cst_35 = arith.constant 1.000000e+00 : f32
    %121 = vector.broadcast %cst_35 : f32 to vector<2x16xf32>
    %122 = arith.addf %121, %120 : vector<2x16xf32>
    %123 = arith.divf %121, %122 : vector<2x16xf32>
    %124 = vector.extract_strided_slice %111 {offsets = [0, 32], sizes = [2, 16], strides = [1, 1]} : vector<2x64xf32> to vector<2x16xf32>
    %125 = math.tanh %124 : vector<2x16xf32>
    %126 = vector.extract_strided_slice %111 {offsets = [0, 48], sizes = [2, 16], strides = [1, 1]} : vector<2x64xf32> to vector<2x16xf32>
    %127 = arith.negf %126 : vector<2x16xf32>
    %128 = math.exp %127 : vector<2x16xf32>
    %cst_36 = arith.constant 1.000000e+00 : f32
    %129 = vector.broadcast %cst_36 : f32 to vector<2x16xf32>
    %130 = arith.addf %129, %128 : vector<2x16xf32>
    %131 = arith.divf %129, %130 : vector<2x16xf32>
    %132 = arith.mulf %123, %105 : vector<2x16xf32>
    %133 = arith.mulf %117, %125 : vector<2x16xf32>
    %134 = arith.addf %132, %133 : vector<2x16xf32>
    %135 = math.tanh %134 : vector<2x16xf32>
    %136 = arith.mulf %131, %135 : vector<2x16xf32>
    %c6 = arith.constant 6 : index
    %c0_37 = arith.constant 0 : index
    %137 = vector.load %arg6[%c6, %c0_37] : memref<16x16xf32, #tpu.memory_space<vmem>>, vector<2x16xf32>
    tpu.vector_store %arg6[%c6, %c0_37], %136 {strides = array<i32>} : memref<16x16xf32, #tpu.memory_space<vmem>>, vector<2x16xf32>,
    %cst_38 = arith.constant dense<0.000000e+00> : vector<2x64xf32>
    %138 = tpu.matmul %136, %15, %cst_38 {dimension_numbers = #tpu.dot_dimension_numbers<[1], [0], [0], [1], [0, 0, 1, 1], [], []>} : vector<2x16xf32>, vector<16x64xf32>, vector<2x64xf32> -> vector<2x64xf32>
    %139 = vector.extract_strided_slice %20 {offsets = [8, 0], sizes = [2, 64], strides = [1, 1]} : vector<16x64xf32> to vector<2x64xf32>
    %140 = arith.addf %138, %139 : vector<2x64xf32>
    %141 = vector.extract_strided_slice %140 {offsets = [0, 0], sizes = [2, 16], strides = [1, 1]} : vector<2x64xf32> to vector<2x16xf32>
    %142 = arith.negf %141 : vector<2x16xf32>
    %143 = math.exp %142 : vector<2x16xf32>
    %cst_39 = arith.constant 1.000000e+00 : f32
    %144 = vector.broadcast %cst_39 : f32 to vector<2x16xf32>
    %145 = arith.addf %144, %143 : vector<2x16xf32>
    %146 = arith.divf %144, %145 : vector<2x16xf32>
    %147 = vector.extract_strided_slice %140 {offsets = [0, 16], sizes = [2, 16], strides = [1, 1]} : vector<2x64xf32> to vector<2x16xf32>
    %148 = arith.negf %147 : vector<2x16xf32>
    %149 = math.exp %148 : vector<2x16xf32>
    %cst_40 = arith.constant 1.000000e+00 : f32
    %150 = vector.broadcast %cst_40 : f32 to vector<2x16xf32>
    %151 = arith.addf %150, %149 : vector<2x16xf32>
    %152 = arith.divf %150, %151 : vector<2x16xf32>
    %153 = vector.extract_strided_slice %140 {offsets = [0, 32], sizes = [2, 16], strides = [1, 1]} : vector<2x64xf32> to vector<2x16xf32>
    %154 = math.tanh %153 : vector<2x16xf32>
    %155 = vector.extract_strided_slice %140 {offsets = [0, 48], sizes = [2, 16], strides = [1, 1]} : vector<2x64xf32> to vector<2x16xf32>
    %156 = arith.negf %155 : vector<2x16xf32>
    %157 = math.exp %156 : vector<2x16xf32>
    %cst_41 = arith.constant 1.000000e+00 : f32
    %158 = vector.broadcast %cst_41 : f32 to vector<2x16xf32>
    %159 = arith.addf %158, %157 : vector<2x16xf32>
    %160 = arith.divf %158, %159 : vector<2x16xf32>
    %161 = arith.mulf %152, %134 : vector<2x16xf32>
    %162 = arith.mulf %146, %154 : vector<2x16xf32>
    %163 = arith.addf %161, %162 : vector<2x16xf32>
    %164 = math.tanh %163 : vector<2x16xf32>
    %165 = arith.mulf %160, %164 : vector<2x16xf32>
    %c8_42 = arith.constant 8 : index
    %c0_43 = arith.constant 0 : index
    %166 = vector.load %arg6[%c8_42, %c0_43] : memref<16x16xf32, #tpu.memory_space<vmem>>, vector<2x16xf32>
    tpu.vector_store %arg6[%c8_42, %c0_43], %165 {strides = array<i32>} : memref<16x16xf32, #tpu.memory_space<vmem>>, vector<2x16xf32>,
    %cst_44 = arith.constant dense<0.000000e+00> : vector<2x64xf32>
    %167 = tpu.matmul %165, %15, %cst_44 {dimension_numbers = #tpu.dot_dimension_numbers<[1], [0], [0], [1], [0, 0, 1, 1], [], []>} : vector<2x16xf32>, vector<16x64xf32>, vector<2x64xf32> -> vector<2x64xf32>
    %168 = vector.extract_strided_slice %20 {offsets = [10, 0], sizes = [2, 64], strides = [1, 1]} : vector<16x64xf32> to vector<2x64xf32>
    %169 = arith.addf %167, %168 : vector<2x64xf32>
    %170 = vector.extract_strided_slice %169 {offsets = [0, 0], sizes = [2, 16], strides = [1, 1]} : vector<2x64xf32> to vector<2x16xf32>
    %171 = arith.negf %170 : vector<2x16xf32>
    %172 = math.exp %171 : vector<2x16xf32>
    %cst_45 = arith.constant 1.000000e+00 : f32
    %173 = vector.broadcast %cst_45 : f32 to vector<2x16xf32>
    %174 = arith.addf %173, %172 : vector<2x16xf32>
    %175 = arith.divf %173, %174 : vector<2x16xf32>
    %176 = vector.extract_strided_slice %169 {offsets = [0, 16], sizes = [2, 16], strides = [1, 1]} : vector<2x64xf32> to vector<2x16xf32>
    %177 = arith.negf %176 : vector<2x16xf32>
    %178 = math.exp %177 : vector<2x16xf32>
    %cst_46 = arith.constant 1.000000e+00 : f32
    %179 = vector.broadcast %cst_46 : f32 to vector<2x16xf32>
    %180 = arith.addf %179, %178 : vector<2x16xf32>
    %181 = arith.divf %179, %180 : vector<2x16xf32>
    %182 = vector.extract_strided_slice %169 {offsets = [0, 32], sizes = [2, 16], strides = [1, 1]} : vector<2x64xf32> to vector<2x16xf32>
    %183 = math.tanh %182 : vector<2x16xf32>
    %184 = vector.extract_strided_slice %169 {offsets = [0, 48], sizes = [2, 16], strides = [1, 1]} : vector<2x64xf32> to vector<2x16xf32>
    %185 = arith.negf %184 : vector<2x16xf32>
    %186 = math.exp %185 : vector<2x16xf32>
    %cst_47 = arith.constant 1.000000e+00 : f32
    %187 = vector.broadcast %cst_47 : f32 to vector<2x16xf32>
    %188 = arith.addf %187, %186 : vector<2x16xf32>
    %189 = arith.divf %187, %188 : vector<2x16xf32>
    %190 = arith.mulf %181, %163 : vector<2x16xf32>
    %191 = arith.mulf %175, %183 : vector<2x16xf32>
    %192 = arith.addf %190, %191 : vector<2x16xf32>
    %193 = math.tanh %192 : vector<2x16xf32>
    %194 = arith.mulf %189, %193 : vector<2x16xf32>
    %c10 = arith.constant 10 : index
    %c0_48 = arith.constant 0 : index
    %195 = vector.load %arg6[%c10, %c0_48] : memref<16x16xf32, #tpu.memory_space<vmem>>, vector<2x16xf32>
    tpu.vector_store %arg6[%c10, %c0_48], %194 {strides = array<i32>} : memref<16x16xf32, #tpu.memory_space<vmem>>, vector<2x16xf32>,
    %cst_49 = arith.constant dense<0.000000e+00> : vector<2x64xf32>
    %196 = tpu.matmul %194, %15, %cst_49 {dimension_numbers = #tpu.dot_dimension_numbers<[1], [0], [0], [1], [0, 0, 1, 1], [], []>} : vector<2x16xf32>, vector<16x64xf32>, vector<2x64xf32> -> vector<2x64xf32>
    %197 = vector.extract_strided_slice %20 {offsets = [12, 0], sizes = [2, 64], strides = [1, 1]} : vector<16x64xf32> to vector<2x64xf32>
    %198 = arith.addf %196, %197 : vector<2x64xf32>
    %199 = vector.extract_strided_slice %198 {offsets = [0, 0], sizes = [2, 16], strides = [1, 1]} : vector<2x64xf32> to vector<2x16xf32>
    %200 = arith.negf %199 : vector<2x16xf32>
    %201 = math.exp %200 : vector<2x16xf32>
    %cst_50 = arith.constant 1.000000e+00 : f32
    %202 = vector.broadcast %cst_50 : f32 to vector<2x16xf32>
    %203 = arith.addf %202, %201 : vector<2x16xf32>
    %204 = arith.divf %202, %203 : vector<2x16xf32>
    %205 = vector.extract_strided_slice %198 {offsets = [0, 16], sizes = [2, 16], strides = [1, 1]} : vector<2x64xf32> to vector<2x16xf32>
    %206 = arith.negf %205 : vector<2x16xf32>
    %207 = math.exp %206 : vector<2x16xf32>
    %cst_51 = arith.constant 1.000000e+00 : f32
    %208 = vector.broadcast %cst_51 : f32 to vector<2x16xf32>
    %209 = arith.addf %208, %207 : vector<2x16xf32>
    %210 = arith.divf %208, %209 : vector<2x16xf32>
    %211 = vector.extract_strided_slice %198 {offsets = [0, 32], sizes = [2, 16], strides = [1, 1]} : vector<2x64xf32> to vector<2x16xf32>
    %212 = math.tanh %211 : vector<2x16xf32>
    %213 = vector.extract_strided_slice %198 {offsets = [0, 48], sizes = [2, 16], strides = [1, 1]} : vector<2x64xf32> to vector<2x16xf32>
    %214 = arith.negf %213 : vector<2x16xf32>
    %215 = math.exp %214 : vector<2x16xf32>
    %cst_52 = arith.constant 1.000000e+00 : f32
    %216 = vector.broadcast %cst_52 : f32 to vector<2x16xf32>
    %217 = arith.addf %216, %215 : vector<2x16xf32>
    %218 = arith.divf %216, %217 : vector<2x16xf32>
    %219 = arith.mulf %210, %192 : vector<2x16xf32>
    %220 = arith.mulf %204, %212 : vector<2x16xf32>
    %221 = arith.addf %219, %220 : vector<2x16xf32>
    %222 = math.tanh %221 : vector<2x16xf32>
    %223 = arith.mulf %218, %222 : vector<2x16xf32>
    %c12 = arith.constant 12 : index
    %c0_53 = arith.constant 0 : index
    %224 = vector.load %arg6[%c12, %c0_53] : memref<16x16xf32, #tpu.memory_space<vmem>>, vector<2x16xf32>
    tpu.vector_store %arg6[%c12, %c0_53], %223 {strides = array<i32>} : memref<16x16xf32, #tpu.memory_space<vmem>>, vector<2x16xf32>,
    %cst_54 = arith.constant dense<0.000000e+00> : vector<2x64xf32>
    %225 = tpu.matmul %223, %15, %cst_54 {dimension_numbers = #tpu.dot_dimension_numbers<[1], [0], [0], [1], [0, 0, 1, 1], [], []>} : vector<2x16xf32>, vector<16x64xf32>, vector<2x64xf32> -> vector<2x64xf32>
    %226 = vector.extract_strided_slice %20 {offsets = [14, 0], sizes = [2, 64], strides = [1, 1]} : vector<16x64xf32> to vector<2x64xf32>
    %227 = arith.addf %225, %226 : vector<2x64xf32>
    %228 = vector.extract_strided_slice %227 {offsets = [0, 0], sizes = [2, 16], strides = [1, 1]} : vector<2x64xf32> to vector<2x16xf32>
    %229 = arith.negf %228 : vector<2x16xf32>
    %230 = math.exp %229 : vector<2x16xf32>
    %cst_55 = arith.constant 1.000000e+00 : f32
    %231 = vector.broadcast %cst_55 : f32 to vector<2x16xf32>
    %232 = arith.addf %231, %230 : vector<2x16xf32>
    %233 = arith.divf %231, %232 : vector<2x16xf32>
    %234 = vector.extract_strided_slice %227 {offsets = [0, 16], sizes = [2, 16], strides = [1, 1]} : vector<2x64xf32> to vector<2x16xf32>
    %235 = arith.negf %234 : vector<2x16xf32>
    %236 = math.exp %235 : vector<2x16xf32>
    %cst_56 = arith.constant 1.000000e+00 : f32
    %237 = vector.broadcast %cst_56 : f32 to vector<2x16xf32>
    %238 = arith.addf %237, %236 : vector<2x16xf32>
    %239 = arith.divf %237, %238 : vector<2x16xf32>
    %240 = vector.extract_strided_slice %227 {offsets = [0, 32], sizes = [2, 16], strides = [1, 1]} : vector<2x64xf32> to vector<2x16xf32>
    %241 = math.tanh %240 : vector<2x16xf32>
    %242 = vector.extract_strided_slice %227 {offsets = [0, 48], sizes = [2, 16], strides = [1, 1]} : vector<2x64xf32> to vector<2x16xf32>
    %243 = arith.negf %242 : vector<2x16xf32>
    %244 = math.exp %243 : vector<2x16xf32>
    %cst_57 = arith.constant 1.000000e+00 : f32
    %245 = vector.broadcast %cst_57 : f32 to vector<2x16xf32>
    %246 = arith.addf %245, %244 : vector<2x16xf32>
    %247 = arith.divf %245, %246 : vector<2x16xf32>
    %248 = arith.mulf %239, %221 : vector<2x16xf32>
    %249 = arith.mulf %233, %241 : vector<2x16xf32>
    %250 = arith.addf %248, %249 : vector<2x16xf32>
    %251 = math.tanh %250 : vector<2x16xf32>
    %252 = arith.mulf %247, %251 : vector<2x16xf32>
    %c14 = arith.constant 14 : index
    %c0_58 = arith.constant 0 : index
    %253 = vector.load %arg6[%c14, %c0_58] : memref<16x16xf32, #tpu.memory_space<vmem>>, vector<2x16xf32>
    tpu.vector_store %arg6[%c14, %c0_58], %252 {strides = array<i32>} : memref<16x16xf32, #tpu.memory_space<vmem>>, vector<2x16xf32>,
    %c0_59 = arith.constant 0 : index
    %c0_60 = arith.constant 0 : index
    %254 = vector.load %arg6[%c0_59, %c0_60] : memref<16x16xf32, #tpu.memory_space<vmem>>, vector<16x16xf32>
    %c48 = arith.constant 48 : index
    %c0_61 = arith.constant 0 : index
    %255 = vector.load %arg4[%c48, %c0_61] : memref<568x64xf32, #tpu.memory_space<vmem>>, vector<16x8xf32>
    %cst_62 = arith.constant dense<0.000000e+00> : vector<16x8xf32>
    %256 = tpu.matmul %254, %255, %cst_62 {dimension_numbers = #tpu.dot_dimension_numbers<[1], [0], [0], [1], [0, 0, 1, 1], [], []>} : vector<16x16xf32>, vector<16x8xf32>, vector<16x8xf32> -> vector<16x8xf32>
    %c64 = arith.constant 64 : index
    %c0_63 = arith.constant 0 : index
    %257 = vector.load %arg4[%c64, %c0_63] : memref<568x64xf32, #tpu.memory_space<vmem>>, vector<16x8xf32>
    %cst_64 = arith.constant dense<0.000000e+00> : vector<16x8xf32>
    %258 = tpu.matmul %254, %257, %cst_64 {dimension_numbers = #tpu.dot_dimension_numbers<[1], [0], [0], [1], [0, 0, 1, 1], [], []>} : vector<16x16xf32>, vector<16x8xf32>, vector<16x8xf32> -> vector<16x8xf32>
    %c80 = arith.constant 80 : index
    %c0_65 = arith.constant 0 : index
    %259 = vector.load %arg4[%c80, %c0_65] : memref<568x64xf32, #tpu.memory_space<vmem>>, vector<16x8xf32>
    %cst_66 = arith.constant dense<0.000000e+00> : vector<16x8xf32>
    %260 = tpu.matmul %254, %259, %cst_66 {dimension_numbers = #tpu.dot_dimension_numbers<[1], [0], [0], [1], [0, 0, 1, 1], [], []>} : vector<16x16xf32>, vector<16x8xf32>, vector<16x8xf32> -> vector<16x8xf32>
    %cst_67 = arith.constant dense<0.000000e+00> : vector<16x16xf32>
    %261 = tpu.matmul %256, %258, %cst_67 {dimension_numbers = #tpu.dot_dimension_numbers<[1], [1], [0], [0], [0, 0, 1, 0], [], []>} : vector<16x8xf32>, vector<16x8xf32>, vector<16x16xf32> -> vector<16x16xf32>
    %262 = tpu.iota {dimensions = array<i32: 0>} : vector<16x16xi32>
    %c2_i32 = arith.constant 2 : i32
    %c0_i32 = arith.constant 0 : i32
    %263 = arith.cmpi eq, %c2_i32, %c0_i32 : i32
    %c1_i32 = arith.constant 1 : i32
    %264 = arith.select %263, %c1_i32, %c2_i32 : i32
    %265 = vector.broadcast %264 : i32 to vector<16x16xi32>
    %266 = arith.remsi %262, %265 : vector<16x16xi32>
    %c0_i32_68 = arith.constant 0 : i32
    %267 = vector.broadcast %c0_i32_68 : i32 to vector<16x16xi32>
    %268 = arith.cmpi ne, %266, %267 : vector<16x16xi32>
    %c0_i32_69 = arith.constant 0 : i32
    %269 = vector.broadcast %c0_i32_69 : i32 to vector<16x16xi32>
    %270 = arith.cmpi slt, %266, %269 : vector<16x16xi32>
    %c0_i32_70 = arith.constant 0 : i32
    %271 = arith.cmpi slt, %264, %c0_i32_70 : i32
    %272 = vector.broadcast %271 : i1 to vector<16x16xi1>
    %273 = vector.broadcast %272 : vector<16x16xi1> to vector<16x16xi1>
    %274 = arith.xori %270, %273 : vector<16x16xi1>
    %275 = arith.andi %274, %268 : vector<16x16xi1>
    %276 = vector.broadcast %264 : i32 to vector<16x16xi32>
    %277 = arith.addi %266, %276 : vector<16x16xi32>
    %278 = arith.select %275, %277, %266 : vector<16x16xi1>, vector<16x16xi32>
    %279 = tpu.iota {dimensions = array<i32: 1>} : vector<16x16xi32>
    %c2_i32_71 = arith.constant 2 : i32
    %c0_i32_72 = arith.constant 0 : i32
    %280 = arith.cmpi eq, %c2_i32_71, %c0_i32_72 : i32
    %c1_i32_73 = arith.constant 1 : i32
    %281 = arith.select %280, %c1_i32_73, %c2_i32_71 : i32
    %282 = vector.broadcast %281 : i32 to vector<16x16xi32>
    %283 = arith.remsi %279, %282 : vector<16x16xi32>
    %c0_i32_74 = arith.constant 0 : i32
    %284 = vector.broadcast %c0_i32_74 : i32 to vector<16x16xi32>
    %285 = arith.cmpi ne, %283, %284 : vector<16x16xi32>
    %c0_i32_75 = arith.constant 0 : i32
    %286 = vector.broadcast %c0_i32_75 : i32 to vector<16x16xi32>
    %287 = arith.cmpi slt, %283, %286 : vector<16x16xi32>
    %c0_i32_76 = arith.constant 0 : i32
    %288 = arith.cmpi slt, %281, %c0_i32_76 : i32
    %289 = vector.broadcast %288 : i1 to vector<16x16xi1>
    %290 = vector.broadcast %289 : vector<16x16xi1> to vector<16x16xi1>
    %291 = arith.xori %287, %290 : vector<16x16xi1>
    %292 = arith.andi %291, %285 : vector<16x16xi1>
    %293 = vector.broadcast %281 : i32 to vector<16x16xi32>
    %294 = arith.addi %283, %293 : vector<16x16xi32>
    %295 = arith.select %292, %294, %283 : vector<16x16xi1>, vector<16x16xi32>
    %296 = arith.cmpi eq, %278, %295 : vector<16x16xi32>
    %cst_77 = arith.constant -1.000000e+30 : f32
    %297 = vector.broadcast %cst_77 : f32 to vector<16x16xf32>
    %298 = arith.select %296, %261, %297 : vector<16x16xi1>, vector<16x16xf32>
    %cst_78 = arith.constant dense<0xFF800000> : vector<16xf32>
    %299 = vector.multi_reduction <maximumf>, %298, %cst_78 [1] : vector<16x16xf32> to vector<16xf32>
    %300 = vector.shape_cast %299 : vector<16xf32> to vector<16x1xf32>
    %301 = vector.broadcast %300 : vector<16x1xf32> to vector<16x16xf32>
    %302 = arith.subf %298, %301 : vector<16x16xf32>
    %303 = math.exp %302 : vector<16x16xf32>
    %cst_79 = arith.constant dense<0.000000e+00> : vector<16xf32>
    %304 = vector.multi_reduction <add>, %303, %cst_79 [1] : vector<16x16xf32> to vector<16xf32>
    %305 = vector.shape_cast %304 : vector<16xf32> to vector<16x1xf32>
    %306 = tpu.reciprocal %305 {approx = true} : vector<16x1xf32> -> vector<16x1xf32>
    %307 = vector.broadcast %306 : vector<16x1xf32> to vector<16x16xf32>
    %308 = arith.mulf %303, %307 : vector<16x16xf32>
    %cst_80 = arith.constant dense<0.000000e+00> : vector<16x8xf32>
    %309 = tpu.matmul %308, %260, %cst_80 {dimension_numbers = #tpu.dot_dimension_numbers<[1], [0], [0], [1], [0, 0, 1, 1], [], []>} : vector<16x16xf32>, vector<16x8xf32>, vector<16x8xf32> -> vector<16x8xf32>
    %c96 = arith.constant 96 : index
    %c0_81 = arith.constant 0 : index
    %310 = vector.load %arg4[%c96, %c0_81] : memref<568x64xf32, #tpu.memory_space<vmem>>, vector<8x16xf32>
    %cst_82 = arith.constant dense<0.000000e+00> : vector<16x16xf32>
    %311 = tpu.matmul %309, %310, %cst_82 {dimension_numbers = #tpu.dot_dimension_numbers<[1], [0], [0], [1], [0, 0, 1, 1], [], []>} : vector<16x8xf32>, vector<8x16xf32>, vector<16x16xf32> -> vector<16x16xf32>
    %312 = arith.addf %254, %311 : vector<16x16xf32>
    %c104 = arith.constant 104 : index
    %c0_83 = arith.constant 0 : index
    %313 = vector.load %arg4[%c104, %c0_83] : memref<568x64xf32, #tpu.memory_space<vmem>>, vector<1x16xf32>
    %c112 = arith.constant 112 : index
    %c0_84 = arith.constant 0 : index
    %314 = vector.load %arg4[%c112, %c0_84] : memref<568x64xf32, #tpu.memory_space<vmem>>, vector<1x16xf32>
    %cst_85 = arith.constant dense<0.000000e+00> : vector<16xf32>
    %315 = vector.multi_reduction <add>, %312, %cst_85 [1] : vector<16x16xf32> to vector<16xf32>
    %316 = vector.shape_cast %315 : vector<16xf32> to vector<16x1xf32>
    %cst_86 = arith.constant 1.600000e+01 : f32
    %317 = vector.broadcast %cst_86 : f32 to vector<16x1xf32>
    %318 = arith.divf %316, %317 : vector<16x1xf32>
    %319 = vector.broadcast %318 : vector<16x1xf32> to vector<16x16xf32>
    %320 = arith.subf %312, %319 : vector<16x16xf32>
    %321 = arith.mulf %320, %320 : vector<16x16xf32>
    %cst_87 = arith.constant dense<0.000000e+00> : vector<16xf32>
    %322 = vector.multi_reduction <add>, %321, %cst_87 [1] : vector<16x16xf32> to vector<16xf32>
    %323 = vector.shape_cast %322 : vector<16xf32> to vector<16x1xf32>
    %cst_88 = arith.constant 1.600000e+01 : f32
    %324 = vector.broadcast %cst_88 : f32 to vector<16x1xf32>
    %325 = arith.divf %323, %324 : vector<16x1xf32>
    %326 = vector.broadcast %318 : vector<16x1xf32> to vector<16x16xf32>
    %327 = arith.subf %312, %326 : vector<16x16xf32>
    %cst_89 = arith.constant 9.99999974E-6 : f32
    %328 = vector.broadcast %cst_89 : f32 to vector<16x1xf32>
    %329 = arith.addf %325, %328 : vector<16x1xf32>
    %330 = math.rsqrt %329 : vector<16x1xf32>
    %331 = vector.broadcast %330 : vector<16x1xf32> to vector<16x16xf32>
    %332 = arith.mulf %327, %331 : vector<16x16xf32>
    %333 = vector.broadcast %313 : vector<1x16xf32> to vector<16x16xf32>
    %334 = arith.mulf %332, %333 : vector<16x16xf32>
    %335 = vector.broadcast %314 : vector<1x16xf32> to vector<16x16xf32>
    %336 = arith.addf %334, %335 : vector<16x16xf32>
    %c120 = arith.constant 120 : index
    %c0_90 = arith.constant 0 : index
    %337 = vector.load %arg4[%c120, %c0_90] : memref<568x64xf32, #tpu.memory_space<vmem>>, vector<16x64xf32>
    %cst_91 = arith.constant dense<0.000000e+00> : vector<16x64xf32>
    %338 = tpu.matmul %336, %337, %cst_91 {dimension_numbers = #tpu.dot_dimension_numbers<[1], [0], [0], [1], [0, 0, 1, 1], [], []>} : vector<16x16xf32>, vector<16x64xf32>, vector<16x64xf32> -> vector<16x64xf32>
    %c136 = arith.constant 136 : index
    %c0_92 = arith.constant 0 : index
    %339 = vector.load %arg4[%c136, %c0_92] : memref<568x64xf32, #tpu.memory_space<vmem>>, vector<1x64xf32>
    %340 = vector.broadcast %339 : vector<1x64xf32> to vector<16x64xf32>
    %341 = arith.addf %338, %340 : vector<16x64xf32>
    %cst_93 = arith.constant 0.000000e+00 : f32
    %342 = vector.broadcast %cst_93 : f32 to vector<16x64xf32>
    %343 = arith.maximumf %341, %342 : vector<16x64xf32>
    %c144 = arith.constant 144 : index
    %c0_94 = arith.constant 0 : index
    %344 = vector.load %arg4[%c144, %c0_94] : memref<568x64xf32, #tpu.memory_space<vmem>>, vector<64x16xf32>
    %cst_95 = arith.constant dense<0.000000e+00> : vector<16x16xf32>
    %345 = tpu.matmul %343, %344, %cst_95 {dimension_numbers = #tpu.dot_dimension_numbers<[1], [0], [0], [1], [0, 0, 1, 1], [], []>} : vector<16x64xf32>, vector<64x16xf32>, vector<16x16xf32> -> vector<16x16xf32>
    %c208 = arith.constant 208 : index
    %c0_96 = arith.constant 0 : index
    %346 = vector.load %arg4[%c208, %c0_96] : memref<568x64xf32, #tpu.memory_space<vmem>>, vector<1x16xf32>
    %347 = vector.broadcast %346 : vector<1x16xf32> to vector<16x16xf32>
    %348 = arith.addf %345, %347 : vector<16x16xf32>
    %349 = arith.addf %348, %336 : vector<16x16xf32>
    %c216 = arith.constant 216 : index
    %c0_97 = arith.constant 0 : index
    %350 = vector.load %arg4[%c216, %c0_97] : memref<568x64xf32, #tpu.memory_space<vmem>>, vector<1x16xf32>
    %c224 = arith.constant 224 : index
    %c0_98 = arith.constant 0 : index
    %351 = vector.load %arg4[%c224, %c0_98] : memref<568x64xf32, #tpu.memory_space<vmem>>, vector<1x16xf32>
    %cst_99 = arith.constant dense<0.000000e+00> : vector<16xf32>
    %352 = vector.multi_reduction <add>, %349, %cst_99 [1] : vector<16x16xf32> to vector<16xf32>
    %353 = vector.shape_cast %352 : vector<16xf32> to vector<16x1xf32>
    %cst_100 = arith.constant 1.600000e+01 : f32
    %354 = vector.broadcast %cst_100 : f32 to vector<16x1xf32>
    %355 = arith.divf %353, %354 : vector<16x1xf32>
    %356 = vector.broadcast %355 : vector<16x1xf32> to vector<16x16xf32>
    %357 = arith.subf %349, %356 : vector<16x16xf32>
    %358 = arith.mulf %357, %357 : vector<16x16xf32>
    %cst_101 = arith.constant dense<0.000000e+00> : vector<16xf32>
    %359 = vector.multi_reduction <add>, %358, %cst_101 [1] : vector<16x16xf32> to vector<16xf32>
    %360 = vector.shape_cast %359 : vector<16xf32> to vector<16x1xf32>
    %cst_102 = arith.constant 1.600000e+01 : f32
    %361 = vector.broadcast %cst_102 : f32 to vector<16x1xf32>
    %362 = arith.divf %360, %361 : vector<16x1xf32>
    %363 = vector.broadcast %355 : vector<16x1xf32> to vector<16x16xf32>
    %364 = arith.subf %349, %363 : vector<16x16xf32>
    %cst_103 = arith.constant 9.99999974E-6 : f32
    %365 = vector.broadcast %cst_103 : f32 to vector<16x1xf32>
    %366 = arith.addf %362, %365 : vector<16x1xf32>
    %367 = math.rsqrt %366 : vector<16x1xf32>
    %368 = vector.broadcast %367 : vector<16x1xf32> to vector<16x16xf32>
    %369 = arith.mulf %364, %368 : vector<16x16xf32>
    %370 = vector.broadcast %350 : vector<1x16xf32> to vector<16x16xf32>
    %371 = arith.mulf %369, %370 : vector<16x16xf32>
    %372 = vector.broadcast %351 : vector<1x16xf32> to vector<16x16xf32>
    %373 = arith.addf %371, %372 : vector<16x16xf32>
    %c232 = arith.constant 232 : index
    %c0_104 = arith.constant 0 : index
    %374 = vector.load %arg4[%c232, %c0_104] : memref<568x64xf32, #tpu.memory_space<vmem>>, vector<16x64xf32>
    %cst_105 = arith.constant dense<0.000000e+00> : vector<16x64xf32>
    %375 = tpu.matmul %373, %374, %cst_105 {dimension_numbers = #tpu.dot_dimension_numbers<[1], [0], [0], [1], [0, 0, 1, 1], [], []>} : vector<16x16xf32>, vector<16x64xf32>, vector<16x64xf32> -> vector<16x64xf32>
    %c248 = arith.constant 248 : index
    %c0_106 = arith.constant 0 : index
    %376 = vector.load %arg4[%c248, %c0_106] : memref<568x64xf32, #tpu.memory_space<vmem>>, vector<1x64xf32>
    %377 = vector.broadcast %376 : vector<1x64xf32> to vector<16x64xf32>
    %378 = arith.addf %375, %377 : vector<16x64xf32>
    %cst_107 = arith.constant 0.000000e+00 : f32
    %379 = vector.broadcast %cst_107 : f32 to vector<16x64xf32>
    %380 = arith.maximumf %378, %379 : vector<16x64xf32>
    %c256 = arith.constant 256 : index
    %c0_108 = arith.constant 0 : index
    %381 = vector.load %arg4[%c256, %c0_108] : memref<568x64xf32, #tpu.memory_space<vmem>>, vector<64x64xf32>
    %cst_109 = arith.constant dense<0.000000e+00> : vector<16x64xf32>
    %382 = tpu.matmul %380, %381, %cst_109 {dimension_numbers = #tpu.dot_dimension_numbers<[1], [0], [0], [1], [0, 0, 1, 1], [], []>} : vector<16x64xf32>, vector<64x64xf32>, vector<16x64xf32> -> vector<16x64xf32>
    %c320 = arith.constant 320 : index
    %c0_110 = arith.constant 0 : index
    %383 = vector.load %arg4[%c320, %c0_110] : memref<568x64xf32, #tpu.memory_space<vmem>>, vector<1x64xf32>
    %384 = vector.broadcast %383 : vector<1x64xf32> to vector<16x64xf32>
    %385 = arith.addf %382, %384 : vector<16x64xf32>
    %cst_111 = arith.constant 0.000000e+00 : f32
    %386 = vector.broadcast %cst_111 : f32 to vector<16x64xf32>
    %387 = arith.maximumf %385, %386 : vector<16x64xf32>
    %c328 = arith.constant 328 : index
    %c0_112 = arith.constant 0 : index
    %388 = vector.load %arg4[%c328, %c0_112] : memref<568x64xf32, #tpu.memory_space<vmem>>, vector<64x64xf32>
    %cst_113 = arith.constant dense<0.000000e+00> : vector<16x64xf32>
    %389 = tpu.matmul %387, %388, %cst_113 {dimension_numbers = #tpu.dot_dimension_numbers<[1], [0], [0], [1], [0, 0, 1, 1], [], []>} : vector<16x64xf32>, vector<64x64xf32>, vector<16x64xf32> -> vector<16x64xf32>
    %c392 = arith.constant 392 : index
    %c0_114 = arith.constant 0 : index
    %390 = vector.load %arg4[%c392, %c0_114] : memref<568x64xf32, #tpu.memory_space<vmem>>, vector<1x64xf32>
    %391 = vector.broadcast %390 : vector<1x64xf32> to vector<16x64xf32>
    %392 = arith.addf %389, %391 : vector<16x64xf32>
    %cst_115 = arith.constant 0.000000e+00 : f32
    %393 = vector.broadcast %cst_115 : f32 to vector<16x64xf32>
    %394 = arith.maximumf %392, %393 : vector<16x64xf32>
    %c400 = arith.constant 400 : index
    %c0_116 = arith.constant 0 : index
    %395 = vector.load %arg4[%c400, %c0_116] : memref<568x64xf32, #tpu.memory_space<vmem>>, vector<64x64xf32>
    %cst_117 = arith.constant dense<0.000000e+00> : vector<16x64xf32>
    %396 = tpu.matmul %394, %395, %cst_117 {dimension_numbers = #tpu.dot_dimension_numbers<[1], [0], [0], [1], [0, 0, 1, 1], [], []>} : vector<16x64xf32>, vector<64x64xf32>, vector<16x64xf32> -> vector<16x64xf32>
    %c464 = arith.constant 464 : index
    %c0_118 = arith.constant 0 : index
    %397 = vector.load %arg4[%c464, %c0_118] : memref<568x64xf32, #tpu.memory_space<vmem>>, vector<1x64xf32>
    %398 = vector.broadcast %397 : vector<1x64xf32> to vector<16x64xf32>
    %399 = arith.addf %396, %398 : vector<16x64xf32>
    %400 = vector.extract_strided_slice %399 {offsets = [0, 0], sizes = [2, 64], strides = [1, 1]} : vector<16x64xf32> to vector<2x64xf32>
    %401 = vector.extract_strided_slice %399 {offsets = [2, 0], sizes = [2, 64], strides = [1, 1]} : vector<16x64xf32> to vector<2x64xf32>
    %402 = arith.maximumf %400, %401 : vector<2x64xf32>
    %403 = vector.extract_strided_slice %399 {offsets = [4, 0], sizes = [2, 64], strides = [1, 1]} : vector<16x64xf32> to vector<2x64xf32>
    %404 = arith.maximumf %402, %403 : vector<2x64xf32>
    %405 = vector.extract_strided_slice %399 {offsets = [6, 0], sizes = [2, 64], strides = [1, 1]} : vector<16x64xf32> to vector<2x64xf32>
    %406 = arith.maximumf %404, %405 : vector<2x64xf32>
    %407 = vector.extract_strided_slice %399 {offsets = [8, 0], sizes = [2, 64], strides = [1, 1]} : vector<16x64xf32> to vector<2x64xf32>
    %408 = arith.maximumf %406, %407 : vector<2x64xf32>
    %409 = vector.extract_strided_slice %399 {offsets = [10, 0], sizes = [2, 64], strides = [1, 1]} : vector<16x64xf32> to vector<2x64xf32>
    %410 = arith.maximumf %408, %409 : vector<2x64xf32>
    %411 = vector.extract_strided_slice %399 {offsets = [12, 0], sizes = [2, 64], strides = [1, 1]} : vector<16x64xf32> to vector<2x64xf32>
    %412 = arith.maximumf %410, %411 : vector<2x64xf32>
    %413 = vector.extract_strided_slice %399 {offsets = [14, 0], sizes = [2, 64], strides = [1, 1]} : vector<16x64xf32> to vector<2x64xf32>
    %414 = arith.maximumf %412, %413 : vector<2x64xf32>
    %c472 = arith.constant 472 : index
    %c0_119 = arith.constant 0 : index
    %415 = vector.load %arg4[%c472, %c0_119] : memref<568x64xf32, #tpu.memory_space<vmem>>, vector<64x10xf32>
    %cst_120 = arith.constant dense<0.000000e+00> : vector<2x10xf32>
    %416 = tpu.matmul %414, %415, %cst_120 {dimension_numbers = #tpu.dot_dimension_numbers<[1], [0], [0], [1], [0, 0, 1, 1], [], []>} : vector<2x64xf32>, vector<64x10xf32>, vector<2x10xf32> -> vector<2x10xf32>
    %c536 = arith.constant 536 : index
    %c0_121 = arith.constant 0 : index
    %417 = vector.load %arg4[%c536, %c0_121] : memref<568x64xf32, #tpu.memory_space<vmem>>, vector<1x10xf32>
    %418 = vector.broadcast %417 : vector<1x10xf32> to vector<2x10xf32>
    %419 = arith.addf %416, %418 : vector<2x10xf32>
    %cst_122 = arith.constant 0.000000e+00 : f32
    %420 = vector.broadcast %cst_122 : f32 to vector<2x10xf32>
    %421 = arith.maximumf %419, %420 : vector<2x10xf32>
    %c544 = arith.constant 544 : index
    %c0_123 = arith.constant 0 : index
    %422 = vector.load %arg4[%c544, %c0_123] : memref<568x64xf32, #tpu.memory_space<vmem>>, vector<10x10xf32>
    %cst_124 = arith.constant dense<0.000000e+00> : vector<2x10xf32>
    %423 = tpu.matmul %421, %422, %cst_124 {dimension_numbers = #tpu.dot_dimension_numbers<[1], [0], [0], [1], [0, 0, 1, 1], [], []>} : vector<2x10xf32>, vector<10x10xf32>, vector<2x10xf32> -> vector<2x10xf32>
    %c560 = arith.constant 560 : index
    %c0_125 = arith.constant 0 : index
    %424 = vector.load %arg4[%c560, %c0_125] : memref<568x64xf32, #tpu.memory_space<vmem>>, vector<1x10xf32>
    %425 = vector.broadcast %424 : vector<1x10xf32> to vector<2x10xf32>
    %426 = arith.addf %423, %425 : vector<2x10xf32>
    %c0_126 = arith.constant 0 : index
    %c0_127 = arith.constant 0 : index
    %427 = vector.load %arg5[%c0_126, %c0_127] : memref<2x10xf32, #tpu.memory_space<vmem>>, vector<2x10xf32>
    tpu.vector_store %arg5[%c0_126, %c0_127], %426 {strides = array<i32>} : memref<2x10xf32, #tpu.memory_space<vmem>>, vector<2x10xf32>,
    return
  }
}

</mosaic_0001>

<bundles_post_ra>
// kernel: fwd.1
= control target key start
LH: loop header
LB: loop body
LE: loop exit
PB: predicated region body
PF: predicated region fallthrough
CT: control target
= control target key end

     0   :  { %10 = vsyncpa [#allocation4], 0  ;;  %s5375_s0 = inlined_call_operand.vmem [shape: f32[16,16], index: 0, kind: input, shape index: {}]   ;;  %s5376_s1 = inlined_call_operand.vmem [shape: f32[2,2048], index: 1, kind: input, shape index: {}]   ;;  %s5377_s2 = inlined_call_operand.hbm [shape: bf16[2048,256], index: 2, kind: input, shape index: {}]   ;;  %s5378_s3 = inlined_call_operand.vmem [shape: f32[17,256], index: 3, kind: input, shape index: {}]   ;;  %s5379_s4 = inlined_call_operand.vmem [shape: f32[568,64], index: 4, kind: input, shape index: {}]   ;;  %s5380_s5 = inlined_call_operand.hbm [shape: f32[2,10], index: 5, kind: output, shape index: {}]  }
   0x1   :  { %11 = vsyncpa [#allocation5], 0  ;;  %s20_s20 = sshll.u32 %s5377_s2, 4  ;;  %s4853_s21 = smov [#allocation3]   ;;  %s21_s20 = int_to_ptr.hbm [resolvable:$true] %s20_s20 }
   0x2   :  { %s22_s22 = sshll.u32 %s4853_s21, 4  ;;  %s4854_s23 = smov 128   ;;  %s23_s22 = int_to_ptr.vmem [resolvable:$true] %s22_s22 }
   0x3   :  { %s4855_s24 = smov 8  }
   0x4   :  { %28 = dma.hbm_to_vmem [thread:$0]  %s21_s20, 32768, %s23_s22, [#allocation4], %s4854_s23, %s4854_s23, %s4855_s24  }
   0x5   :  { %4849 = dma.done.wait [#allocation4], 32768  }
   0x6   :  { %4850 = vsyncadd [#allocation4], 4294934528  ;;  %v3427_v0 = vld [vmem:[#allocation3 + $0x70] sm:$0xf]  ;;  %v4455_v1 = vld [vmem:[#allocation3 + $0x74] sm:$0xf0] }
   0x7   :  { %v3491_v2 = vld [vmem:[#allocation3 + $0xf0] sm:$0xf]  ;;  %v3428_v3 = vor.u32 %v4455_v1, %v3427_v0  ;;  %v4471_v4 = vld [vmem:[#allocation3 + $0xf4] sm:$0xf0]  ;;  %v3419_v11 = vld [vmem:[#allocation3 + $0x60] sm:$0xf] }
   0x8   :  { %v3555_v5 = vld [vmem:[#allocation3 + $0x170] sm:$0xf]  ;;  %v4487_v6 = vld [vmem:[#allocation3 + $0x174] sm:$0xf0]  ;;  %v3492_v7 = vor.u32 %v4471_v4, %v3491_v2  ;;  %v4453_v13 = vld [vmem:[#allocation3 + $0x64] sm:$0xf0] }
   0x9   :  { %v3556_v8 = vor.u32 %v4487_v6, %v3555_v5  ;;  %v3619_v9 = vld [vmem:[#allocation3 + $0x1f0] sm:$0xf]  ;;  %v4503_v10 = vld [vmem:[#allocation3 + $0x1f4] sm:$0xf0]  ;;  %1645 = vmatpush.bf16.msra.mxu0 %v3428_v3  ;;  %v3483_v14 = vld [vmem:[#allocation3 + $0xe0] sm:$0xf]  ;;  %v3420_v16 = vor.u32 %v4453_v13, %v3419_v11 }
   0xa   :  { %v3620_v12 = vor.u32 %v4503_v10, %v3619_v9  ;;  %v4469_v15 = vld [vmem:[#allocation3 + $0xe4] sm:$0xf0]  ;;  %1658 = vmatpush.bf16.msra.mxu1 %v3492_v7  ;;  %v3547_v18 = vld [vmem:[#allocation3 + $0x160] sm:$0xf]  ;;  %v3411_v23 = vld [vmem:[#allocation3 + $0x50] sm:$0xf] }
   0xb   :  { %1671 = vmatpush.bf16.msra.mxu2 %v3556_v8  ;;  %v3484_v17 = vor.u32 %v4469_v15, %v3483_v14  ;;  %v4485_v19 = vld [vmem:[#allocation3 + $0x164] sm:$0xf0]  ;;  %v3611_v20 = vld [vmem:[#allocation3 + $0x1e0] sm:$0xf]  ;;  %v4451_v24 = vld [vmem:[#allocation3 + $0x54] sm:$0xf0] }
   0xc   :  { %1684 = vmatpush.bf16.msra.mxu3 %v3620_v12  ;;  %v3548_v21 = vor.u32 %v4485_v19, %v3547_v18  ;;  %v4501_v22 = vld [vmem:[#allocation3 + $0x1e4] sm:$0xf0]  ;;  %v3475_v26 = vld [vmem:[#allocation3 + $0xd0] sm:$0xf]  ;;  %v4467_v27 = vld [vmem:[#allocation3 + $0xd4] sm:$0xf0]  ;;  %v3412_v29 = vor.u32 %v4451_v24, %v3411_v23 }
   0xd   :  { %v3612_v25 = vor.u32 %v4501_v22, %v3611_v20  ;;  %v3539_v28 = vld [vmem:[#allocation3 + $0x150] sm:$0xf]  ;;  %1646 = vmatpush.bf16.msra.mxu0 %v3420_v16  ;;  %v4483_v30 = vld [vmem:[#allocation3 + $0x154] sm:$0xf0]  ;;  %v3476_v33 = vor.u32 %v4467_v27, %v3475_v26  ;;  %v3403_v35 = vld [vmem:[#allocation3 + $0x40] sm:$0xf] }
   0xe   :  { %v3603_v31 = vld [vmem:[#allocation3 + $0x1d0] sm:$0xf]  ;;  %v4499_v32 = vld [vmem:[#allocation3 + $0x1d4] sm:$0xf0]  ;;  %1659 = vmatpush.bf16.msra.mxu1 %v3484_v17  ;;  %v3540_v34 = vor.u32 %v4483_v30, %v3539_v28  ;;  %v4449_v36 = vld [vmem:[#allocation3 + $0x44] sm:$0xf0] }
   0xf   :  { %1672 = vmatpush.bf16.msra.mxu2 %v3548_v21  ;;  %v3467_v37 = vld [vmem:[#allocation3 + $0xc0] sm:$0xf]  ;;  %v3604_v38 = vor.u32 %v4499_v32, %v3603_v31  ;;  %v4465_v39 = vld [vmem:[#allocation3 + $0xc4] sm:$0xf0]  ;;  %v3404_v44 = vor.u32 %v4449_v36, %v3403_v35  ;;  %v3395_v47 = vld [vmem:[#allocation3 + $0x30] sm:$0xf] }
  0x10   :  { %1685 = vmatpush.bf16.msra.mxu3 %v3612_v25  ;;  %v3531_v40 = vld [vmem:[#allocation3 + $0x140] sm:$0xf]  ;;  %v4481_v41 = vld [vmem:[#allocation3 + $0x144] sm:$0xf0]  ;;  %v3468_v45 = vor.u32 %v4465_v39, %v3467_v37  ;;  %v4447_v48 = vld [vmem:[#allocation3 + $0x34] sm:$0xf0] }
  0x11   :  { %v3595_v42 = vld [vmem:[#allocation3 + $0x1c0] sm:$0xf]  ;;  %v4497_v43 = vld [vmem:[#allocation3 + $0x1c4] sm:$0xf0]  ;;  %1647 = vmatpush.bf16.msra.mxu0 %v3412_v29  ;;  %v3532_v46 = vor.u32 %v4481_v41, %v3531_v40  ;;  %v3459_v49 = vld [vmem:[#allocation3 + $0xb0] sm:$0xf]  ;;  %v3396_v56 = vor.u32 %v4447_v48, %v3395_v47 }
  0x12   :  { %1660 = vmatpush.bf16.msra.mxu1 %v3476_v33  ;;  %v3596_v50 = vor.u32 %v4497_v43, %v3595_v42  ;;  %v4463_v51 = vld [vmem:[#allocation3 + $0xb4] sm:$0xf0]  ;;  %v3523_v52 = vld [vmem:[#allocation3 + $0x130] sm:$0xf]  ;;  %v3387_v59 = vld [vmem:[#allocation3 + $0x20] sm:$0xf] }
  0x13   :  { %1673 = vmatpush.bf16.msra.mxu2 %v3540_v34  ;;  %v4479_v53 = vld [vmem:[#allocation3 + $0x134] sm:$0xf0]  ;;  %v3587_v54 = vld [vmem:[#allocation3 + $0x1b0] sm:$0xf]  ;;  %v3460_v57 = vor.u32 %v4463_v51, %v3459_v49  ;;  %v4445_v60 = vld [vmem:[#allocation3 + $0x24] sm:$0xf0] }
  0x14   :  { %1686 = vmatpush.bf16.msra.mxu3 %v3604_v38  ;;  %v4495_v55 = vld [vmem:[#allocation3 + $0x1b4] sm:$0xf0]  ;;  %v3524_v58 = vor.u32 %v4479_v53, %v3523_v52  ;;  %v3451_v61 = vld [vmem:[#allocation3 + $0xa0] sm:$0xf]  ;;  %v4461_v63 = vld [vmem:[#allocation3 + $0xa4] sm:$0xf0]  ;;  %v3388_v4 = vor.u32 %v4445_v60, %v3387_v59 }
  0x15   :  { %1648 = vmatpush.bf16.msra.mxu0 %v3404_v44  ;;  %v3588_v62 = vor.u32 %v4495_v55, %v3587_v54  ;;  %v3515_v0 = vld [vmem:[#allocation3 + $0x120] sm:$0xf]  ;;  %v4477_v1 = vld [vmem:[#allocation3 + $0x124] sm:$0xf0]  ;;  %v3452_v5 = vor.u32 %v4461_v63, %v3451_v61  ;;  %v3379_v7 = vld [vmem:[#allocation3 + $0x10] sm:$0xf] }
  0x16   :  { %1661 = vmatpush.bf16.msra.mxu1 %v3468_v45  ;;  %v3579_v2 = vld [vmem:[#allocation3 + $0x1a0] sm:$0xf]  ;;  %v4493_v3 = vld [vmem:[#allocation3 + $0x1a4] sm:$0xf0]  ;;  %v3516_v6 = vor.u32 %v4477_v1, %v3515_v0  ;;  %v4443_v8 = vld [vmem:[#allocation3 + $0x14] sm:$0xf0] }
  0x17   :  { %1674 = vmatpush.bf16.msra.mxu2 %v3532_v46  ;;  %v3443_v9 = vld [vmem:[#allocation3 + $0x90] sm:$0xf]  ;;  %v3580_v10 = vor.u32 %v4493_v3, %v3579_v2  ;;  %v4459_v11 = vld [vmem:[#allocation3 + $0x94] sm:$0xf0]  ;;  %v3380_v16 = vor.u32 %v4443_v8, %v3379_v7  ;;  %v3371_v17 = vld [vmem:[#allocation3] sm:$0xf] }
  0x18   :  { %1687 = vmatpush.bf16.msra.mxu3 %v3596_v50  ;;  %v3507_v12 = vld [vmem:[#allocation3 + $0x110] sm:$0xf]  ;;  %v4475_v13 = vld [vmem:[#allocation3 + $0x114] sm:$0xf0]  ;;  %v4441_v18 = vld [vmem:[#allocation3 + $0x4] sm:$0xf0]  ;;  %v3444_v19 = vor.u32 %v4459_v11, %v3443_v9 }
  0x19   :  { %1649 = vmatpush.bf16.msra.mxu0 %v3396_v56  ;;  %v3571_v14 = vld [vmem:[#allocation3 + $0x190] sm:$0xf]  ;;  %v4491_v15 = vld [vmem:[#allocation3 + $0x194] sm:$0xf0]  ;;  %v3508_v20 = vor.u32 %v4475_v13, %v3507_v12  ;;  %v3435_v21 = vld [vmem:[#allocation3 + $0x80] sm:$0xf]  ;;  %v3372_v31 = vor.u32 %v4441_v18, %v3371_v17 }
  0x1a   :  { %1662 = vmatpush.bf16.msra.mxu1 %v3460_v57  ;;  %v4457_v22 = vld [vmem:[#allocation3 + $0x84] sm:$0xf0]  ;;  %v3499_v23 = vld [vmem:[#allocation3 + $0x100] sm:$0xf]  ;;  %v3572_v24 = vor.u32 %v4491_v15, %v3571_v14  ;;  %v3683_v28 = vld [vmem:[#allocation3 + $0x270] sm:$0xf] }
  0x1b   :  { %1675 = vmatpush.bf16.msra.mxu2 %v3524_v58  ;;  %v4473_v25 = vld [vmem:[#allocation3 + $0x104] sm:$0xf0]  ;;  %v3563_v26 = vld [vmem:[#allocation3 + $0x180] sm:$0xf]  ;;  %v4519_v29 = vld [vmem:[#allocation3 + $0x274] sm:$0xf0]  ;;  %v3436_v35 = vor.u32 %v4457_v22, %v3435_v21 }
  0x1c   :  { %1688 = vmatpush.bf16.msra.mxu3 %v3588_v62  ;;  %v4489_v27 = vld [vmem:[#allocation3 + $0x184] sm:$0xf0]  ;;  %v3747_v30 = vld [vmem:[#allocation3 + $0x2f0] sm:$0xf]  ;;  %v4535_v32 = vld [vmem:[#allocation3 + $0x2f4] sm:$0xf0]  ;;  %v3500_v36 = vor.u32 %v4473_v25, %v3499_v23  ;;  %v3684_v40 = vor.u32 %v4519_v29, %v3683_v28 }
  0x1d   :  { %1650 = vmatpush.bf16.msra.mxu0 %v3388_v4  ;;  %v3811_v33 = vld [vmem:[#allocation3 + $0x370] sm:$0xf]  ;;  %v4551_v34 = vld [vmem:[#allocation3 + $0x374] sm:$0xf0]  ;;  %v3564_v39 = vor.u32 %v4489_v27, %v3563_v26  ;;  %v3748_v41 = vor.u32 %v4535_v32, %v3747_v30  ;;  %v3675_v43 = vld [vmem:[#allocation3 + $0x260] sm:$0xf] }
  0x1e   :  { %1663 = vmatpush.bf16.msra.mxu1 %v3452_v5  ;;  %v3875_v37 = vld [vmem:[#allocation3 + $0x3f0] sm:$0xf]  ;;  %v4567_v38 = vld [vmem:[#allocation3 + $0x3f4] sm:$0xf0]  ;;  %v3812_v42 = vor.u32 %v4551_v34, %v3811_v33  ;;  %v4517_v44 = vld [vmem:[#allocation3 + $0x264] sm:$0xf0] }
  0x1f   :  { %1676 = vmatpush.bf16.msra.mxu2 %v3516_v6  ;;  %v3739_v45 = vld [vmem:[#allocation3 + $0x2e0] sm:$0xf]  ;;  %v3876_v46 = vor.u32 %v4567_v38, %v3875_v37  ;;  %v4533_v47 = vld [vmem:[#allocation3 + $0x2e4] sm:$0xf0]  ;;  %v3676_v52 = vor.u32 %v4517_v44, %v3675_v43  ;;  %v3667_v55 = vld [vmem:[#allocation3 + $0x250] sm:$0xf] }
  0x20   :  { %1689 = vmatpush.bf16.msra.mxu3 %v3580_v10  ;;  %v3803_v48 = vld [vmem:[#allocation3 + $0x360] sm:$0xf]  ;;  %v4549_v49 = vld [vmem:[#allocation3 + $0x364] sm:$0xf0]  ;;  %v3740_v53 = vor.u32 %v4533_v47, %v3739_v45  ;;  %v4515_v56 = vld [vmem:[#allocation3 + $0x254] sm:$0xf0] }
  0x21   :  { %1651 = vmatpush.bf16.msra.mxu0 %v3380_v16  ;;  %v3867_v50 = vld [vmem:[#allocation3 + $0x3e0] sm:$0xf]  ;;  %v4565_v51 = vld [vmem:[#allocation3 + $0x3e4] sm:$0xf0]  ;;  %v3804_v54 = vor.u32 %v4549_v49, %v3803_v48  ;;  %v3731_v57 = vld [vmem:[#allocation3 + $0x2d0] sm:$0xf]  ;;  %v3668_v0 = vor.u32 %v4515_v56, %v3667_v55 }
  0x22   :  { %1664 = vmatpush.bf16.msra.mxu1 %v3444_v19  ;;  %v3868_v58 = vor.u32 %v4565_v51, %v3867_v50  ;;  %v4531_v59 = vld [vmem:[#allocation3 + $0x2d4] sm:$0xf0]  ;;  %v3795_v60 = vld [vmem:[#allocation3 + $0x350] sm:$0xf]  ;;  %v3659_v1 = vld [vmem:[#allocation3 + $0x240] sm:$0xf] }
  0x23   :  { %1677 = vmatpush.bf16.msra.mxu2 %v3508_v20  ;;  %v4547_v61 = vld [vmem:[#allocation3 + $0x354] sm:$0xf0]  ;;  %v3859_v62 = vld [vmem:[#allocation3 + $0x3d0] sm:$0xf]  ;;  %v43_v2 = vld [vmem:[%s5376_s1] sm:$0xff]  ;;  %v3732_v3 = vor.u32 %v4531_v59, %v3731_v57  ;;  %vm2113_vm0 = vcmask 130048  }
  0x24   :  { %1690 = vmatpush.bf16.msra.mxu3 %v3572_v24  ;;  %v4563_v63 = vld [vmem:[#allocation3 + $0x3d4] sm:$0xf0]  ;;  %v3796_v4 = vor.u32 %v4547_v61, %v3795_v60  ;;  %v4513_v5 = vld [vmem:[#allocation3 + $0x244] sm:$0xf0]  ;;  %v3723_v6 = vld [vmem:[#allocation3 + $0x2c0] sm:$0xf] }
  0x25   :  { %1652 = vmatpush.bf16.msra.mxu0 %v3372_v31  ;;  %51 = vst [vmem:[#allocation1] ss:$4 sm:$0xff] %v43_v2  ;;  %v3860_v7 = vor.u32 %v4563_v63, %v3859_v62  ;;  %v4529_v8 = vld [vmem:[#allocation3 + $0x2c4] sm:$0xf0]  ;;  %v3787_v9 = vld [vmem:[#allocation3 + $0x340] sm:$0xf]  ;;  %v3660_v13 = vor.u32 %v4513_v5, %v3659_v1 }
  0x26   :  { %1665 = vmatpush.bf16.msra.mxu1 %v3436_v35  ;;  %v4545_v10 = vld [vmem:[#allocation3 + $0x344] sm:$0xf0]  ;;  %v3851_v11 = vld [vmem:[#allocation3 + $0x3c0] sm:$0xf]  ;;  %v3651_v14 = vld [vmem:[#allocation3 + $0x230] sm:$0xf]  ;;  %v3724_v16 = vor.u32 %v4529_v8, %v3723_v6 }
  0x27   :  { %1678 = vmatpush.bf16.msra.mxu2 %v3500_v36  ;;  %v4561_v12 = vld [vmem:[#allocation3 + $0x3c4] sm:$0xf0]  ;;  %v4511_v15 = vld [vmem:[#allocation3 + $0x234] sm:$0xf0]  ;;  %v3788_v17 = vor.u32 %v4545_v10, %v3787_v9  ;;  %v3715_v18 = vld [vmem:[#allocation3 + $0x2b0] sm:$0xf] }
  0x28   :  { %1691 = vmatpush.bf16.msra.mxu3 %v3564_v39  ;;  %v4527_v19 = vld [vmem:[#allocation3 + $0x2b4] sm:$0xf0]  ;;  %v3779_v20 = vld [vmem:[#allocation3 + $0x330] sm:$0xf]  ;;  %v3852_v21 = vor.u32 %v4561_v12, %v3851_v11  ;;  %v3643_v25 = vld [vmem:[#allocation3 + $0x220] sm:$0xf]  ;;  %v3652_v28 = vor.u32 %v4511_v15, %v3651_v14 }
  0x29   :  { %1697 = vmatpush.bf16.msrb.mxu0 %v3684_v40  ;;  %v4543_v22 = vld [vmem:[#allocation3 + $0x334] sm:$0xf0]  ;;  %v3843_v23 = vld [vmem:[#allocation3 + $0x3b0] sm:$0xf]  ;;  %v4509_v26 = vld [vmem:[#allocation3 + $0x224] sm:$0xf0]  ;;  %v3716_v29 = vor.u32 %v4527_v19, %v3715_v18 }
  0x2a   :  { %1710 = vmatpush.bf16.msrb.mxu1 %v3748_v41  ;;  %v4559_v24 = vld [vmem:[#allocation3 + $0x3b4] sm:$0xf0]  ;;  %v3707_v30 = vld [vmem:[#allocation3 + $0x2a0] sm:$0xf]  ;;  %v4525_v31 = vld [vmem:[#allocation3 + $0x2a4] sm:$0xf0]  ;;  %v3780_v34 = vor.u32 %v4543_v22, %v3779_v20 }
  0x2b   :  { %1723 = vmatpush.bf16.msrb.mxu2 %v3812_v42  ;;  %v45_v27 = vld [vmem:[%s5376_s1 + $0x10] sm:$0xff]  ;;  %v3844_v39 = vor.u32 %v4559_v24, %v3843_v23  ;;  %v3771_v40 = vld [vmem:[#allocation3 + $0x320] sm:$0xf]  ;;  %v4541_v41 = vld [vmem:[#allocation3 + $0x324] sm:$0xf0]  ;;  %v3708_v49 = vor.u32 %v4525_v31, %v3707_v30  ;;  %s4856_s28 = smov 96  }
  0x2c   :  { %1736 = vmatpush.bf16.msrb.mxu3 %v3876_v46  ;;  %v56_v32 = vld.sshfl [vmem:[#allocation1 + $0x10] sm:$0xff pattern:$0x73625140]  ;;  %v54_v33 = vld.sshfl [vmem:[#allocation1] sm:$0xff pattern:$0x73625140]  ;;  %v3644_v46 = vor.u32 %v4509_v26, %v3643_v25  ;;  %v3772_v50 = vor.u32 %v4541_v41, %v3771_v40 }
  0x2d   :  { %1698 = vmatpush.bf16.msrb.mxu0 %v3676_v52  ;;  %v4901_v35 = vpack.c.bf16 %v56_v32, %v56_v32  ;;  %v4903_v36 = vpack.c.bf16 %v54_v33, %v54_v33  ;;  %v57_v37 = vld.sshfl [vmem:[#allocation1 + $0x18] sm:$0xff pattern:$0x73625140]  ;;  %v55_v38 = vld.sshfl [vmem:[#allocation1 + $0x8] sm:$0xff pattern:$0x73625140] }
  0x2e   :  { %1711 = vmatpush.bf16.msrb.mxu1 %v3740_v53  ;;  %v4905_v42 = vpack.c.bf16 %v57_v37, %v57_v37  ;;  %62 = vst [vmem:[#allocation1] ss:$4 sm:$0xff] %v45_v27  ;;  %v4907_v43 = vpack.c.bf16 %v55_v38, %v55_v38  ;;  %v3835_v44 = vld [vmem:[#allocation3 + $0x3a0] sm:$0xf]  ;;  %v4557_v45 = vld [vmem:[#allocation3 + $0x3a4] sm:$0xf0] }
  0x2f   :  { %1724 = vmatpush.bf16.msrb.mxu2 %v3804_v54  ;;  %1653 = vmatmul.bf16.vlgmr.msra.gmra.mxu0 %v4903_v36  ;;  %v3635_v47 = vld [vmem:[#allocation3 + $0x210] sm:$0xf]  ;;  %v4507_v48 = vld [vmem:[#allocation3 + $0x214] sm:$0xf0]  ;;  %v3836_v54 = vor.u32 %v4557_v45, %v3835_v44  ;;  %v3627_v59 = vld [vmem:[#allocation3 + $0x200] sm:$0xf] }
  0x30   :  { %1737 = vmatpush.bf16.msrb.mxu3 %v3868_v58  ;;  %1679 = vmatmul.bf16.vlgmr.msra.gmra.mxu2 %v4901_v35  ;;  %v3699_v51 = vld [vmem:[#allocation3 + $0x290] sm:$0xf]  ;;  %v4523_v52 = vld [vmem:[#allocation3 + $0x294] sm:$0xf0]  ;;  %v3636_v60 = vor.u32 %v4507_v48, %v3635_v47  ;;  %v4505_v61 = vld [vmem:[#allocation3 + $0x204] sm:$0xf0] }
  0x31   :  { %1699 = vmatpush.bf16.msrb.mxu0 %v3668_v0  ;;  %1692 = vmatmul.bf16.vlgmr.msra.gmra.mxu3 %v4905_v42  ;;  %v3763_v53 = vld [vmem:[#allocation3 + $0x310] sm:$0xf]  ;;  %v4539_v55 = vld [vmem:[#allocation3 + $0x314] sm:$0xf0]  ;;  %v3691_v62 = vld [vmem:[#allocation3 + $0x280] sm:$0xf]  ;;  %v3700_v0 = vor.u32 %v4523_v52, %v3699_v51  ;;  %v3628_v12 = vor.u32 %v4505_v61, %v3627_v59 }
  0x32   :  { %1712 = vmatpush.bf16.msrb.mxu1 %v3732_v3  ;;  %v3827_v56 = vld [vmem:[#allocation3 + $0x390] sm:$0xf]  ;;  %v4555_v58 = vld [vmem:[#allocation3 + $0x394] sm:$0xf0]  ;;  %v4521_v63 = vld [vmem:[#allocation3 + $0x284] sm:$0xf0]  ;;  %v3764_v1 = vor.u32 %v4539_v55, %v3763_v53 }
  0x33   :  { %1725 = vmatpush.bf16.msrb.mxu2 %v3796_v4  ;;  %1666 = vmatmul.bf16.vlgmr.msra.gmra.mxu1 %v4907_v43  ;;  %v44_v57 = vld [vmem:[%s5376_s1 + $0x8] sm:$0xff]  ;;  %v3755_v2 = vld [vmem:[#allocation3 + $0x300] sm:$0xf]  ;;  %v4537_v3 = vld [vmem:[#allocation3 + $0x304] sm:$0xf0]  ;;  %v3828_v5 = vor.u32 %v4555_v58, %v3827_v56  ;;  %s4857_s29 = smov 16  }
  0x34   :  { %1738 = vmatpush.bf16.msrb.mxu3 %v3860_v7  ;;  %53 = vst [vmem:[#allocation1 + $0x20] ss:$4 sm:$0xff] %v44_v57  ;;  %v3819_v4 = vld [vmem:[#allocation3 + $0x380] sm:$0xf]  ;;  %v4553_v6 = vld [vmem:[#allocation3 + $0x384] sm:$0xf0] }
  0x35   :  { %1700 = vmatpush.bf16.msrb.mxu0 %v3660_v13  ;;  %v3939_v7 = vld [vmem:[#allocation3 + $0x470] sm:$0xf]  ;;  %v4583_v8 = vld [vmem:[#allocation3 + $0x474] sm:$0xf0]  ;;  %v3931_v18 = vld [vmem:[#allocation3 + $0x460] sm:$0xf] }
  0x36   :  { %1713 = vmatpush.bf16.msrb.mxu1 %v3724_v16  ;;  %v4003_v9 = vld [vmem:[#allocation3 + $0x4f0] sm:$0xf]  ;;  %v4599_v10 = vld [vmem:[#allocation3 + $0x4f4] sm:$0xf0]  ;;  %v3692_v16 = vor.u32 %v4521_v63, %v3691_v62  ;;  %v4581_v19 = vld [vmem:[#allocation3 + $0x464] sm:$0xf0]  ;;  %v3940_v22 = vor.u32 %v4583_v8, %v3939_v7 }
  0x37   :  { %1726 = vmatpush.bf16.msrb.mxu2 %v3788_v17  ;;  %v4067_v11 = vld [vmem:[#allocation3 + $0x570] sm:$0xf]  ;;  %v4615_v13 = vld [vmem:[#allocation3 + $0x574] sm:$0xf0]  ;;  %v3756_v17 = vor.u32 %v4537_v3, %v3755_v2  ;;  %v46_v20 = vld [vmem:[%s5376_s1 + $0x18] sm:$0xff]  ;;  %v4004_v27 = vor.u32 %v4599_v10, %v4003_v9  ;;  %v3932_v41 = vor.u32 %v4581_v19, %v3931_v18  ;;  %s4858_s30 = smov 32  }
  0x38   :  { %1739 = vmatpush.bf16.msrb.mxu3 %v3852_v21  ;;  %v4131_v14 = vld [vmem:[#allocation3 + $0x5f0] sm:$0xf]  ;;  %v4631_v15 = vld [vmem:[#allocation3 + $0x5f4] sm:$0xf0]  ;;  %v3820_v21 = vor.u32 %v4553_v6, %v3819_v4  ;;  %v3995_v23 = vld [vmem:[#allocation3 + $0x4e0] sm:$0xf] }
  0x39   :  { %1701 = vmatpush.bf16.msrb.mxu0 %v3652_v28  ;;  %v4597_v24 = vld [vmem:[#allocation3 + $0x4e4] sm:$0xf0]  ;;  %v4068_v28 = vor.u32 %v4615_v13, %v4067_v11  ;;  %v4132_v31 = vor.u32 %v4631_v15, %v4131_v14  ;;  %v4059_v32 = vld [vmem:[#allocation3 + $0x560] sm:$0xf]  ;;  %v3923_v47 = vld [vmem:[#allocation3 + $0x450] sm:$0xf] }
  0x3a   :  { %1714 = vmatpush.bf16.msrb.mxu1 %v3716_v29  ;;  %v4613_v33 = vld [vmem:[#allocation3 + $0x564] sm:$0xf0]  ;;  %v4123_v37 = vld [vmem:[#allocation3 + $0x5e0] sm:$0xf]  ;;  %v3996_v45 = vor.u32 %v4597_v24, %v3995_v23  ;;  %v4579_v48 = vld [vmem:[#allocation3 + $0x454] sm:$0xf0] }
  0x3b   :  { %1727 = vmatpush.bf16.msrb.mxu2 %v3780_v34  ;;  %v60_v25 = vld.sshfl [vmem:[#allocation1 + $0x30] sm:$0xff pattern:$0x73625140]  ;;  %v58_v26 = vld.sshfl [vmem:[#allocation1 + $0x20] sm:$0xff pattern:$0x73625140]  ;;  %v3924_v56 = vor.u32 %v4579_v48, %v3923_v47 }
  0x3c   :  { %1740 = vmatpush.bf16.msrb.mxu3 %v3844_v39  ;;  %v61_v29 = vld.sshfl [vmem:[#allocation1 + $0x38] sm:$0xff pattern:$0x73625140]  ;;  %v59_v30 = vld.sshfl [vmem:[#allocation1 + $0x28] sm:$0xff pattern:$0x73625140]  ;;  %v4919_v34 = vpack.c.bf16 %v60_v25, %v60_v25  ;;  %v4921_v39 = vpack.c.bf16 %v58_v26, %v58_v26 }
  0x3d   :  { %1702 = vmatpush.bf16.msrb.mxu0 %v3644_v46  ;;  %63 = vst [vmem:[#allocation1 + $0x20] ss:$4 sm:$0xff] %v46_v20  ;;  %v4629_v38 = vld [vmem:[#allocation3 + $0x5e4] sm:$0xf0]  ;;  %v4923_v40 = vpack.c.bf16 %v61_v29, %v61_v29  ;;  %v4925_v44 = vpack.c.bf16 %v59_v30, %v59_v30  ;;  %v4060_v46 = vor.u32 %v4613_v33, %v4059_v32  ;;  %v4595_v51 = vld [vmem:[#allocation3 + $0x4d4] sm:$0xf0] }
  0x3e   :  { %1715 = vmatpush.bf16.msrb.mxu1 %v3708_v49  ;;  %v3987_v49 = vld [vmem:[#allocation3 + $0x4d0] sm:$0xf]  ;;  %v4611_v53 = vld [vmem:[#allocation3 + $0x554] sm:$0xf0]  ;;  %v3915_v59 = vld [vmem:[#allocation3 + $0x440] sm:$0xf] }
  0x3f   :  { %1728 = vmatpush.bf16.msrb.mxu2 %v3772_v50  ;;  %v4124_v50 = vor.u32 %v4629_v38, %v4123_v37  ;;  %v4051_v52 = vld [vmem:[#allocation3 + $0x550] sm:$0xf]  ;;  %v4627_v55 = vld [vmem:[#allocation3 + $0x5d4] sm:$0xf0]  ;;  %v3988_v57 = vor.u32 %v4595_v51, %v3987_v49  ;;  %v3979_v61 = vld [vmem:[#allocation3 + $0x4c0] sm:$0xf] }
  0x40   :  { %1741 = vmatpush.bf16.msrb.mxu3 %v3836_v54  ;;  %v4115_v54 = vld [vmem:[#allocation3 + $0x5d0] sm:$0xf]  ;;  %v4052_v58 = vor.u32 %v4611_v53, %v4051_v52  ;;  %v4593_v63 = vld [vmem:[#allocation3 + $0x4c4] sm:$0xf0]  ;;  %v4107_v2 = vld [vmem:[#allocation3 + $0x5c0] sm:$0xf] }
  0x41   :  { %1703 = vmatpush.bf16.msrb.mxu0 %v3636_v60  ;;  %v4577_v60 = vld [vmem:[#allocation3 + $0x444] sm:$0xf0]  ;;  %v4116_v62 = vor.u32 %v4627_v55, %v4115_v54  ;;  %v3907_v7 = vld [vmem:[#allocation3 + $0x430] sm:$0xf]  ;;  %v4575_v8 = vld [vmem:[#allocation3 + $0x434] sm:$0xf0] }
  0x42   :  { %1716 = vmatpush.bf16.msrb.mxu1 %v3700_v0  ;;  %v4043_v0 = vld [vmem:[#allocation3 + $0x540] sm:$0xf]  ;;  %v4625_v3 = vld [vmem:[#allocation3 + $0x5c4] sm:$0xf0]  ;;  %v3916_v4 = vor.u32 %v4577_v60, %v3915_v59  ;;  %v3971_v9 = vld [vmem:[#allocation3 + $0x4b0] sm:$0xf] }
  0x43   :  { %1729 = vmatpush.bf16.msrb.mxu2 %v3764_v1  ;;  %v4609_v1 = vld [vmem:[#allocation3 + $0x544] sm:$0xf0]  ;;  %v4108_v10 = vor.u32 %v4625_v3, %v4107_v2  ;;  %v4591_v11 = vld [vmem:[#allocation3 + $0x4b4] sm:$0xf0]  ;;  %v4099_v14 = vld [vmem:[#allocation3 + $0x5b0] sm:$0xf] }
  0x44   :  { %1742 = vmatpush.bf16.msrb.mxu3 %v3828_v5  ;;  %v3980_v5 = vor.u32 %v4593_v63, %v3979_v61  ;;  %v4044_v6 = vor.u32 %v4609_v1, %v4043_v0  ;;  %v4607_v13 = vld [vmem:[#allocation3 + $0x534] sm:$0xf0]  ;;  %v3899_v19 = vld [vmem:[#allocation3 + $0x420] sm:$0xf]  ;;  %v4573_v20 = vld [vmem:[#allocation3 + $0x424] sm:$0xf0] }
  0x45   :  { %1704 = vmatpush.bf16.msrb.mxu0 %v3628_v12  ;;  %v4035_v12 = vld [vmem:[#allocation3 + $0x530] sm:$0xf]  ;;  %v4623_v15 = vld [vmem:[#allocation3 + $0x5b4] sm:$0xf0]  ;;  %v4589_v23 = vld [vmem:[#allocation3 + $0x4a4] sm:$0xf0] }
  0x46   :  { %1717 = vmatpush.bf16.msrb.mxu1 %v3692_v16  ;;  %v3908_v16 = vor.u32 %v4575_v8, %v3907_v7  ;;  %v4036_v18 = vor.u32 %v4607_v13, %v4035_v12  ;;  %v4027_v24 = vld [vmem:[#allocation3 + $0x520] sm:$0xf]  ;;  %v4605_v25 = vld [vmem:[#allocation3 + $0x524] sm:$0xf0]  ;;  %v4571_v32 = vld [vmem:[#allocation3 + $0x414] sm:$0xf0] }
  0x47   :  { %1730 = vmatpush.bf16.msrb.mxu2 %v3756_v17  ;;  %v3972_v17 = vor.u32 %v4591_v11, %v3971_v9  ;;  %v4091_v26 = vld [vmem:[#allocation3 + $0x5a0] sm:$0xf]  ;;  %v4028_v30 = vor.u32 %v4605_v25, %v4027_v24  ;;  %v3955_v33 = vld [vmem:[#allocation3 + $0x490] sm:$0xf]  ;;  %v4587_v38 = vld [vmem:[#allocation3 + $0x494] sm:$0xf0] }
  0x48   :  { %1743 = vmatpush.bf16.msrb.mxu3 %v3820_v21  ;;  %1705 = vmatmul.bf16.vlgmr.msrb.gmra.mxu0 %v4921_v39  ;;  %v3963_v21 = vld [vmem:[#allocation3 + $0x4a0] sm:$0xf]  ;;  %v4619_v47 = vld [vmem:[#allocation3 + $0x594] sm:$0xf0]  ;;  %v4585_v52 = vld [vmem:[#allocation3 + $0x484] sm:$0xf0]  ;;  %v3956_v53 = vor.u32 %v4587_v38, %v3955_v33 }
  0x49   :  { %1749 = vmatpush.bf16.msra.mxu0 %v3940_v22  ;;  %1718 = vmatmul.bf16.vlgmr.msrb.gmra.mxu1 %v4925_v44  ;;  %v4100_v22 = vor.u32 %v4623_v15, %v4099_v14  ;;  %v3964_v29 = vor.u32 %v4589_v23, %v3963_v21  ;;  %v3883_v48 = vld [vmem:[#allocation3 + $0x400] sm:$0xf]  ;;  %v4617_v59 = vld [vmem:[#allocation3 + $0x584] sm:$0xf0]  ;;  %v4195_v60 = vld [vmem:[#allocation3 + $0x670] sm:$0xf] }
  0x4a   :  { %1762 = vmatpush.bf16.msra.mxu1 %v4004_v27  ;;  %1731 = vmatmul.bf16.vlgmr.msrb.gmra.mxu2 %v4919_v34  ;;  %v4621_v27 = vld [vmem:[#allocation3 + $0x5a4] sm:$0xf0]  ;;  %v3947_v51 = vld [vmem:[#allocation3 + $0x480] sm:$0xf]  ;;  %v4647_v61 = vld [vmem:[#allocation3 + $0x674] sm:$0xf0] }
  0x4b   :  { %1775 = vmatpush.bf16.msra.mxu2 %v4068_v28  ;;  %1744 = vmatmul.bf16.vlgmr.msrb.gmra.mxu3 %v4923_v40  ;;  %v3900_v28 = vor.u32 %v4573_v20, %v3899_v19  ;;  %v4092_v37 = vor.u32 %v4621_v27, %v4091_v26  ;;  %v4011_v55 = vld [vmem:[#allocation3 + $0x500] sm:$0xf]  ;;  %v4663_v63 = vld [vmem:[#allocation3 + $0x6f4] sm:$0xf0]  ;;  %v4323_v0 = vld [vmem:[#allocation3 + $0x770] sm:$0xf] }
  0x4c   :  { %1788 = vmatpush.bf16.msra.mxu3 %v4132_v31  ;;  %v3891_v31 = vld [vmem:[#allocation3 + $0x410] sm:$0xf]  ;;  %v4679_v2 = vld [vmem:[#allocation3 + $0x774] sm:$0xf0]  ;;  %v4187_v15 = vld [vmem:[#allocation3 + $0x660] sm:$0xf] }
  0x4d   :  { %1750 = vmatpush.bf16.msra.mxu0 %v3932_v41  ;;  %v4019_v41 = vld [vmem:[#allocation3 + $0x510] sm:$0xf]  ;;  %v3892_v49 = vor.u32 %v4571_v32, %v3891_v31  ;;  %v64_v7 = vld.sshfl [vmem:[#allocation1] sm:$0xff pattern:$0x73625140]  ;;  %v4324_v14 = vor.u32 %v4679_v2, %v4323_v0  ;;  %s4859_s6 = smov 80  }
  0x4e   :  { %1763 = vmatpush.bf16.msra.mxu1 %v3996_v45  ;;  %v4603_v45 = vld [vmem:[#allocation3 + $0x514] sm:$0xf0]  ;;  %v4387_v3 = vld [vmem:[#allocation3 + $0x7f0] sm:$0xf]  ;;  %v4931_v19 = vpack.c.bf16 %v64_v7, %v64_v7  ;;  %v4661_v20 = vld [vmem:[#allocation3 + $0x6e4] sm:$0xf0] }
  0x4f   :  { %1776 = vmatpush.bf16.msra.mxu2 %v4060_v46  ;;  %v4083_v46 = vld [vmem:[#allocation3 + $0x590] sm:$0xf]  ;;  %v4020_v54 = vor.u32 %v4603_v45, %v4019_v41  ;;  %v66_v8 = vld.sshfl [vmem:[#allocation1 + $0x10] sm:$0xff pattern:$0x73625140]  ;;  %vm2207_vm5 = vcmask 123904  }
  0x50   :  { %1789 = vmatpush.bf16.msra.mxu3 %v4124_v50  ;;  %v4569_v50 = vld [vmem:[#allocation3 + $0x404] sm:$0xf0]  ;;  %v65_v11 = vld.sshfl [vmem:[#allocation1 + $0x8] sm:$0xff pattern:$0x73625140]  ;;  %v4933_v23 = vpack.c.bf16 %v66_v8, %v66_v8  ;;  %s4861_s21 = smov [#allocation6]  }
  0x51   :  { %1751 = vmatpush.bf16.msra.mxu0 %v3924_v56  ;;  %v4601_v56 = vld [vmem:[#allocation3 + $0x504] sm:$0xf0]  ;;  %v3884_v1 = vor.u32 %v4569_v50, %v3883_v48  ;;  %v67_v12 = vld.sshfl [vmem:[#allocation1 + $0x18] sm:$0xff pattern:$0x73625140]  ;;  %v4935_v24 = vpack.c.bf16 %v65_v11, %v65_v11  ;;  %s3358_s24 = sshll.u32 %s5380_s5, 4  ;;  %s3359_s24 = int_to_ptr.hbm [resolvable:$true] %s3358_s24 }
  0x52   :  { %1764 = vmatpush.bf16.msra.mxu1 %v3988_v57  ;;  %v4075_v57 = vld [vmem:[#allocation3 + $0x580] sm:$0xf]  ;;  %v4693_v26 = vld [vmem:[#allocation3 + $0x7e4] sm:$0xf0]  ;;  %v4937_v27 = vpack.c.bf16 %v67_v12, %v67_v12  ;;  %v4179_v31 = vld [vmem:[#allocation3 + $0x650] sm:$0xf] }
  0x53   :  { %1777 = vmatpush.bf16.msra.mxu2 %v4052_v58  ;;  %v4084_v58 = vor.u32 %v4619_v47, %v4083_v46  ;;  %v4076_v9 = vor.u32 %v4617_v59, %v4075_v57  ;;  %v4315_v21 = vld [vmem:[#allocation3 + $0x760] sm:$0xf]  ;;  %v4643_v32 = vld [vmem:[#allocation3 + $0x654] sm:$0xf0]  ;;  %v4243_v33 = vld [vmem:[#allocation3 + $0x6d0] sm:$0xf] }
  0x54   :  { %1790 = vmatpush.bf16.msra.mxu3 %v4116_v62  ;;  %v4259_v62 = vld [vmem:[#allocation3 + $0x6f0] sm:$0xf]  ;;  %v4379_v25 = vld [vmem:[#allocation3 + $0x7e0] sm:$0xf]  ;;  %v4659_v38 = vld [vmem:[#allocation3 + $0x6d4] sm:$0xf0]  ;;  %v4180_v48 = vor.u32 %v4643_v32, %v4179_v31 }
  0x55   :  { %1752 = vmatpush.bf16.msra.mxu0 %v3916_v4  ;;  %v4695_v4 = vld [vmem:[#allocation3 + $0x7f4] sm:$0xf0]  ;;  %v4260_v13 = vor.u32 %v4663_v63, %v4259_v62  ;;  %v4307_v41 = vld [vmem:[#allocation3 + $0x750] sm:$0xf]  ;;  %v4673_v57 = vld [vmem:[#allocation3 + $0x744] sm:$0xf0] }
  0x56   :  { %1765 = vmatpush.bf16.msra.mxu1 %v3980_v5  ;;  %v3948_v5 = vor.u32 %v4585_v52, %v3947_v51  ;;  %v4675_v45 = vld [vmem:[#allocation3 + $0x754] sm:$0xf0]  ;;  %v4371_v46 = vld [vmem:[#allocation3 + $0x7d0] sm:$0xf]  ;;  %v4171_v51 = vld [vmem:[#allocation3 + $0x640] sm:$0xf] }
  0x57   :  { %1778 = vmatpush.bf16.msra.mxu2 %v4044_v6  ;;  %v4012_v6 = vor.u32 %v4601_v56, %v4011_v55  ;;  %v4691_v47 = vld [vmem:[#allocation3 + $0x7d4] sm:$0xf0]  ;;  %v4308_v50 = vor.u32 %v4675_v45, %v4307_v41  ;;  %v4641_v52 = vld [vmem:[#allocation3 + $0x644] sm:$0xf0]  ;;  %v4299_v56 = vld [vmem:[#allocation3 + $0x740] sm:$0xf] }
  0x58   :  { %1791 = vmatpush.bf16.msra.mxu3 %v4108_v10  ;;  %v4196_v10 = vor.u32 %v4647_v61, %v4195_v60  ;;  %v4657_v55 = vld [vmem:[#allocation3 + $0x6c4] sm:$0xf0]  ;;  %v4172_v60 = vor.u32 %v4641_v52, %v4171_v51  ;;  %v4300_v62 = vor.u32 %v4673_v57, %v4299_v56  ;;  %v4163_v63 = vld [vmem:[#allocation3 + $0x630] sm:$0xf]  ;;  %v4639_v0 = vld [vmem:[#allocation3 + $0x634] sm:$0xf0] }
  0x59   :  { %1753 = vmatpush.bf16.msra.mxu0 %v3908_v16  ;;  %v4645_v16 = vld [vmem:[#allocation3 + $0x664] sm:$0xf0]  ;;  %v4687_v7 = vld [vmem:[#allocation3 + $0x7b4] sm:$0xf0]  ;;  %v4164_v8 = vor.u32 %v4639_v0, %v4163_v63  ;;  %v4155_v11 = vld [vmem:[#allocation3 + $0x620] sm:$0xf] }
  0x5a   :  { %1766 = vmatpush.bf16.msra.mxu1 %v3972_v17  ;;  %v4251_v17 = vld [vmem:[#allocation3 + $0x6e0] sm:$0xf]  ;;  %v4689_v59 = vld [vmem:[#allocation3 + $0x7c4] sm:$0xf0]  ;;  %v4275_v31 = vld [vmem:[#allocation3 + $0x710] sm:$0xf] }
  0x5b   :  { %1779 = vmatpush.bf16.msra.mxu2 %v4036_v18  ;;  %v4388_v18 = vor.u32 %v4695_v4, %v4387_v3  ;;  %v4655_v3 = vld [vmem:[#allocation3 + $0x6b4] sm:$0xf0]  ;;  %v4291_v4 = vld [vmem:[#allocation3 + $0x730] sm:$0xf]  ;;  %v4637_v12 = vld [vmem:[#allocation3 + $0x624] sm:$0xf0] }
  0x5c   :  { %1792 = vmatpush.bf16.msra.mxu3 %v4100_v22  ;;  %v4677_v22 = vld [vmem:[#allocation3 + $0x764] sm:$0xf0]  ;;  %v4139_v41 = vld [vmem:[#allocation3 + $0x600] sm:$0xf]  ;;  %v3429_v56 = vld [vmem:[#allocation3 + $0x78] sm:$0xf0] }
  0x5d   :  { %1754 = vmatpush.bf16.msra.mxu0 %v3900_v28  ;;  %v4188_v28 = vor.u32 %v4645_v16, %v4187_v15  ;;  %v4653_v15 = vld [vmem:[#allocation3 + $0x6a4] sm:$0xf0]  ;;  %v4283_v16 = vld [vmem:[#allocation3 + $0x720] sm:$0xf]  ;;  %v4502_v63 = vld [vmem:[#allocation3 + $0x1f4] sm:$0xf] }
  0x5e   :  { %1767 = vmatpush.bf16.msra.mxu1 %v3964_v29  ;;  %v4252_v29 = vor.u32 %v4661_v20, %v4251_v17  ;;  %v4669_v17 = vld [vmem:[#allocation3 + $0x724] sm:$0xf0]  ;;  %v3621_v0 = vld [vmem:[#allocation3 + $0x1f8] sm:$0xf0] }
  0x5f   :  { %1780 = vmatpush.bf16.msra.mxu2 %v4028_v30  ;;  %v4316_v30 = vor.u32 %v4677_v22, %v4315_v21  ;;  %v4685_v20 = vld [vmem:[#allocation3 + $0x7a4] sm:$0xf0]  ;;  %v4156_v21 = vor.u32 %v4637_v12, %v4155_v11  ;;  %v4147_v22 = vld [vmem:[#allocation3 + $0x610] sm:$0xf]  ;;  %v4452_v11 = vld [vmem:[#allocation3 + $0x64] sm:$0xf] }
  0x60   :  { %1793 = vmatpush.bf16.msra.mxu3 %v4092_v37  ;;  %v4380_v37 = vor.u32 %v4693_v26, %v4379_v25  ;;  %v4635_v25 = vld [vmem:[#allocation3 + $0x614] sm:$0xf0]  ;;  %v4633_v45 = vld [vmem:[#allocation3 + $0x604] sm:$0xf0]  ;;  %v3421_v12 = vld [vmem:[#allocation3 + $0x68] sm:$0xf0] }
  0x61   :  { %1755 = vmatpush.bf16.msra.mxu0 %v3892_v49  ;;  %v4244_v49 = vor.u32 %v4659_v38, %v4243_v33  ;;  %v4667_v33 = vld [vmem:[#allocation3 + $0x714] sm:$0xf0] }
  0x62   :  { %1768 = vmatpush.bf16.msra.mxu1 %v3956_v53  ;;  %v4235_v53 = vld [vmem:[#allocation3 + $0x6c0] sm:$0xf]  ;;  %v4683_v38 = vld [vmem:[#allocation3 + $0x794] sm:$0xf0]  ;;  %v4276_v52 = vor.u32 %v4667_v33, %v4275_v31  ;;  %v4466_v33 = vld [vmem:[#allocation3 + $0xd4] sm:$0xf] }
  0x63   :  { %1781 = vmatpush.bf16.msra.mxu2 %v4020_v54  ;;  %v4372_v54 = vor.u32 %v4691_v47, %v4371_v46  ;;  %v4236_v61 = vor.u32 %v4657_v55, %v4235_v53  ;;  %v4148_v46 = vor.u32 %v4635_v25, %v4147_v22  ;;  %v4203_v47 = vld [vmem:[#allocation3 + $0x680] sm:$0xf]  ;;  %v4454_v55 = vld [vmem:[#allocation3 + $0x74] sm:$0xf]  ;;  %v4500_v22 = vld [vmem:[#allocation3 + $0x1e4] sm:$0xf] }
  0x64   :  { %1794 = vmatpush.bf16.msra.mxu3 %v4084_v58  ;;  %v4363_v58 = vld [vmem:[#allocation3 + $0x7c0] sm:$0xf]  ;;  %v3613_v25 = vld [vmem:[#allocation3 + $0x1e8] sm:$0xf0] }
  0x65   :  { %1756 = vmatpush.bf16.msra.mxu0 %v3884_v1  ;;  %v4227_v1 = vld [vmem:[#allocation3 + $0x6b0] sm:$0xf]  ;;  %v4364_v2 = vor.u32 %v4689_v59, %v4363_v58  ;;  %v4331_v53 = vld [vmem:[#allocation3 + $0x780] sm:$0xf]  ;;  %v4470_v58 = vld [vmem:[#allocation3 + $0xf4] sm:$0xf] }
  0x66   :  { %1769 = vmatpush.bf16.msra.mxu1 %v3948_v5  ;;  %v4671_v5 = vld [vmem:[#allocation3 + $0x734] sm:$0xf0]  ;;  %v3493_v59 = vld [vmem:[#allocation3 + $0xf8] sm:$0xf0] }
  0x67   :  { %1782 = vmatpush.bf16.msra.mxu2 %v4012_v6  ;;  %v4355_v6 = vld [vmem:[#allocation3 + $0x7b0] sm:$0xf] }
  0x68   :  { %1795 = vmatpush.bf16.msra.mxu3 %v4076_v9  ;;  %1757 = vmatmul.bf16.vlgmr.msra.gmra.mxu0 %v4931_v19  ;;  %v4228_v9 = vor.u32 %v4655_v3, %v4227_v1  ;;  %v68_v3 = vld.sshfl [vmem:[#allocation1 + $0x20] sm:$0xff pattern:$0x73625140] }
  0x69   :  { %1801 = vmatpush.bf16.msrb.mxu0 %v4196_v10  ;;  %1770 = vmatmul.bf16.vlgmr.msra.gmra.mxu1 %v4935_v24  ;;  %v4292_v10 = vor.u32 %v4671_v5, %v4291_v4  ;;  %v70_v4 = vld.sshfl [vmem:[#allocation1 + $0x30] sm:$0xff pattern:$0x73625140] }
  0x6a   :  { %1814 = vmatpush.bf16.msrb.mxu1 %v4260_v13  ;;  %1783 = vmatmul.bf16.vlgmr.msra.gmra.mxu2 %v4933_v23  ;;  %v4219_v13 = vld [vmem:[#allocation3 + $0x6a0] sm:$0xf] }
  0x6b   :  { %1827 = vmatpush.bf16.msrb.mxu2 %v4324_v14  ;;  %1796 = vmatmul.bf16.vlgmr.msra.gmra.mxu3 %v4937_v27  ;;  %v4356_v14 = vor.u32 %v4687_v7, %v4355_v6  ;;  %v4220_v26 = vor.u32 %v4653_v15, %v4219_v13  ;;  %v3432_v6 = vor.u32 %v4454_v55, %v3429_v56  ;;  %v69_v7 = vld.sshfl [vmem:[#allocation1 + $0x28] sm:$0xff pattern:$0x73625140]  ;;  %v4468_v13 = vld [vmem:[#allocation3 + $0xe4] sm:$0xf] }
  0x6c   :  { %1840 = vmatpush.bf16.msrb.mxu3 %v4388_v18  ;;  %v4347_v18 = vld [vmem:[#allocation3 + $0x7a0] sm:$0xf]  ;;  %v4943_v15 = vpack.c.bf16 %v68_v3, %v68_v3  ;;  %v3469_v55 = vld [vmem:[#allocation3 + $0xc8] sm:$0xf0]  ;;  %v4480_v56 = vld [vmem:[#allocation3 + $0x144] sm:$0xf] }
  0x6d   :  { %1802 = vmatpush.bf16.msrb.mxu0 %v4188_v28  ;;  %v4284_v28 = vor.u32 %v4669_v17, %v4283_v16  ;;  %v4348_v32 = vor.u32 %v4685_v20, %v4347_v18  ;;  %v3485_v16 = vld [vmem:[#allocation3 + $0xe8] sm:$0xf0]  ;;  %v4484_v17 = vld [vmem:[#allocation3 + $0x164] sm:$0xf]  ;;  %v4945_v20 = vpack.c.bf16 %v70_v4, %v70_v4  ;;  %v3461_v3 = vld [vmem:[#allocation3 + $0xb8] sm:$0xf0] }
  0x6e   :  { %1815 = vmatpush.bf16.msrb.mxu1 %v4252_v29  ;;  %v4211_v29 = vld [vmem:[#allocation3 + $0x690] sm:$0xf]  ;;  %v3549_v18 = vld [vmem:[#allocation3 + $0x168] sm:$0xf0]  ;;  %v3488_v31 = vor.u32 %v4468_v13, %v3485_v16  ;;  %v4478_v4 = vld [vmem:[#allocation3 + $0x134] sm:$0xf] }
  0x6f   :  { %1828 = vmatpush.bf16.msrb.mxu2 %v4316_v30  ;;  %v4651_v30 = vld [vmem:[#allocation3 + $0x694] sm:$0xf0]  ;;  %v4460_v13 = vld [vmem:[#allocation3 + $0xa4] sm:$0xf]  ;;  %v3453_v16 = vld [vmem:[#allocation3 + $0xa8] sm:$0xf0] }
  0x70   :  { %1841 = vmatpush.bf16.msrb.mxu3 %v4380_v37  ;;  %v4339_v37 = vld [vmem:[#allocation3 + $0x790] sm:$0xf]  ;;  %v4212_v51 = vor.u32 %v4651_v30, %v4211_v29  ;;  %v4450_v29 = vld [vmem:[#allocation3 + $0x54] sm:$0xf]  ;;  %v3413_v30 = vld [vmem:[#allocation3 + $0x58] sm:$0xf0] }
  0x71   :  { %1803 = vmatpush.bf16.msrb.mxu0 %v4180_v48  ;;  %v4649_v48 = vld [vmem:[#allocation3 + $0x684] sm:$0xf0]  ;;  %v4340_v57 = vor.u32 %v4683_v38, %v4339_v37  ;;  %v3477_v37 = vld [vmem:[#allocation3 + $0xd8] sm:$0xf0]  ;;  %v4482_v38 = vld [vmem:[#allocation3 + $0x154] sm:$0xf] }
  0x72   :  { %1816 = vmatpush.bf16.msrb.mxu1 %v4244_v49  ;;  %v4267_v49 = vld [vmem:[#allocation3 + $0x700] sm:$0xf]  ;;  %v4204_v1 = vor.u32 %v4649_v48, %v4203_v47  ;;  %v3605_v47 = vld [vmem:[#allocation3 + $0x1d8] sm:$0xf0]  ;;  %v3416_v48 = vor.u32 %v4450_v29, %v3413_v30  ;;  %v3456_v29 = vor.u32 %v4460_v13, %v3453_v16  ;;  %v4532_v13 = vld [vmem:[#allocation3 + $0x2e4] sm:$0xf] }
  0x73   :  { %1829 = vmatpush.bf16.msrb.mxu2 %v4308_v50  ;;  %v4665_v50 = vld [vmem:[#allocation3 + $0x704] sm:$0xf0]  ;;  %v3741_v16 = vld [vmem:[#allocation3 + $0x2e8] sm:$0xf0] }
  0x74   :  { %1842 = vmatpush.bf16.msrb.mxu3 %v4372_v54  ;;  %v4681_v54 = vld [vmem:[#allocation3 + $0x784] sm:$0xf0] }
  0x75   :  { %1804 = vmatpush.bf16.msrb.mxu0 %v4172_v60  ;;  %v4486_v60 = vld [vmem:[#allocation3 + $0x174] sm:$0xf]  ;;  %v4332_v5 = vor.u32 %v4681_v54, %v4331_v53  ;;  %v4464_v53 = vld [vmem:[#allocation3 + $0xc4] sm:$0xf] }
  0x76   :  { %1817 = vmatpush.bf16.msrb.mxu1 %v4236_v61  ;;  %v3557_v61 = vld [vmem:[#allocation3 + $0x178] sm:$0xf0] }
  0x77   :  { %1830 = vmatpush.bf16.msrb.mxu2 %v4300_v62  ;;  %v4140_v62 = vor.u32 %v4633_v45, %v4139_v41  ;;  %v3616_v41 = vor.u32 %v4500_v22, %v3613_v25  ;;  %v3541_v45 = vld [vmem:[#allocation3 + $0x158] sm:$0xf0]  ;;  %v4492_v22 = vld [vmem:[#allocation3 + $0x1a4] sm:$0xf]  ;;  %v3581_v25 = vld [vmem:[#allocation3 + $0x1a8] sm:$0xf0] }
  0x78   :  { %1843 = vmatpush.bf16.msrb.mxu3 %v4364_v2  ;;  %v4268_v2 = vor.u32 %v4665_v50, %v4267_v49  ;;  %v3480_v49 = vor.u32 %v4466_v33, %v3477_v37  ;;  %v3544_v50 = vor.u32 %v4482_v38, %v3541_v45  ;;  %v4458_v33 = vld [vmem:[#allocation3 + $0x94] sm:$0xf]  ;;  %v3584_v37 = vor.u32 %v4492_v22, %v3581_v25  ;;  %v3445_v38 = vld [vmem:[#allocation3 + $0x98] sm:$0xf0]  ;;  %v4564_v22 = vld [vmem:[#allocation3 + $0x3e4] sm:$0xf] }
  0x79   :  { %1805 = vmatpush.bf16.msrb.mxu0 %v4164_v8  ;;  %v71_v8 = vld.sshfl [vmem:[#allocation1 + $0x38] sm:$0xff pattern:$0x73625140]  ;;  %v3509_v45 = vld [vmem:[#allocation3 + $0x118] sm:$0xf0] }
  0x7a   :  { %1818 = vmatpush.bf16.msrb.mxu1 %v4228_v9  ;;  %v3496_v9 = vor.u32 %v4470_v58, %v3493_v59  ;;  %v4496_v58 = vld [vmem:[#allocation3 + $0x1c4] sm:$0xf]  ;;  %v3597_v59 = vld [vmem:[#allocation3 + $0x1c8] sm:$0xf0] }
  0x7b   :  { %1831 = vmatpush.bf16.msrb.mxu2 %v4292_v10  ;;  %v3560_v10 = vor.u32 %v4486_v60, %v3557_v61  ;;  %v3472_v61 = vor.u32 %v4464_v53, %v3469_v55  ;;  %v4456_v53 = vld [vmem:[#allocation3 + $0x84] sm:$0xf]  ;;  %v3869_v25 = vld [vmem:[#allocation3 + $0x3e8] sm:$0xf0] }
  0x7c   :  { %1844 = vmatpush.bf16.msrb.mxu3 %v4356_v14  ;;  %v3624_v14 = vor.u32 %v4502_v63, %v3621_v0  ;;  %v4446_v63 = vld [vmem:[#allocation3 + $0x34] sm:$0xf]  ;;  %v3397_v0 = vld [vmem:[#allocation3 + $0x38] sm:$0xf0]  ;;  %v4472_v55 = vld [vmem:[#allocation3 + $0x104] sm:$0xf] }
  0x7d   :  { %1806 = vmatpush.bf16.msrb.mxu0 %v4156_v21  ;;  %v4947_v21 = vpack.c.bf16 %v69_v7, %v69_v7  ;;  %v3589_v7 = vld [vmem:[#allocation3 + $0x1b8] sm:$0xf0] }
  0x7e   :  { %1819 = vmatpush.bf16.msrb.mxu1 %v4220_v26  ;;  %v4949_v26 = vpack.c.bf16 %v71_v8, %v71_v8  ;;  %v3400_v8 = vor.u32 %v4446_v63, %v3397_v0  ;;  %v3749_v0 = vld [vmem:[#allocation3 + $0x2f8] sm:$0xf0] }
  0x7f   :  { %1832 = vmatpush.bf16.msrb.mxu2 %v4284_v28  ;;  %v3424_v28 = vor.u32 %v4452_v11, %v3421_v12  ;;  %v4444_v11 = vld [vmem:[#allocation3 + $0x24] sm:$0xf]  ;;  %v3389_v12 = vld [vmem:[#allocation3 + $0x28] sm:$0xf0] }
  0x80   :  { %1845 = vmatpush.bf16.msrb.mxu3 %v4348_v32  ;;  %v3552_v32 = vor.u32 %v4484_v17, %v3549_v18  ;;  %v4476_v17 = vld [vmem:[#allocation3 + $0x124] sm:$0xf]  ;;  %v3517_v18 = vld [vmem:[#allocation3 + $0x128] sm:$0xf0] }
  0x81   :  { %1807 = vmatpush.bf16.msrb.mxu0 %v4148_v46  ;;  %v4498_v46 = vld [vmem:[#allocation3 + $0x1d4] sm:$0xf]  ;;  %v3520_v30 = vor.u32 %v4476_v17, %v3517_v18  ;;  %v4548_v17 = vld [vmem:[#allocation3 + $0x364] sm:$0xf]  ;;  %v3805_v18 = vld [vmem:[#allocation3 + $0x368] sm:$0xf0] }
  0x82   :  { %1820 = vmatpush.bf16.msrb.mxu1 %v4212_v51  ;;  %v4448_v51 = vld [vmem:[#allocation3 + $0x44] sm:$0xf]  ;;  %v3608_v54 = vor.u32 %v4498_v46, %v3605_v47  ;;  %v4490_v46 = vld [vmem:[#allocation3 + $0x194] sm:$0xf]  ;;  %v3573_v47 = vld [vmem:[#allocation3 + $0x198] sm:$0xf0] }
  0x83   :  { %1833 = vmatpush.bf16.msrb.mxu2 %v4276_v52  ;;  %v3405_v52 = vld [vmem:[#allocation3 + $0x48] sm:$0xf0] }
  0x84   :  { %1846 = vmatpush.bf16.msrb.mxu3 %v4340_v57  ;;  %v3533_v57 = vld [vmem:[#allocation3 + $0x148] sm:$0xf0]  ;;  %v3408_v60 = vor.u32 %v4448_v51, %v3405_v52  ;;  %v3448_v51 = vor.u32 %v4458_v33, %v3445_v38  ;;  %v4530_v33 = vld [vmem:[#allocation3 + $0x2d4] sm:$0xf]  ;;  %v3733_v38 = vld [vmem:[#allocation3 + $0x2d8] sm:$0xf0] }
  0x85   :  { %1808 = vmatpush.bf16.msrb.mxu0 %v4140_v62  ;;  %v3536_v62 = vor.u32 %v4480_v56, %v3533_v57  ;;  %v3576_v56 = vor.u32 %v4490_v46, %v3573_v47  ;;  %v3501_v57 = vld [vmem:[#allocation3 + $0x108] sm:$0xf0]  ;;  %v4562_v46 = vld [vmem:[#allocation3 + $0x3d4] sm:$0xf]  ;;  %v3861_v47 = vld [vmem:[#allocation3 + $0x3d8] sm:$0xf0] }
  0x86   :  { %1821 = vmatpush.bf16.msrb.mxu1 %v4204_v1  ;;  %v4462_v1 = vld [vmem:[#allocation3 + $0xb4] sm:$0xf] }
  0x87   :  { %1834 = vmatpush.bf16.msrb.mxu2 %v4268_v2  ;;  %v3600_v2 = vor.u32 %v4496_v58, %v3597_v59  ;;  %v4488_v58 = vld [vmem:[#allocation3 + $0x184] sm:$0xf]  ;;  %v3565_v59 = vld [vmem:[#allocation3 + $0x188] sm:$0xf0] }
  0x88   :  { %1847 = vmatpush.bf16.msrb.mxu3 %v4332_v5  ;;  %1809 = vmatmul.bf16.vlgmr.msrb.gmra.mxu0 %v4943_v15  ;;  %v3525_v5 = vld [vmem:[#allocation3 + $0x138] sm:$0xf0] }
  0x89   :  { %1853 = vmatpush.bf16.msra.mxu0 %v3432_v6  ;;  %1822 = vmatmul.bf16.vlgmr.msrb.gmra.mxu1 %v4947_v21  ;;  %v4494_v6 = vld [vmem:[#allocation3 + $0x1b4] sm:$0xf] }
  0x8a   :  { %1866 = vmatpush.bf16.msra.mxu1 %v3496_v9  ;;  %1835 = vmatmul.bf16.vlgmr.msrb.gmra.mxu2 %v4945_v20  ;;  %v3464_v9 = vor.u32 %v4462_v1, %v3461_v3  ;;  %v4550_v1 = vld [vmem:[#allocation3 + $0x374] sm:$0xf] }
  0x8b   :  { %1879 = vmatpush.bf16.msra.mxu2 %v3560_v10  ;;  %1848 = vmatmul.bf16.vlgmr.msrb.gmra.mxu3 %v4949_v26  ;;  %v3528_v10 = vor.u32 %v4478_v4, %v3525_v5  ;;  %v3504_v4 = vor.u32 %v4472_v55, %v3501_v57  ;;  %v4566_v5 = vld [vmem:[#allocation3 + $0x3f4] sm:$0xf]  ;;  %v4544_v55 = vld [vmem:[#allocation3 + $0x344] sm:$0xf] }
  0x8c   :  { %1892 = vmatpush.bf16.msra.mxu3 %v3624_v14  ;;  %v3592_v14 = vor.u32 %v4494_v6, %v3589_v7  ;;  %v3877_v6 = vld [vmem:[#allocation3 + $0x3f8] sm:$0xf0]  ;;  %v3568_v7 = vor.u32 %v4488_v58, %v3565_v59  ;;  %v4560_v57 = vld [vmem:[#allocation3 + $0x3c4] sm:$0xf]  ;;  %v4510_v59 = vld [vmem:[#allocation3 + $0x234] sm:$0xf] }
  0x8d   :  { %1854 = vmatpush.bf16.msra.mxu0 %v3424_v28  ;;  %v3392_v28 = vor.u32 %v4444_v11, %v3389_v12  ;;  %v4516_v11 = vld [vmem:[#allocation3 + $0x264] sm:$0xf]  ;;  %v3677_v12 = vld [vmem:[#allocation3 + $0x268] sm:$0xf0] }
  0x8e   :  { %1867 = vmatpush.bf16.msra.mxu1 %v3488_v31  ;;  %v4442_v31 = vld [vmem:[#allocation3 + $0x14] sm:$0xf] }
  0x8f   :  { %1880 = vmatpush.bf16.msra.mxu2 %v3552_v32  ;;  %v3381_v32 = vld [vmem:[#allocation3 + $0x18] sm:$0xf0] }
  0x90   :  { %1893 = vmatpush.bf16.msra.mxu3 %v3616_v41  ;;  %v4474_v41 = vld [vmem:[#allocation3 + $0x114] sm:$0xf] }
  0x91   :  { %1855 = vmatpush.bf16.msra.mxu0 %v3416_v48  ;;  %v3384_v48 = vor.u32 %v4442_v31, %v3381_v32  ;;  %v3512_v52 = vor.u32 %v4474_v41, %v3509_v45  ;;  %v4514_v31 = vld [vmem:[#allocation3 + $0x254] sm:$0xf]  ;;  %v3669_v32 = vld [vmem:[#allocation3 + $0x258] sm:$0xf0] }
  0x92   :  { %1868 = vmatpush.bf16.msra.mxu1 %v3480_v49  ;;  %v4440_v49 = vld [vmem:[#allocation3 + $0x4] sm:$0xf]  ;;  %v4546_v41 = vld [vmem:[#allocation3 + $0x354] sm:$0xf]  ;;  %v3797_v45 = vld [vmem:[#allocation3 + $0x358] sm:$0xf0] }
  0x93   :  { %1881 = vmatpush.bf16.msra.mxu2 %v3544_v50  ;;  %v3373_v50 = vld [vmem:[#allocation3 + $0x8] sm:$0xf0] }
  0x94   :  { %1894 = vmatpush.bf16.msra.mxu3 %v3608_v54  ;;  %v3437_v54 = vld [vmem:[#allocation3 + $0x88] sm:$0xf0]  ;;  %v3376_v63 = vor.u32 %v4440_v49, %v3373_v50  ;;  %v3736_v49 = vor.u32 %v4530_v33, %v3733_v38  ;;  %v3800_v50 = vor.u32 %v4546_v41, %v3797_v45  ;;  %v3765_v33 = vld [vmem:[#allocation3 + $0x318] sm:$0xf0]  ;;  %v4504_v45 = vld [vmem:[#allocation3 + $0x204] sm:$0xf] }
  0x95   :  { %1856 = vmatpush.bf16.msra.mxu0 %v3408_v60  ;;  %v4518_v60 = vld [vmem:[#allocation3 + $0x274] sm:$0xf]  ;;  %v3440_v3 = vor.u32 %v4456_v53, %v3437_v54  ;;  %v4528_v53 = vld [vmem:[#allocation3 + $0x2c4] sm:$0xf]  ;;  %v3864_v54 = vor.u32 %v4562_v46, %v3861_v47  ;;  %v3829_v38 = vld [vmem:[#allocation3 + $0x398] sm:$0xf0] }
  0x96   :  { %1869 = vmatpush.bf16.msra.mxu1 %v3472_v61  ;;  %v3685_v61 = vld [vmem:[#allocation3 + $0x278] sm:$0xf0]  ;;  %v3629_v46 = vld [vmem:[#allocation3 + $0x208] sm:$0xf0] }
  0x97   :  { %1882 = vmatpush.bf16.msra.mxu2 %v3536_v62  ;;  %v4534_v62 = vld [vmem:[#allocation3 + $0x2f4] sm:$0xf] }
  0x98   :  { %1895 = vmatpush.bf16.msra.mxu3 %v3600_v2  ;;  %v3813_v2 = vld [vmem:[#allocation3 + $0x378] sm:$0xf0] }
  0x99   :  { %1857 = vmatpush.bf16.msra.mxu0 %v3400_v8  ;;  %v3688_v8 = vor.u32 %v4518_v60, %v3685_v61  ;;  %v3653_v60 = vld [vmem:[#allocation3 + $0x238] sm:$0xf0]  ;;  %v4526_v61 = vld [vmem:[#allocation3 + $0x2b4] sm:$0xf] }
  0x9a   :  { %1870 = vmatpush.bf16.msra.mxu1 %v3464_v9  ;;  %v3752_v9 = vor.u32 %v4534_v62, %v3749_v0  ;;  %v4542_v0 = vld [vmem:[#allocation3 + $0x334] sm:$0xf] }
  0x9b   :  { %1883 = vmatpush.bf16.msra.mxu2 %v3528_v10  ;;  %v3816_v10 = vor.u32 %v4550_v1, %v3813_v2  ;;  %v3781_v1 = vld [vmem:[#allocation3 + $0x338] sm:$0xf0]  ;;  %v4558_v2 = vld [vmem:[#allocation3 + $0x3b4] sm:$0xf] }
  0x9c   :  { %1896 = vmatpush.bf16.msra.mxu3 %v3592_v14  ;;  %v3880_v14 = vor.u32 %v4566_v5, %v3877_v6  ;;  %v3784_v6 = vor.u32 %v4542_v0, %v3781_v1  ;;  %v4133_v0 = vld [vmem:[#allocation3 + $0x5f8] sm:$0xf0] }
  0x9d   :  { %1858 = vmatpush.bf16.msra.mxu0 %v3392_v28  ;;  %v3680_v28 = vor.u32 %v4516_v11, %v3677_v12  ;;  %v3709_v11 = vld [vmem:[#allocation3 + $0x2a8] sm:$0xf0]  ;;  %v4540_v12 = vld [vmem:[#allocation3 + $0x324] sm:$0xf] }
  0x9e   :  { %1871 = vmatpush.bf16.msra.mxu1 %v3456_v29  ;;  %v3744_v29 = vor.u32 %v4532_v13, %v3741_v16  ;;  %v3773_v13 = vld [vmem:[#allocation3 + $0x328] sm:$0xf0] }
  0x9f   :  { %1884 = vmatpush.bf16.msra.mxu2 %v3520_v30  ;;  %v3808_v30 = vor.u32 %v4548_v17, %v3805_v18  ;;  %v3837_v16 = vld [vmem:[#allocation3 + $0x3a8] sm:$0xf0] }
  0xa0   :  { %1897 = vmatpush.bf16.msra.mxu3 %v3584_v37  ;;  %v3872_v37 = vor.u32 %v4564_v22, %v3869_v25  ;;  %v3776_v22 = vor.u32 %v4540_v12, %v3773_v13  ;;  %v4506_v25 = vld [vmem:[#allocation3 + $0x214] sm:$0xf]  ;;  %v4612_v12 = vld [vmem:[#allocation3 + $0x564] sm:$0xf]  ;;  %v4061_v13 = vld [vmem:[#allocation3 + $0x568] sm:$0xf0] }
  0xa1   :  { %1859 = vmatpush.bf16.msra.mxu0 %v3384_v48  ;;  %v3672_v48 = vor.u32 %v4514_v31, %v3669_v32  ;;  %v3701_v31 = vld [vmem:[#allocation3 + $0x298] sm:$0xf0]  ;;  %v4538_v32 = vld [vmem:[#allocation3 + $0x314] sm:$0xf] }
  0xa2   :  { %1872 = vmatpush.bf16.msra.mxu1 %v3448_v51  ;;  %v4512_v51 = vld [vmem:[#allocation3 + $0x244] sm:$0xf] }
  0xa3   :  { %1885 = vmatpush.bf16.msra.mxu2 %v3512_v52  ;;  %v3661_v52 = vld [vmem:[#allocation3 + $0x248] sm:$0xf0] }
  0xa4   :  { %1898 = vmatpush.bf16.msra.mxu3 %v3576_v56  ;;  %v3789_v56 = vld [vmem:[#allocation3 + $0x348] sm:$0xf0] }
  0xa5   :  { %1860 = vmatpush.bf16.msra.mxu0 %v3376_v63  ;;  %v3717_v63 = vld [vmem:[#allocation3 + $0x2b8] sm:$0xf0] }
  0xa6   :  { %1873 = vmatpush.bf16.msra.mxu1 %v3440_v3  ;;  %v3845_v3 = vld [vmem:[#allocation3 + $0x3b8] sm:$0xf0]  ;;  %v3720_v5 = vor.u32 %v4526_v61, %v3717_v63  ;;  %v4630_v63 = vld [vmem:[#allocation3 + $0x5f4] sm:$0xf] }
  0xa7   :  { %1886 = vmatpush.bf16.msra.mxu2 %v3504_v4  ;;  %v3656_v4 = vor.u32 %v4510_v59, %v3653_v60  ;;  %v4614_v59 = vld [vmem:[#allocation3 + $0x574] sm:$0xf]  ;;  %v4069_v60 = vld [vmem:[#allocation3 + $0x578] sm:$0xf0] }
  0xa8   :  { %1899 = vmatpush.bf16.msra.mxu3 %v3568_v7  ;;  %1861 = vmatmul.bf16.vlgmr.msra.gmra.mxu0 %v4903_v36  ;;  %v3853_v36 = vld [vmem:[#allocation3 + $0x3c8] sm:$0xf0]  ;;  %v4508_v7 = vld [vmem:[#allocation3 + $0x224] sm:$0xf] }
  0xa9   :  { %1905 = vmatpush.bf16.msrb.mxu0 %v3688_v8  ;;  %1874 = vmatmul.bf16.vlgmr.msra.gmra.mxu1 %v4907_v43  ;;  %v3792_v43 = vor.u32 %v4544_v55, %v3789_v56  ;;  %v3856_v62 = vor.u32 %v4560_v57, %v3853_v36  ;;  %v3645_v8 = vld [vmem:[#allocation3 + $0x228] sm:$0xf0]  ;;  %v4582_v56 = vld [vmem:[#allocation3 + $0x474] sm:$0xf]  ;;  %v3941_v57 = vld [vmem:[#allocation3 + $0x478] sm:$0xf0] }
  0xaa   :  { %1918 = vmatpush.bf16.msrb.mxu1 %v3752_v9  ;;  %1887 = vmatmul.bf16.vlgmr.msra.gmra.mxu2 %v4901_v35  ;;  %v3725_v35 = vld [vmem:[#allocation3 + $0x2c8] sm:$0xf0]  ;;  %v4524_v9 = vld [vmem:[#allocation3 + $0x2a4] sm:$0xf]  ;;  %v3648_v17 = vor.u32 %v4508_v7, %v3645_v8  ;;  %v4598_v36 = vld [vmem:[#allocation3 + $0x4f4] sm:$0xf] }
  0xab   :  { %1931 = vmatpush.bf16.msrb.mxu2 %v3816_v10  ;;  %1900 = vmatmul.bf16.vlgmr.msra.gmra.mxu3 %v4905_v42  ;;  %v3664_v42 = vor.u32 %v4512_v51, %v3661_v52  ;;  %v3728_v58 = vor.u32 %v4528_v53, %v3725_v35  ;;  %v3848_v10 = vor.u32 %v4558_v2, %v3845_v3  ;;  %v3693_v51 = vld [vmem:[#allocation3 + $0x288] sm:$0xf0]  ;;  %v4536_v52 = vld [vmem:[#allocation3 + $0x304] sm:$0xf] }
  0xac   :  { %1944 = vmatpush.bf16.msrb.mxu3 %v3880_v14  ;;  %v4556_v14 = vld [vmem:[#allocation3 + $0x3a4] sm:$0xf]  ;;  %v3712_v18 = vor.u32 %v4524_v9, %v3709_v11  ;;  %v4959_v47 = vpop.f32.mrf.mxu0  ;;  %v3821_v55 = vld [vmem:[#allocation3 + $0x388] sm:$0xf0]  ;;  %v3944_v2 = vor.u32 %v4582_v56, %v3941_v57 }
  0xad   :  { %1906 = vmatpush.bf16.msrb.mxu0 %v3680_v28  ;;  %v3637_v28 = vld [vmem:[#allocation3 + $0x218] sm:$0xf0]  ;;  %v4552_v35 = vld [vmem:[#allocation3 + $0x384] sm:$0xf]  ;;  %v3933_v7 = vld [vmem:[#allocation3 + $0x468] sm:$0xf0] }
  0xae   :  { %1919 = vmatpush.bf16.msrb.mxu1 %v3744_v29  ;;  %v4522_v29 = vld [vmem:[#allocation3 + $0x294] sm:$0xf]  ;;  %v3640_v41 = vor.u32 %v4506_v25, %v3637_v28  ;;  %v3824_v1 = vor.u32 %v4552_v35, %v3821_v55  ;;  %v4596_v8 = vld [vmem:[#allocation3 + $0x4e4] sm:$0xf]  ;;  %v3997_v11 = vld [vmem:[#allocation3 + $0x4e8] sm:$0xf0]  ;;  %v4064_v25 = vor.u32 %v4612_v12, %v4061_v13 }
  0xaf   :  { %1932 = vmatpush.bf16.msrb.mxu2 %v3808_v30  ;;  %v3840_v30 = vor.u32 %v4556_v14, %v3837_v16  ;;  %v4628_v16 = vld [vmem:[#allocation3 + $0x5e4] sm:$0xf]  ;;  %v4578_v28 = vld [vmem:[#allocation3 + $0x454] sm:$0xf]  ;;  %v3981_v35 = vld [vmem:[#allocation3 + $0x4c8] sm:$0xf0] }
  0xb0   :  { %1945 = vmatpush.bf16.msrb.mxu3 %v3872_v37  ;;  %v4554_v37 = vld [vmem:[#allocation3 + $0x394] sm:$0xf]  ;;  %v4608_v55 = vld [vmem:[#allocation3 + $0x544] sm:$0xf] }
  0xb1   :  { %1907 = vmatpush.bf16.msrb.mxu0 %v3672_v48  ;;  %v3704_v48 = vor.u32 %v4522_v29, %v3701_v31  ;;  %v3832_v53 = vor.u32 %v4554_v37, %v3829_v38  ;;  %v3925_v29 = vld [vmem:[#allocation3 + $0x458] sm:$0xf0]  ;;  %v4610_v37 = vld [vmem:[#allocation3 + $0x554] sm:$0xf]  ;;  %v4624_v56 = vld [vmem:[#allocation3 + $0x5c4] sm:$0xf] }
  0xb2   :  { %1920 = vmatpush.bf16.msrb.mxu1 %v3736_v49  ;;  %v3768_v49 = vor.u32 %v4538_v32, %v3765_v33  ;;  %v3989_v33 = vld [vmem:[#allocation3 + $0x4d8] sm:$0xf0] }
  0xb3   :  { %1933 = vmatpush.bf16.msrb.mxu2 %v3800_v50  ;;  %v4520_v50 = vld [vmem:[#allocation3 + $0x284] sm:$0xf]  ;;  %v4963_v3 = vpop.f32.mrf.mxu2  ;;  %v4053_v38 = vld [vmem:[#allocation3 + $0x558] sm:$0xf0] }
  0xb4   :  { %1946 = vmatpush.bf16.msrb.mxu3 %v3864_v54  ;;  %v3757_v54 = vld [vmem:[#allocation3 + $0x308] sm:$0xf0]  ;;  %v3696_v61 = vor.u32 %v4520_v50, %v3693_v51  ;;  %v4965_v9 = vpop.f32.mrf.mxu3  ;;  %v1656_v14 = vpop.f32.mrf.mxu0  ;;  %v4056_v50 = vor.u32 %v4610_v37, %v4053_v38  ;;  %v4576_v51 = vld [vmem:[#allocation3 + $0x444] sm:$0xf]  ;;  %v3893_v37 = vld [vmem:[#allocation3 + $0x418] sm:$0xf0] }
  0xb5   :  { %1908 = vmatpush.bf16.msrb.mxu0 %v3664_v42  ;;  %v4961_v42 = vpop.f32.mrf.mxu1  ;;  %v3965_v14 = vld [vmem:[#allocation3 + $0x4a8] sm:$0xf0]  ;;  %v4586_v38 = vld [vmem:[#allocation3 + $0x494] sm:$0xf] }
  0xb6   :  { %1921 = vmatpush.bf16.msrb.mxu1 %v3728_v58  ;;  %v3632_v58 = vor.u32 %v4504_v45, %v3629_v46  ;;  %v4117_v45 = vld [vmem:[#allocation3 + $0x5d8] sm:$0xf0]  ;;  %v3928_v46 = vor.u32 %v4578_v28, %v3925_v29  ;;  %v4982_v28 = vld [vmem:[%s5378_s3 + $0x20] ss:$8 sm:$0x3] }
  0xb7   :  { %1934 = vmatpush.bf16.msrb.mxu2 %v3792_v43  ;;  %v4005_v43 = vld [vmem:[#allocation3 + $0x4f8] sm:$0xf0] }
  0xb8   :  { %1947 = vmatpush.bf16.msrb.mxu3 %v3856_v62  ;;  %v3760_v62 = vor.u32 %v4536_v52, %v3757_v54  ;;  %v4592_v52 = vld [vmem:[#allocation3 + $0x4c4] sm:$0xf] }
  0xb9   :  { %1909 = vmatpush.bf16.msrb.mxu0 %v3656_v4  ;;  %v4008_v4 = vor.u32 %v4598_v36, %v4005_v43  ;;  %v4574_v43 = vld [vmem:[#allocation3 + $0x434] sm:$0xf] }
  0xba   :  { %1922 = vmatpush.bf16.msrb.mxu1 %v3720_v5  ;;  %v4072_v5 = vor.u32 %v4614_v59, %v4069_v60  ;;  %v3909_v59 = vld [vmem:[#allocation3 + $0x438] sm:$0xf0]  ;;  %v4590_v60 = vld [vmem:[#allocation3 + $0x4b4] sm:$0xf] }
  0xbb   :  { %1935 = vmatpush.bf16.msrb.mxu2 %v3784_v6  ;;  %v4580_v6 = vld [vmem:[#allocation3 + $0x464] sm:$0xf] }
  0xbc   :  { %1948 = vmatpush.bf16.msrb.mxu3 %v3848_v10  ;;  %v4136_v10 = vor.u32 %v4630_v63, %v4133_v0  ;;  %v3973_v63 = vld [vmem:[#allocation3 + $0x4b8] sm:$0xf0]  ;;  %v4606_v0 = vld [vmem:[#allocation3 + $0x534] sm:$0xf] }
  0xbd   :  { %1910 = vmatpush.bf16.msrb.mxu0 %v3648_v17  ;;  %v4125_v17 = vld [vmem:[#allocation3 + $0x5e8] sm:$0xf0]  ;;  %v1669_v31 = vpop.f32.mrf.mxu1 }
  0xbe   :  { %1923 = vmatpush.bf16.msrb.mxu1 %v3712_v18  ;;  %v3936_v18 = vor.u32 %v4580_v6, %v3933_v7  ;;  %v4128_v32 = vor.u32 %v4628_v16, %v4125_v17  ;;  %v3976_v6 = vor.u32 %v4590_v60, %v3973_v63  ;;  %v4604_v16 = vld [vmem:[#allocation3 + $0x524] sm:$0xf]  ;;  %v4029_v17 = vld [vmem:[#allocation3 + $0x528] sm:$0xf0]  ;;  %v4197_v63 = vld [vmem:[#allocation3 + $0x678] sm:$0xf0] }
  0xbf   :  { %1936 = vmatpush.bf16.msrb.mxu2 %v3776_v22  ;;  %v4000_v22 = vor.u32 %v4596_v8, %v3997_v11  ;;  %v4572_v8 = vld [vmem:[#allocation3 + $0x424] sm:$0xf] }
  0xc0   :  { %1949 = vmatpush.bf16.msrb.mxu3 %v3840_v30  ;;  %v4594_v30 = vld [vmem:[#allocation3 + $0x4d4] sm:$0xf]  ;;  %v4588_v11 = vld [vmem:[#allocation3 + $0x4a4] sm:$0xf] }
  0xc1   :  { %1911 = vmatpush.bf16.msrb.mxu0 %v3640_v41  ;;  %v4626_v41 = vld [vmem:[#allocation3 + $0x5d4] sm:$0xf]  ;;  %v3968_v31 = vor.u32 %v4588_v11, %v3965_v14 }
  0xc2   :  { %1924 = vmatpush.bf16.msrb.mxu1 %v3704_v48  ;;  %v1682_v48 = vpop.f32.mrf.mxu2  ;;  %v4120_v54 = vor.u32 %v4626_v41, %v4117_v45 }
  0xc3   :  { %1937 = vmatpush.bf16.msrb.mxu2 %v3768_v49  ;;  %v3992_v49 = vor.u32 %v4594_v30, %v3989_v33  ;;  %v4570_v33 = vld [vmem:[#allocation3 + $0x414] sm:$0xf] }
  0xc4   :  { %1950 = vmatpush.bf16.msrb.mxu3 %v3832_v53  ;;  %v1695_v53 = vpop.f32.mrf.mxu3  ;;  %v4602_v48 = vld [vmem:[#allocation3 + $0x514] sm:$0xf] }
  0xc5   :  { %1912 = vmatpush.bf16.msrb.mxu0 %v3632_v58  ;;  %v4971_v36 = vpop.f32.mrf.mxu0  ;;  %v4568_v53 = vld [vmem:[#allocation3 + $0x404] sm:$0xf] }
  0xc6   :  { %1925 = vmatpush.bf16.msrb.mxu1 %v3696_v61  ;;  %v4973_v61 = vpop.f32.mrf.mxu1 }
  0xc7   :  { %1938 = vmatpush.bf16.msrb.mxu2 %v3760_v62 }
  0xc8   :  { %1951 = vmatpush.bf16.msrb.mxu3 %v3824_v1  ;;  %1913 = vmatmul.bf16.vlgmr.msrb.gmra.mxu0 %v4921_v39  ;;  %v4045_v39 = vld [vmem:[#allocation3 + $0x548] sm:$0xf0]  ;;  %v4037_v1 = vld [vmem:[#allocation3 + $0x538] sm:$0xf0] }
  0xc9   :  { %1957 = vmatpush.bf16.msra.mxu0 %v3944_v2  ;;  %1926 = vmatmul.bf16.vlgmr.msrb.gmra.mxu1 %v4925_v44  ;;  %v3984_v44 = vor.u32 %v4592_v52, %v3981_v35  ;;  %v4048_v58 = vor.u32 %v4608_v55, %v4045_v39  ;;  %v4622_v2 = vld [vmem:[#allocation3 + $0x5b4] sm:$0xf]  ;;  %v4040_v7 = vor.u32 %v4606_v0, %v4037_v1  ;;  %v4584_v39 = vld [vmem:[#allocation3 + $0x484] sm:$0xf] }
  0xca   :  { %1970 = vmatpush.bf16.msra.mxu1 %v4008_v4  ;;  %1939 = vmatmul.bf16.vlgmr.msrb.gmra.mxu2 %v4919_v34  ;;  %v3917_v34 = vld [vmem:[#allocation3 + $0x448] sm:$0xf0]  ;;  %v4101_v4 = vld [vmem:[#allocation3 + $0x5b8] sm:$0xf0]  ;;  %v3896_v52 = vor.u32 %v4570_v33, %v3893_v37  ;;  %v4662_v0 = vld [vmem:[#allocation3 + $0x6f4] sm:$0xf] }
  0xcb   :  { %1983 = vmatpush.bf16.msra.mxu2 %v4072_v5  ;;  %1952 = vmatmul.bf16.vlgmr.msrb.gmra.mxu3 %v4923_v40  ;;  %v4109_v40 = vld [vmem:[#allocation3 + $0x5c8] sm:$0xf0]  ;;  %v3920_v57 = vor.u32 %v4576_v51, %v3917_v34  ;;  %v3912_v5 = vor.u32 %v4574_v43, %v3909_v59  ;;  %v4104_v13 = vor.u32 %v4622_v2, %v4101_v4  ;;  %v4085_v51 = vld [vmem:[#allocation3 + $0x598] sm:$0xf0]  ;;  %v361_v34 = vperm.slane %v4982_v28, 0 }
  0xcc   :  { %1996 = vmatpush.bf16.msra.mxu3 %v4136_v10  ;;  %v4112_v62 = vor.u32 %v4624_v56, %v4109_v40  ;;  %v3901_v10 = vld [vmem:[#allocation3 + $0x428] sm:$0xf0]  ;;  %v4600_v40 = vld [vmem:[#allocation3 + $0x504] sm:$0xf]  ;;  %v4261_v2 = vld [vmem:[#allocation3 + $0x6f8] sm:$0xf0] }
  0xcd   :  { %1958 = vmatpush.bf16.msra.mxu0 %v3936_v18  ;;  %v4975_v12 = vpop.f32.mrf.mxu2  ;;  %v3904_v29 = vor.u32 %v4572_v8, %v3901_v10  ;;  %v1708_v30 = vpop.f32.mrf.mxu0  ;;  %v3949_v56 = vld [vmem:[#allocation3 + $0x488] sm:$0xf0]  ;;  %v4616_v43 = vld [vmem:[#allocation3 + $0x584] sm:$0xf]  ;;  %v4678_v4 = vld [vmem:[#allocation3 + $0x774] sm:$0xf]  ;;  %v1655_v14 = vadd.f32 %v4959_v47, %v361_v34 }
  0xce   :  { %1971 = vmatpush.bf16.msra.mxu1 %v4000_v22  ;;  %v4977_v18 = vpop.f32.mrf.mxu3  ;;  %v4620_v22 = vld [vmem:[#allocation3 + $0x5a4] sm:$0xf]  ;;  %v1721_v41 = vpop.f32.mrf.mxu1  ;;  %v4077_v59 = vld [vmem:[#allocation3 + $0x588] sm:$0xf0]  ;;  %v4694_v8 = vld [vmem:[#allocation3 + $0x7f4] sm:$0xf] }
  0xcf   :  { %1984 = vmatpush.bf16.msra.mxu2 %v4064_v25  ;;  %v4093_v25 = vld [vmem:[#allocation3 + $0x5a8] sm:$0xf0]  ;;  %v4389_v10 = vld [vmem:[#allocation3 + $0x7f8] sm:$0xf0]  ;;  %v4080_v11 = vor.u32 %v4616_v43, %v4077_v59  ;;  %v4692_v37 = vld [vmem:[#allocation3 + $0x7e4] sm:$0xf] }
  0xd0   :  { %1997 = vmatpush.bf16.msra.mxu3 %v4128_v32  ;;  %v4032_v32 = vor.u32 %v4604_v16, %v4029_v17  ;;  %v4096_v45 = vor.u32 %v4620_v22, %v4093_v25  ;;  %v4264_v16 = vor.u32 %v4662_v0, %v4261_v2  ;;  %v4644_v22 = vld [vmem:[#allocation3 + $0x664] sm:$0xf]  ;;  %v4189_v25 = vld [vmem:[#allocation3 + $0x668] sm:$0xf0]  ;;  %v4392_v30 = vor.u32 %v4694_v8, %v4389_v10  ;;  %v4245_v34 = vld [vmem:[#allocation3 + $0x6d8] sm:$0xf0] }
  0xd1   :  { %1959 = vmatpush.bf16.msra.mxu0 %v3928_v46  ;;  %v3957_v46 = vld [vmem:[#allocation3 + $0x498] sm:$0xf0]  ;;  %v4317_v33 = vld [vmem:[#allocation3 + $0x768] sm:$0xf0]  ;;  %v4192_v41 = vor.u32 %v4644_v22, %v4189_v25  ;;  %v4688_v59 = vld [vmem:[#allocation3 + $0x7c4] sm:$0xf] }
  0xd2   :  { %1972 = vmatpush.bf16.msra.mxu1 %v3992_v49  ;;  %v4021_v49 = vld [vmem:[#allocation3 + $0x518] sm:$0xf0]  ;;  %v3960_v35 = vor.u32 %v4586_v38, %v3957_v46  ;;  %v4381_v38 = vld [vmem:[#allocation3 + $0x7e8] sm:$0xf0]  ;;  %v4686_v10 = vld [vmem:[#allocation3 + $0x7b4] sm:$0xf] }
  0xd3   :  { %1985 = vmatpush.bf16.msra.mxu2 %v4056_v50  ;;  %v4618_v50 = vld [vmem:[#allocation3 + $0x594] sm:$0xf]  ;;  %v4024_v55 = vor.u32 %v4602_v48, %v4021_v49  ;;  %v4181_v49 = vld [vmem:[#allocation3 + $0x658] sm:$0xf0]  ;;  %v4157_v22 = vld [vmem:[#allocation3 + $0x628] sm:$0xf0] }
  0xd4   :  { %1998 = vmatpush.bf16.msra.mxu3 %v4120_v54  ;;  %v3885_v54 = vld [vmem:[#allocation3 + $0x408] sm:$0xf0]  ;;  %v4642_v48 = vld [vmem:[#allocation3 + $0x654] sm:$0xf]  ;;  %v4165_v2 = vld [vmem:[#allocation3 + $0x638] sm:$0xf0] }
  0xd5   :  { %1960 = vmatpush.bf16.msra.mxu0 %v3920_v57  ;;  %v1734_v57 = vpop.f32.mrf.mxu2  ;;  %v3888_v1 = vor.u32 %v4568_v53, %v3885_v54  ;;  %v4309_v53 = vld [vmem:[#allocation3 + $0x758] sm:$0xf0]  ;;  %v4690_v54 = vld [vmem:[#allocation3 + $0x7d4] sm:$0xf]  ;;  %v4652_v25 = vld [vmem:[#allocation3 + $0x6a4] sm:$0xf] }
  0xd6   :  { %1973 = vmatpush.bf16.msra.mxu1 %v3984_v44  ;;  %v4088_v44 = vor.u32 %v4618_v50, %v4085_v51  ;;  %v1747_v60 = vpop.f32.mrf.mxu3  ;;  %v4658_v50 = vld [vmem:[#allocation3 + $0x6d4] sm:$0xf]  ;;  %v4384_v51 = vor.u32 %v4692_v37, %v4381_v38  ;;  %v4656_v57 = vld [vmem:[#allocation3 + $0x6c4] sm:$0xf]  ;;  %v4293_v8 = vld [vmem:[#allocation3 + $0x738] sm:$0xf0] }
  0xd7   :  { %1986 = vmatpush.bf16.msra.mxu2 %v4048_v58  ;;  %v4013_v58 = vld [vmem:[#allocation3 + $0x508] sm:$0xf0]  ;;  %v4684_v38 = vld [vmem:[#allocation3 + $0x7a4] sm:$0xf] }
  0xd8   :  { %1999 = vmatpush.bf16.msra.mxu3 %v4112_v62  ;;  %v4646_v62 = vld [vmem:[#allocation3 + $0x674] sm:$0xf] }
  0xd9   :  { %1961 = vmatpush.bf16.msra.mxu0 %v3912_v5  ;;  %v4325_v5 = vld [vmem:[#allocation3 + $0x778] sm:$0xf0] }
  0xda   :  { %1974 = vmatpush.bf16.msra.mxu1 %v3976_v6  ;;  %v3952_v6 = vor.u32 %v4584_v39, %v3949_v56  ;;  %v4328_v17 = vor.u32 %v4678_v4, %v4325_v5  ;;  %v4248_v39 = vor.u32 %v4658_v50, %v4245_v34  ;;  %v4640_v56 = vld [vmem:[#allocation3 + $0x644] sm:$0xf]  ;;  %v4654_v4 = vld [vmem:[#allocation3 + $0x6b4] sm:$0xf] }
  0xdb   :  { %1987 = vmatpush.bf16.msra.mxu2 %v4040_v7  ;;  %v4016_v7 = vor.u32 %v4600_v40, %v4013_v58  ;;  %v4173_v40 = vld [vmem:[#allocation3 + $0x648] sm:$0xf0]  ;;  %v4672_v58 = vld [vmem:[#allocation3 + $0x744] sm:$0xf]  ;;  %v4634_v50 = vld [vmem:[#allocation3 + $0x614] sm:$0xf] }
  0xdc   :  { %2000 = vmatpush.bf16.msra.mxu3 %v4104_v13  ;;  %v4200_v13 = vor.u32 %v4646_v62, %v4197_v63  ;;  %v4176_v60 = vor.u32 %v4640_v56, %v4173_v40  ;;  %v4650_v34 = vld [vmem:[#allocation3 + $0x694] sm:$0xf]  ;;  %v4632_v40 = vld [vmem:[#allocation3 + $0x604] sm:$0xf] }
  0xdd   :  { %1962 = vmatpush.bf16.msra.mxu0 %v3904_v29  ;;  %v4660_v29 = vld [vmem:[#allocation3 + $0x6e4] sm:$0xf] }
  0xde   :  { %1975 = vmatpush.bf16.msra.mxu1 %v3968_v31  ;;  %v4253_v31 = vld [vmem:[#allocation3 + $0x6e8] sm:$0xf0] }
  0xdf   :  { %1988 = vmatpush.bf16.msra.mxu2 %v4032_v32  ;;  %v4676_v32 = vld [vmem:[#allocation3 + $0x764] sm:$0xf]  ;;  %v4256_v47 = vor.u32 %v4660_v29, %v4253_v31  ;;  %v4221_v31 = vld [vmem:[#allocation3 + $0x6a8] sm:$0xf0] }
  0xe0   :  { %2001 = vmatpush.bf16.msra.mxu3 %v4096_v45  ;;  %v1668_v45 = vadd.f32 %v4961_v42, %v1655_v14  ;;  %v4320_v46 = vor.u32 %v4676_v32, %v4317_v33  ;;  %v4373_v42 = vld [vmem:[#allocation3 + $0x7d8] sm:$0xf0]  ;;  %v4668_v32 = vld [vmem:[#allocation3 + $0x724] sm:$0xf]  ;;  %v4285_v33 = vld [vmem:[#allocation3 + $0x728] sm:$0xf0] }
  0xe1   :  { %1963 = vmatpush.bf16.msra.mxu0 %v3896_v52  ;;  %v4674_v52 = vld [vmem:[#allocation3 + $0x754] sm:$0xf] }
  0xe2   :  { %1976 = vmatpush.bf16.msra.mxu1 %v3960_v35  ;;  %v4184_v35 = vor.u32 %v4642_v48, %v4181_v49  ;;  %v4224_v48 = vor.u32 %v4652_v25, %v4221_v31  ;;  %v4288_v49 = vor.u32 %v4668_v32, %v4285_v33 }
  0xe3   :  { %1989 = vmatpush.bf16.msra.mxu2 %v4024_v55  ;;  %v1681_v55 = vadd.f32 %v4963_v3, %v1668_v45 }
  0xe4   :  { %2002 = vmatpush.bf16.msra.mxu3 %v4088_v44  ;;  %v4376_v44 = vor.u32 %v4690_v54, %v4373_v42  ;;  %v4666_v54 = vld [vmem:[#allocation3 + $0x714] sm:$0xf]  ;;  %v4277_v42 = vld [vmem:[#allocation3 + $0x718] sm:$0xf0] }
  0xe5   :  { %1964 = vmatpush.bf16.msra.mxu0 %v3888_v1  ;;  %v4992_v43 = vpop.f32.mrf.mxu0  ;;  %v1694_v3 = vadd.f32 %v4965_v9, %v1681_v55  ;;  %v4638_v1 = vld [vmem:[#allocation3 + $0x634] sm:$0xf]  ;;  %v4341_v55 = vld [vmem:[#allocation3 + $0x798] sm:$0xf0]  ;;  %v4280_v56 = vor.u32 %v4666_v54, %v4277_v42 }
  0xe6   :  { %1977 = vmatpush.bf16.msra.mxu1 %v3952_v6  ;;  %v4994_v62 = vpop.f32.mrf.mxu1  ;;  %v4229_v6 = vld [vmem:[#allocation3 + $0x6b8] sm:$0xf0] }
  0xe7   :  { %1990 = vmatpush.bf16.msra.mxu2 %v4016_v7  ;;  %v4670_v7 = vld [vmem:[#allocation3 + $0x734] sm:$0xf]  ;;  %v1707_v14 = vadd.f32 %v4971_v36, %v1694_v3  ;;  %v4232_v9 = vor.u32 %v4654_v4, %v4229_v6  ;;  %v4333_v3 = vld [vmem:[#allocation3 + $0x788] sm:$0xf0]  ;;  %v39_v6 = vld [vmem:[%s5378_s3 + $0x10] sm:$0xff] }
  0xe8   :  { %2003 = vmatpush.bf16.msra.mxu3 %v4080_v11  ;;  %1965 = vmatmul.bf16.vlgmr.msra.gmra.mxu0 %v4931_v19  ;;  %v4312_v19 = vor.u32 %v4674_v52, %v4309_v53  ;;  %v4357_v11 = vld [vmem:[#allocation3 + $0x7b8] sm:$0xf0] }
  0xe9   :  { %2009 = vmatpush.bf16.msrb.mxu0 %v4200_v13  ;;  %1978 = vmatmul.bf16.vlgmr.msra.gmra.mxu1 %v4935_v24  ;;  %v4301_v24 = vld [vmem:[#allocation3 + $0x748] sm:$0xf0]  ;;  %v4168_v13 = vor.u32 %v4638_v1, %v4165_v2  ;;  %v4360_v29 = vor.u32 %v4686_v10, %v4357_v11  ;;  %v4213_v53 = vld [vmem:[#allocation3 + $0x698] sm:$0xf0] }
  0xea   :  { %2022 = vmatpush.bf16.msrb.mxu1 %v4264_v16  ;;  %1991 = vmatmul.bf16.vlgmr.msra.gmra.mxu2 %v4933_v23  ;;  %v4237_v23 = vld [vmem:[#allocation3 + $0x6c8] sm:$0xf0]  ;;  %v4304_v0 = vor.u32 %v4672_v58, %v4301_v24  ;;  %v4296_v16 = vor.u32 %v4670_v7, %v4293_v8  ;;  %v4664_v24 = vld [vmem:[#allocation3 + $0x704] sm:$0xf] }
  0xeb   :  { %2035 = vmatpush.bf16.msrb.mxu2 %v4328_v17  ;;  %2004 = vmatmul.bf16.vlgmr.msra.gmra.mxu3 %v4937_v27  ;;  %v4365_v27 = vld [vmem:[#allocation3 + $0x7c8] sm:$0xf0]  ;;  %v4240_v63 = vor.u32 %v4656_v57, %v4237_v23  ;;  %v4636_v17 = vld [vmem:[#allocation3 + $0x624] sm:$0xf] }
  0xec   :  { %2048 = vmatpush.bf16.msrb.mxu3 %v4392_v30  ;;  %v4368_v5 = vor.u32 %v4688_v59, %v4365_v27  ;;  %v4160_v36 = vor.u32 %v4636_v17, %v4157_v22  ;;  %v4141_v57 = vld [vmem:[#allocation3 + $0x608] sm:$0xf0] }
  0xed   :  { %2010 = vmatpush.bf16.msrb.mxu0 %v4192_v41  ;;  %v4998_v30 = vpop.f32.mrf.mxu2  ;;  %v4349_v41 = vld [vmem:[#allocation3 + $0x7a8] sm:$0xf0]  ;;  %v1760_v45 = vpop.f32.mrf.mxu0 }
  0xee   :  { %2023 = vmatpush.bf16.msrb.mxu1 %v4256_v47  ;;  %v5000_v37 = vpop.f32.mrf.mxu3  ;;  %v1773_v47 = vpop.f32.mrf.mxu1  ;;  %v4352_v52 = vor.u32 %v4684_v38, %v4349_v41  ;;  %v4205_v58 = vld [vmem:[#allocation3 + $0x688] sm:$0xf0] }
  0xef   :  { %2036 = vmatpush.bf16.msrb.mxu2 %v4320_v46  ;;  %v1720_v46 = vadd.f32 %v4973_v61, %v1707_v14  ;;  %v4216_v61 = vor.u32 %v4650_v34, %v4213_v53  ;;  %v4269_v59 = vld [vmem:[#allocation3 + $0x708] sm:$0xf0] }
  0xf0   :  { %2049 = vmatpush.bf16.msrb.mxu3 %v4384_v51  ;;  %v4149_v51 = vld [vmem:[#allocation3 + $0x618] sm:$0xf0]  ;;  %v4272_v2 = vor.u32 %v4664_v24, %v4269_v59 }
  0xf1   :  { %2011 = vmatpush.bf16.msrb.mxu0 %v4184_v35  ;;  %v4682_v35 = vld [vmem:[#allocation3 + $0x794] sm:$0xf]  ;;  %v2106_v59 = vld [vmem:[%s5379_s4 + $0x10] sm:$0xff] }
  0xf2   :  { %2024 = vmatpush.bf16.msrb.mxu1 %v4248_v39  ;;  %v4152_v39 = vor.u32 %v4634_v50, %v4149_v51  ;;  %v4344_v23 = vor.u32 %v4682_v35, %v4341_v55 }
  0xf3   :  { %2037 = vmatpush.bf16.msrb.mxu2 %v4312_v19  ;;  %v1733_v19 = vadd.f32 %v4975_v12, %v1720_v46 }
  0xf4   :  { %2050 = vmatpush.bf16.msrb.mxu3 %v4376_v44  ;;  %v4648_v44 = vld [vmem:[#allocation3 + $0x684] sm:$0xf] }
  0xf5   :  { %2012 = vmatpush.bf16.msrb.mxu0 %v4176_v60  ;;  %v1786_v27 = vpop.f32.mrf.mxu2  ;;  %v4680_v60 = vld [vmem:[#allocation3 + $0x784] sm:$0xf]  ;;  %v1746_v12 = vadd.f32 %v4977_v18, %v1733_v19  ;;  %v4208_v1 = vor.u32 %v4648_v44, %v4205_v58  ;;  %v37_v18 = vld [vmem:[%s5378_s3] sm:$0xff] }
  0xf6   :  { %2025 = vmatpush.bf16.msrb.mxu1 %v4240_v63  ;;  %v1799_v63 = vpop.f32.mrf.mxu3  ;;  %v4336_v4 = vor.u32 %v4680_v60, %v4333_v3  ;;  %v2108_v27 = vld [vmem:[%s5379_s4 + $0x20] sm:$0xff]  ;;  %v2105_v60 = vld [vmem:[%s5379_s4 + $0x8] sm:$0xff] }
  0xf7   :  { %2038 = vmatpush.bf16.msrb.mxu2 %v4304_v0  ;;  %v4144_v0 = vor.u32 %v4632_v40, %v4141_v57  ;;  %v2107_v63 = vld [vmem:[%s5379_s4 + $0x18] sm:$0xff] }
  0xf8   :  { %2051 = vmatpush.bf16.msrb.mxu3 %v4368_v5  ;;  %v1759_v5 = vadd.f32 %v4992_v43, %v1746_v12 }
  0xf9   :  { %2013 = vmatpush.bf16.msrb.mxu0 %v4168_v13 }
  0xfa   :  { %2026 = vmatpush.bf16.msrb.mxu1 %v4232_v9  ;;  %v1772_v7 = vadd.f32 %v4994_v62, %v1759_v5 }
  0xfb   :  { %2039 = vmatpush.bf16.msrb.mxu2 %v4296_v16 }
  0xfc   :  { %2052 = vmatpush.bf16.msrb.mxu3 %v4360_v29  ;;  %v1785_v43 = vadd.f32 %v4998_v30, %v1772_v7  ;;  %v362_v29 = vperm.slane %v4982_v28, 1  ;;  %v40_v28 = vld [vmem:[%s5378_s3 + $0x18] sm:$0xff] }
  0xfd   :  { %2014 = vmatpush.bf16.msrb.mxu0 %v4160_v36 }
  0xfe   :  { %2027 = vmatpush.bf16.msrb.mxu1 %v4224_v48  ;;  %v1798_v8 = vadd.f32 %v5000_v37, %v1785_v43 }
  0xff   :  { %2040 = vmatpush.bf16.msrb.mxu2 %v4288_v49 }
 0x100   :  { %2053 = vmatpush.bf16.msrb.mxu3 %v4352_v52 }
 0x101   :  { %2015 = vmatpush.bf16.msrb.mxu0 %v4152_v39 }
 0x102   :  { %2028 = vmatpush.bf16.msrb.mxu1 %v4216_v61 }
 0x103   :  { %2041 = vmatpush.bf16.msrb.mxu2 %v4280_v56  ;;  %v38_v56 = vld [vmem:[%s5378_s3 + $0x8] sm:$0xff]  ;;  %s3356_s3 = sshll.u32 %s4861_s21, 4  ;;  %s3357_s3 = int_to_ptr.vmem [resolvable:$true] %s3356_s3 }
 0x104   :  { %2054 = vmatpush.bf16.msrb.mxu3 %v4344_v23 }
 0x105   :  { %2016 = vmatpush.bf16.msrb.mxu0 %v4144_v0  ;;  %v1810_v10 = vpop.f32.mrf.mxu0 }
 0x106   :  { %2029 = vmatpush.bf16.msrb.mxu1 %v4208_v1  ;;  %v1823_v11 = vpop.f32.mrf.mxu1  ;;  %v1811_v62 = vadd.f32 %v1810_v10, %v1798_v8 }
 0x107   :  { %2042 = vmatpush.bf16.msrb.mxu2 %v4272_v2 }
 0x108   :  { %2055 = vmatpush.bf16.msrb.mxu3 %v4336_v4  ;;  %2017 = vmatmul.bf16.vlgmr.msrb.gmra.mxu0 %v4943_v15  ;;  %v1824_v13 = vadd.f32 %v1823_v11, %v1811_v62 }
 0x109   :  { %2079 = vmatpush.xpose.msra.mxu0 %v39_v6  ;;  %2030 = vmatmul.bf16.vlgmr.msrb.gmra.mxu1 %v4947_v21 }
 0x10a   :  { %2043 = vmatmul.bf16.vlgmr.msrb.gmra.mxu2 %v4945_v20  ;;  %2099 = vmatpush.xpose.msra.mxu1 %v40_v28 }
 0x10b   :  { %2056 = vmatmul.bf16.vlgmr.msrb.gmra.mxu3 %v4949_v26  ;;  %2134 = vmatpush.msra.mxu2 %v2106_v59 }
 0x10c   :  { %2160 = vmatpush.msra.mxu3 %v2108_v27 }
 0x10d   :  { %2080 = vmatpush.xpose.msra.mxu0 %v37_v18  ;;  %v1836_v15 = vpop.f32.mrf.mxu2  ;;  %v1812_v16 = vpop.f32.mrf.mxu0  ;;  %2135 = vmatpush.msra.mxu2 %v2105_v60 }
 0x10e   :  { %v1837_v14 = vadd.f32 %v1836_v15, %v1824_v13  ;;  %v1849_v9 = vpop.f32.mrf.mxu3  ;;  %v1825_v17 = vpop.f32.mrf.mxu1  ;;  %2100 = vmatpush.xpose.msra.mxu1 %v38_v56  ;;  %2161 = vmatpush.msra.mxu3 %v2107_v63 }
 0x10f   :  { %2557 = vmatpush.msrb.mxu2 %v2108_v27 }
 0x110   :  { %v1850_v22 = vadd.f32 %v1849_v9, %v1837_v14  ;;  %2360 = vmatpush.msrb.mxu3 %v2108_v27  ;;  %v2110_v14 = vld [vmem:[%s5375_s0] sm:$0xff] }
 0x111   :  { %2228 = vmatpush.msrb.mxu0 %v2108_v27  ;;  %2558 = vmatpush.msrb.mxu2 %v2107_v63  ;;  %v4705_v9 = vld [vmem:[%s5379_s4] ss:$0 sm:$0xff] }
 0x112   :  { %v2061_v21 = vmax.f32 %v1850_v22, 0.0  ;;  %2294 = vmatpush.msrb.mxu1 %v2108_v27  ;;  %2361 = vmatpush.msrb.mxu3 %v2107_v63 }
 0x113   :  { %2229 = vmatpush.msrb.mxu0 %v2107_v63 }
 0x114   :  { %2295 = vmatpush.msrb.mxu1 %v2107_v63 }
 0x115   :  { %v1838_v20 = vpop.f32.mrf.mxu2 }
 0x116   :  { %v1851_v25 = vpop.f32.mrf.mxu3  ;;  %v5049_v20 = vld [vmem:[%s5379_s4 + $0x28] ss:$0 sm:$0xff] }
 0x118   :  { %2081 = vmatmul.f32.vlgmr.msra.gmra.mxu0 %v2061_v21 }
 0x119   :  { %2424 = vmatpush.msra.mxu0 %v2108_v27 }
 0x11a   :  { %4393 = vmatmul.msk.f32.vlgmr.msra.gmra.mxu2 %vm2113_vm0, %v2110_v14 }
 0x11b   :  { %2425 = vmatpush.msra.mxu0 %v2107_v63 }
 0x125   :  { %v1862_v26 = vpop.f32.mrf.mxu0 }
 0x126   :  { %v1863_v30 = vadd.f32 %v1862_v26, %v362_v29  ;;  %v1875_v31 = vpop.f32.mrf.mxu1 }
 0x128   :  { %v1876_v32 = vadd.f32 %v1875_v31, %v1863_v30 }
 0x12d   :  { %v1888_v33 = vpop.f32.mrf.mxu2  ;;  %v1864_v45 = vpop.f32.mrf.mxu0 }
 0x12e   :  { %v1889_v37 = vadd.f32 %v1888_v33, %v1876_v32  ;;  %v1901_v38 = vpop.f32.mrf.mxu3  ;;  %v1877_v36 = vpop.f32.mrf.mxu1 }
 0x130   :  { %v1902_v41 = vadd.f32 %v1901_v38, %v1889_v37 }
 0x135   :  { %v1890_v47 = vpop.f32.mrf.mxu2 }
 0x136   :  { %v1903_v46 = vpop.f32.mrf.mxu3 }
 0x145   :  { %v1914_v48 = vpop.f32.mrf.mxu0 }
 0x146   :  { %v1927_v49 = vpop.f32.mrf.mxu1  ;;  %v1915_v55 = vadd.f32 %v1914_v48, %v1902_v41 }
 0x148   :  { %v1928_v40 = vadd.f32 %v1927_v49, %v1915_v55 }
 0x14d   :  { %v1940_v50 = vpop.f32.mrf.mxu2  ;;  %v1916_v34 = vpop.f32.mrf.mxu0 }
 0x14e   :  { %v1953_v51 = vpop.f32.mrf.mxu3  ;;  %v1929_v52 = vpop.f32.mrf.mxu1  ;;  %v1941_v44 = vadd.f32 %v1940_v50, %v1928_v40 }
 0x150   :  { %v1954_v24 = vadd.f32 %v1953_v51, %v1941_v44 }
 0x155   :  { %v1942_v53 = vpop.f32.mrf.mxu2 }
 0x156   :  { %v1955_v54 = vpop.f32.mrf.mxu3 }
 0x165   :  { %v1966_v42 = vpop.f32.mrf.mxu0 }
 0x166   :  { %v1979_v35 = vpop.f32.mrf.mxu1  ;;  %v1967_v3 = vadd.f32 %v1966_v42, %v1954_v24 }
 0x168   :  { %v1980_v0 = vadd.f32 %v1979_v35, %v1967_v3 }
 0x16d   :  { %v1992_v39 = vpop.f32.mrf.mxu2  ;;  %v1968_v61 = vpop.f32.mrf.mxu0 }
 0x16e   :  { %v2005_v19 = vpop.f32.mrf.mxu3  ;;  %v1981_v57 = vpop.f32.mrf.mxu1  ;;  %v1993_v12 = vadd.f32 %v1992_v39, %v1980_v0 }
 0x170   :  { %v2006_v1 = vadd.f32 %v2005_v19, %v1993_v12 }
 0x175   :  { %v1994_v23 = vpop.f32.mrf.mxu2 }
 0x176   :  { %v2007_v58 = vpop.f32.mrf.mxu3 }
 0x185   :  { %v2018_v2 = vpop.f32.mrf.mxu0 }
 0x186   :  { %v2031_v4 = vpop.f32.mrf.mxu1  ;;  %v2019_v5 = vadd.f32 %v2018_v2, %v2006_v1 }
 0x188   :  { %v2032_v6 = vadd.f32 %v2031_v4, %v2019_v5 }
 0x18d   :  { %v2044_v7 = vpop.f32.mrf.mxu2  ;;  %v2020_v8 = vpop.f32.mrf.mxu0 }
 0x18e   :  { %v2045_v18 = vadd.f32 %v2044_v7, %v2032_v6  ;;  %v2057_v43 = vpop.f32.mrf.mxu3  ;;  %v2033_v10 = vpop.f32.mrf.mxu1 }
 0x190   :  { %v2058_v11 = vadd.f32 %v2057_v43, %v2045_v18 }
 0x192   :  { %v2062_v62 = vmax.f32 %v2058_v11, 0.0 }
 0x194   :  { %2101 = vmatmul.f32.vlgmr.msra.gmra.mxu1 %v2062_v62 }
 0x195   :  { %v2046_v13 = vpop.f32.mrf.mxu2  ;;  %2491 = vmatpush.msra.mxu1 %v2108_v27  ;;  %v2082_v16 = vpop.f32.mrf.mxu0 }
 0x196   :  { %v2059_v15 = vpop.f32.mrf.mxu3  ;;  %v2083_v17 = vadd.f32 %v4705_v9, %v2082_v16 }
 0x197   :  { %2492 = vmatpush.msra.mxu1 %v2107_v63 }
 0x19d   :  { %v2137_v25 = vpop.f32.mrf.mxu2 }
 0x19e   :  { %v5052_v29 = vadd.f32 %v5049_v20, %v2137_v25 }
 0x1a0   :  { %v2210_v19 = vrot.slane %v5052_v29, 2  ;;  %v2276_v11 = vrot.slane %v5052_v29, 4 }
 0x211   :  { %v2102_v22 = vpop.f32.mrf.mxu1 }
 0x212   :  { %v2103_v21 = vadd.f32 %v2102_v22, %v2083_v17 }
 0x214   :  { %4395 = vmatmul.msk.f32.vlgmr.msra.gmra.mxu3 %vm2113_vm0, %v2103_v21 }
 0x215   :  { %2623 = vmatpush.msra.mxu3 %v2108_v27 }
 0x217   :  { %2624 = vmatpush.msra.mxu3 %v2107_v63 }
 0x297   :  { %v2163_v26 = vpop.f32.mrf.mxu3 }
 0x298   :  { %v2164_v30 = vadd.f32 %v2163_v26, %v5052_v29 }
 0x29a   :  { %4719 = vtanh.f32 %v2164_v30  ;;  %v4396_v32 = vmul.f32 -1.442695, %v2164_v30 }
 0x29c   :  { %4721 = vpow2.f32 %v4396_v32 }
 0x2a0   :  { %v4720_v31 = vpop.eup %4719 }
 0x2a1   :  { %2188 = vrot.lane.b32.xlu0 %v4720_v31, %s4856_s28 }
 0x2a2   :  { %v4722_v33 = vpop.eup %4721 }
 0x2a3   :  { %v2169_v37 = vadd.f32 1.0, %v4722_v33 }
 0x2a5   :  { %4723 = vrcp.f32 %v2169_v37  ;;  %v2181_v46 = vand.u32 2147483648, %v2169_v37  ;;  %vm2175_vm2 = vweird.f32 %v2169_v37  ;;  %v2179_v48 = vand.u32 2147483647, %v2169_v37 }
 0x2a7   :  { %v2182_v50 = vor.u32 1.1754944e-38, %v2181_v46  ;;  %vm2180_vm4 = vcmp.eq.f32.partialorder %v2179_v48, 8.507059e+37 }
 0x2ab   :  { %v4724_v38 = vpop.eup %4723 }
 0x2ac   :  { %v2171_v41 = vmul.f32 %v4724_v38, %v2169_v37  ;;  %vm2176_vm1 = vweird.f32 %v4724_v38 }
 0x2ad   :  { %vm2177_vm3 = vmor %vm2175_vm2, %vm2176_vm1 }
 0x2ae   :  { %v2172_v45 = vsub.f32 1.0, %v2171_v41 }
 0x2b0   :  { %v2173_v36 = vmul.f32 %v4724_v38, %v2172_v45 }
 0x2b2   :  { %v2174_v47 = vadd.f32 %v4724_v38, %v2173_v36 }
 0x2b4   :  { %v2178_v49 = vsel %vm2177_vm3, %v4724_v38, %v2174_v47 }
 0x2b5   :  { %v2183_v34 = vsel %vm2180_vm4, %v2182_v50, %v2178_v49 }
 0x2b6   :  { %v2186_v53 = vmul.f32 0.0, %v2183_v34 }
 0x313   :  { %v2189_v51 = vpop.permute.xlu0 %2188 }
 0x314   :  { %v2191_v52 = vmul.f32 %v2189_v51, %v2183_v34  ;;  %v2342_v51 = vrot.slane %v5052_v29, 6 }
 0x316   :  { %2193 = vrot.lane.b32.xlu0 %v2191_v52, %s4857_s29 }
 0x388   :  { %v2194_v28 = vpop.permute.xlu0 %2193 }
 0x389   :  { %v2196_v54 = vadd.f32 %v2194_v28, %v2186_v53 }
 0x38b   :  { %4725 = vtanh.f32 %v2196_v54 }
 0x391   :  { %v4726_v42 = vpop.eup %4725 }
 0x392   :  { %2199 = vrot.lane.b32.xlu1 %v4726_v42, %s4858_s30 }
 0x404   :  { %v2200_v35 = vpop.permute.xlu1 %2199 }
 0x405   :  { %v2202_v55 = vmul.f32 %v2200_v35, %v2183_v34 }
 0x407   :  { %2204 = vrot.lane.b32.xlu1 %v2202_v55, %s4859_s6 }
 0x479   :  { %v2205_v39 = vpop.permute.xlu1 %2204 }
 0x47a   :  { %2208 = vst.msk [vmem:[#allocation2] sm:$0x3] %vm2207_vm5, %v2205_v39  ;;  %4397 = vmatmul.msk.f32.vlgmr.msrb.gmra.mxu0 %vm2113_vm0, %v2205_v39 }
 0x4f7   :  { %v2231_v61 = vpop.f32.mrf.mxu0 }
 0x4f8   :  { %v2232_v56 = vadd.f32 %v2231_v61, %v2210_v19 }
 0x4fa   :  { %4727 = vtanh.f32 %v2232_v56  ;;  %v4398_v57 = vmul.f32 -1.442695, %v2232_v56 }
 0x4fc   :  { %4729 = vpow2.f32 %v4398_v57 }
 0x500   :  { %v4728_v40 = vpop.eup %4727 }
 0x501   :  { %2256 = vrot.lane.b32.xlu2 %v4728_v40, %s4856_s28 }
 0x502   :  { %v4730_v44 = vpop.eup %4729 }
 0x503   :  { %v2237_v23 = vadd.f32 1.0, %v4730_v44 }
 0x505   :  { %4731 = vrcp.f32 %v2237_v23  ;;  %v2249_v3 = vand.u32 2147483648, %v2237_v23  ;;  %vm2243_vm7 = vweird.f32 %v2237_v23  ;;  %v2247_v63 = vand.u32 2147483647, %v2237_v23 }
 0x507   :  { %v2250_v12 = vor.u32 1.1754944e-38, %v2249_v3  ;;  %vm2248_vm9 = vcmp.eq.f32.partialorder %v2247_v63, 8.507059e+37  ;;  %v2111_v3 = vld [vmem:[%s5375_s0 + $0x8] sm:$0xff] }
 0x508   :  { %4394 = vmatmul.msk.f32.gmra.mxu2 %vm2113_vm0, %v2111_v3 }
 0x50b   :  { %v4732_v58 = vpop.eup %4731 }
 0x50c   :  { %v2239_v24 = vmul.f32 %v4732_v58, %v2237_v23  ;;  %vm2244_vm6 = vweird.f32 %v4732_v58 }
 0x50d   :  { %vm2245_vm8 = vmor %vm2243_vm7, %vm2244_vm6 }
 0x50e   :  { %v2240_v59 = vsub.f32 1.0, %v2239_v24 }
 0x510   :  { %v2241_v27 = vmul.f32 %v4732_v58, %v2240_v59 }
 0x512   :  { %v2242_v60 = vadd.f32 %v4732_v58, %v2241_v27 }
 0x514   :  { %v2246_v0 = vsel %vm2245_vm8, %v4732_v58, %v2242_v60 }
 0x515   :  { %v2251_v2 = vsel %vm2248_vm9, %v2250_v12, %v2246_v0  ;;  %v2674_v12 = vld [vmem:[%s5379_s4 + $0x38] sm:$0xff] }
 0x516   :  { %v2254_v5 = vmul.f32 %v2251_v2, %v2196_v54  ;;  %2695 = vmatpush.msrb.mxu0 %v2674_v12 }
 0x55b   :  { %v2257_v1 = vpop.permute.xlu2 %2256 }
 0x55c   :  { %v2259_v4 = vmul.f32 %v2257_v1, %v2251_v2  ;;  %v2673_v1 = vld [vmem:[%s5379_s4 + $0x30] sm:$0xff] }
 0x55d   :  { %2696 = vmatpush.msrb.mxu0 %v2673_v1 }
 0x55e   :  { %2261 = vrot.lane.b32.xlu2 %v2259_v4, %s4857_s29 }
 0x5b8   :  { %v2262_v6 = vpop.permute.xlu2 %2261 }
 0x5b9   :  { %v2264_v7 = vadd.f32 %v2262_v6, %v2254_v5  ;;  %v2140_v5 = vpop.f32.mrf.mxu2 }
 0x5ba   :  { %v5097_v6 = vadd.f32 %v5049_v20, %v2140_v5 }
 0x5bb   :  { %4733 = vtanh.f32 %v2264_v7 }
 0x5bc   :  { %v2539_v3 = vrot.slane %v5097_v6, 4 }
 0x5c1   :  { %v4734_v18 = vpop.eup %4733 }
 0x5c2   :  { %2267 = vrot.lane.b32.xlu0 %v4734_v18, %s4858_s30 }
 0x634   :  { %v2268_v43 = vpop.permute.xlu0 %2267 }
 0x635   :  { %v2270_v8 = vmul.f32 %v2268_v43, %v2251_v2 }
 0x637   :  { %2272 = vrot.lane.b32.xlu1 %v2270_v8, %s4859_s6 }
 0x6a9   :  { %v2273_v10 = vpop.permute.xlu1 %2272 }
 0x6aa   :  { %2275 = vst.msk [vmem:[#allocation2 + $0x2] sm:$0x3] %vm2207_vm5, %v2273_v10  ;;  %4399 = vmatmul.msk.f32.vlgmr.msrb.gmra.mxu1 %vm2113_vm0, %v2273_v10 }
 0x727   :  { %v2297_v62 = vpop.f32.mrf.mxu1 }
 0x728   :  { %v2298_v13 = vadd.f32 %v2297_v62, %v2276_v11 }
 0x72a   :  { %4735 = vtanh.f32 %v2298_v13  ;;  %v4400_v14 = vmul.f32 -1.442695, %v2298_v13 }
 0x72c   :  { %4737 = vpow2.f32 %v4400_v14 }
 0x730   :  { %v4736_v15 = vpop.eup %4735 }
 0x731   :  { %2322 = vrot.lane.b32.xlu2 %v4736_v15, %s4856_s28 }
 0x732   :  { %v4738_v9 = vpop.eup %4737 }
 0x733   :  { %v2303_v16 = vadd.f32 1.0, %v4738_v9 }
 0x735   :  { %4739 = vrcp.f32 %v2303_v16  ;;  %v2315_v30 = vand.u32 2147483648, %v2303_v16  ;;  %vm2309_vm11 = vweird.f32 %v2303_v16  ;;  %v2313_v31 = vand.u32 2147483647, %v2303_v16 }
 0x737   :  { %v2316_v33 = vor.u32 1.1754944e-38, %v2315_v30  ;;  %vm2314_vm13 = vcmp.eq.f32.partialorder %v2313_v31, 8.507059e+37 }
 0x73b   :  { %v4740_v17 = vpop.eup %4739 }
 0x73c   :  { %v2305_v22 = vmul.f32 %v4740_v17, %v2303_v16  ;;  %vm2310_vm10 = vweird.f32 %v4740_v17 }
 0x73d   :  { %vm2311_vm12 = vmor %vm2309_vm11, %vm2310_vm10 }
 0x73e   :  { %v2306_v21 = vsub.f32 1.0, %v2305_v22 }
 0x740   :  { %v2307_v25 = vmul.f32 %v4740_v17, %v2306_v21 }
 0x742   :  { %v2308_v26 = vadd.f32 %v4740_v17, %v2307_v25 }
 0x744   :  { %v2312_v32 = vsel %vm2311_vm12, %v4740_v17, %v2308_v26 }
 0x745   :  { %v2317_v38 = vsel %vm2314_vm13, %v2316_v33, %v2312_v32 }
 0x746   :  { %v2320_v45 = vmul.f32 %v2317_v38, %v2264_v7 }
 0x78b   :  { %v2323_v37 = vpop.permute.xlu2 %2322 }
 0x78c   :  { %v2325_v41 = vmul.f32 %v2323_v37, %v2317_v38 }
 0x78e   :  { %2327 = vrot.lane.b32.xlu0 %v2325_v41, %s4857_s29  ;;  %v2705_v41 = vld [vmem:[%s5379_s4 + $0x48] sm:$0xff] }
 0x78f   :  { %2720 = vmatpush.msrb.mxu1 %v2705_v41 }
 0x800   :  { %v2328_v36 = vpop.permute.xlu0 %2327 }
 0x801   :  { %v2330_v47 = vadd.f32 %v2328_v36, %v2320_v45  ;;  %v2704_v45 = vld [vmem:[%s5379_s4 + $0x40] sm:$0xff] }
 0x802   :  { %2721 = vmatpush.msrb.mxu1 %v2704_v45 }
 0x803   :  { %4741 = vtanh.f32 %v2330_v47 }
 0x809   :  { %v4742_v46 = vpop.eup %4741 }
 0x80a   :  { %2333 = vrot.lane.b32.xlu1 %v4742_v46, %s4858_s30 }
 0x87c   :  { %v2334_v48 = vpop.permute.xlu1 %2333 }
 0x87d   :  { %v2336_v49 = vmul.f32 %v2334_v48, %v2317_v38 }
 0x87f   :  { %2338 = vrot.lane.b32.xlu2 %v2336_v49, %s4859_s6 }
 0x8d9   :  { %v2339_v50 = vpop.permute.xlu2 %2338 }
 0x8da   :  { %2341 = vst.msk [vmem:[#allocation2 + $0x4] sm:$0x3] %vm2207_vm5, %v2339_v50  ;;  %4401 = vmatmul.msk.f32.vlgmr.msrb.gmra.mxu3 %vm2113_vm0, %v2339_v50 }
 0x95d   :  { %v2363_v34 = vpop.f32.mrf.mxu3 }
 0x95e   :  { %v2364_v52 = vadd.f32 %v2363_v34, %v2342_v51 }
 0x960   :  { %4743 = vtanh.f32 %v2364_v52  ;;  %v4402_v28 = vmul.f32 -1.442695, %v2364_v52 }
 0x962   :  { %4745 = vpow2.f32 %v4402_v28 }
 0x966   :  { %v4744_v53 = vpop.eup %4743 }
 0x967   :  { %2388 = vrot.lane.b32.xlu0 %v4744_v53, %s4856_s28 }
 0x968   :  { %v4746_v54 = vpop.eup %4745 }
 0x969   :  { %v2369_v42 = vadd.f32 1.0, %v4746_v54 }
 0x96b   :  { %4747 = vrcp.f32 %v2369_v42  ;;  %v2381_v56 = vand.u32 2147483648, %v2369_v42  ;;  %vm2375_vm15 = vweird.f32 %v2369_v42  ;;  %v2379_v29 = vand.u32 2147483647, %v2369_v42 }
 0x96d   :  { %v2382_v57 = vor.u32 1.1754944e-38, %v2381_v56  ;;  %vm2380_vm2 = vcmp.eq.f32.partialorder %v2379_v29, 8.507059e+37 }
 0x971   :  { %v4748_v35 = vpop.eup %4747 }
 0x972   :  { %v2371_v55 = vmul.f32 %v4748_v35, %v2369_v42  ;;  %vm2376_vm14 = vweird.f32 %v4748_v35 }
 0x973   :  { %vm2377_vm1 = vmor %vm2375_vm15, %vm2376_vm14 }
 0x974   :  { %v2372_v39 = vsub.f32 1.0, %v2371_v55 }
 0x976   :  { %v2373_v19 = vmul.f32 %v4748_v35, %v2372_v39 }
 0x978   :  { %v2374_v61 = vadd.f32 %v4748_v35, %v2373_v19 }
 0x97a   :  { %v2378_v40 = vsel %vm2377_vm1, %v4748_v35, %v2374_v61 }
 0x97b   :  { %v2383_v23 = vsel %vm2380_vm2, %v2382_v57, %v2378_v40 }
 0x97c   :  { %v2386_v24 = vmul.f32 %v2383_v23, %v2330_v47  ;;  %v2473_v47 = vrot.slane %v5097_v6, 2 }
 0x9d9   :  { %v2389_v44 = vpop.permute.xlu0 %2388 }
 0x9da   :  { %v2391_v58 = vmul.f32 %v2389_v44, %v2383_v23 }
 0x9dc   :  { %2393 = vrot.lane.b32.xlu1 %v2391_v58, %s4857_s29 }
 0xa4e   :  { %v2394_v59 = vpop.permute.xlu1 %2393 }
 0xa4f   :  { %v2396_v27 = vadd.f32 %v2394_v59, %v2386_v24  ;;  %v2730_v59 = vld [vmem:[%s5379_s4 + $0x58] sm:$0xff] }
 0xa50   :  { %2745 = vmatpush.msra.mxu2 %v2730_v59 }
 0xa51   :  { %4749 = vtanh.f32 %v2396_v27 }
 0xa57   :  { %v4750_v60 = vpop.eup %4749 }
 0xa58   :  { %2399 = vrot.lane.b32.xlu2 %v4750_v60, %s4858_s30 }
 0xab2   :  { %v2400_v63 = vpop.permute.xlu2 %2399 }
 0xab3   :  { %v2402_v0 = vmul.f32 %v2400_v63, %v2383_v23 }
 0xab5   :  { %2404 = vrot.lane.b32.xlu0 %v2402_v0, %s4859_s6 }
 0xb27   :  { %v2405_v2 = vpop.permute.xlu0 %2404 }
 0xb28   :  { %2407 = vst.msk [vmem:[#allocation2 + $0x6] sm:$0x3] %vm2207_vm5, %v2405_v2  ;;  %4403 = vmatmul.msk.f32.vlgmr.msra.gmra.mxu0 %vm2113_vm0, %v2405_v2 }
 0xb2f   :  { %v5092_v4 = vld [vmem:[#allocation2] sm:$0xff] }
 0xb30   :  { %4411 = vmatmul.msk.f32.vlgmr.msrb.gmra.mxu0 %vm2113_vm0, %v5092_v4 }
 0xba5   :  { %v2427_v7 = vpop.f32.mrf.mxu0 }
 0xba6   :  { %v2428_v18 = vadd.f32 %v2427_v7, %v5097_v6 }
 0xba8   :  { %4751 = vtanh.f32 %v2428_v18  ;;  %v4404_v8 = vmul.f32 -1.442695, %v2428_v18 }
 0xbaa   :  { %4753 = vpow2.f32 %v4404_v8 }
 0xbae   :  { %v4752_v43 = vpop.eup %4751 }
 0xbaf   :  { %2452 = vrot.lane.b32.xlu1 %v4752_v43, %s4856_s28 }
 0xbb0   :  { %v4754_v10 = vpop.eup %4753 }
 0xbb1   :  { %v2433_v11 = vadd.f32 1.0, %v4754_v10 }
 0xbb3   :  { %4755 = vrcp.f32 %v2433_v11  ;;  %v2445_v20 = vand.u32 2147483648, %v2433_v11  ;;  %vm2439_vm4 = vweird.f32 %v2433_v11  ;;  %v2443_v16 = vand.u32 2147483647, %v2433_v11 }
 0xbb5   :  { %v2446_v22 = vor.u32 1.1754944e-38, %v2445_v20  ;;  %vm2444_vm7 = vcmp.eq.f32.partialorder %v2443_v16, 8.507059e+37 }
 0xbb9   :  { %v4756_v62 = vpop.eup %4755 }
 0xbba   :  { %v2435_v13 = vmul.f32 %v4756_v62, %v2433_v11  ;;  %vm2440_vm3 = vweird.f32 %v4756_v62 }
 0xbbb   :  { %vm2441_vm6 = vmor %vm2439_vm4, %vm2440_vm3 }
 0xbbc   :  { %v2436_v15 = vsub.f32 1.0, %v2435_v13 }
 0xbbe   :  { %v2437_v14 = vmul.f32 %v4756_v62, %v2436_v15 }
 0xbc0   :  { %v2438_v9 = vadd.f32 %v4756_v62, %v2437_v14 }
 0xbc2   :  { %v2442_v17 = vsel %vm2441_vm6, %v4756_v62, %v2438_v9  ;;  %vm2754_vm6 = vcmask 64512  }
 0xbc3   :  { %v2447_v25 = vsel %vm2444_vm7, %v2446_v22, %v2442_v17 }
 0xbc4   :  { %v2450_v30 = vmul.f32 %v2447_v25, %v2396_v27  ;;  %v2729_v27 = vld [vmem:[%s5379_s4 + $0x50] sm:$0xff] }
 0xbc5   :  { %2746 = vmatpush.msra.mxu2 %v2729_v27 }
 0xc21   :  { %v2453_v21 = vpop.permute.xlu1 %2452 }
 0xc22   :  { %v2455_v26 = vmul.f32 %v2453_v21, %v2447_v25 }
 0xc24   :  { %2457 = vrot.lane.b32.xlu2 %v2455_v26, %s4857_s29 }
 0xc7e   :  { %v2458_v31 = vpop.permute.xlu2 %2457 }
 0xc7f   :  { %v2460_v32 = vadd.f32 %v2458_v31, %v2450_v30  ;;  %v2605_v31 = vrot.slane %v5097_v6, 6 }
 0xc81   :  { %4757 = vtanh.f32 %v2460_v32 }
 0xc87   :  { %v4758_v33 = vpop.eup %4757 }
 0xc88   :  { %2463 = vrot.lane.b32.xlu0 %v4758_v33, %s4858_s30 }
 0xcfa   :  { %v2464_v37 = vpop.permute.xlu0 %2463 }
 0xcfb   :  { %v2466_v38 = vmul.f32 %v2464_v37, %v2447_v25 }
 0xcfd   :  { %2468 = vrot.lane.b32.xlu1 %v2466_v38, %s4859_s6 }
 0xd6f   :  { %v2469_v36 = vpop.permute.xlu1 %2468 }
 0xd70   :  { %2471 = vst.msk [vmem:[#allocation2 + $0x8] sm:$0x3] %vm2207_vm5, %v2469_v36  ;;  %4405 = vmatmul.msk.f32.vlgmr.msra.gmra.mxu1 %vm2113_vm0, %v2469_v36 }
 0xd78   :  { %4413 = vmatmul.msk.f32.vlgmr.msrb.gmra.mxu1 %vm2113_vm0, %v5092_v4 }
 0xded   :  { %v2494_v46 = vpop.f32.mrf.mxu1 }
 0xdee   :  { %v2495_v48 = vadd.f32 %v2494_v46, %v2473_v47 }
 0xdf0   :  { %4759 = vtanh.f32 %v2495_v48  ;;  %v4406_v50 = vmul.f32 -1.442695, %v2495_v48 }
 0xdf2   :  { %4761 = vpow2.f32 %v4406_v50 }
 0xdf6   :  { %v4760_v49 = vpop.eup %4759 }
 0xdf7   :  { %2519 = vrot.lane.b32.xlu2 %v4760_v49, %s4856_s28 }
 0xdf8   :  { %v4762_v51 = vpop.eup %4761 }
 0xdf9   :  { %v2500_v34 = vadd.f32 1.0, %v4762_v51 }
 0xdfb   :  { %4763 = vrcp.f32 %v2500_v34  ;;  %v2512_v35 = vand.u32 2147483648, %v2500_v34  ;;  %vm2506_vm9 = vweird.f32 %v2500_v34  ;;  %v2510_v55 = vand.u32 2147483647, %v2500_v34 }
 0xdfd   :  { %v2513_v19 = vor.u32 1.1754944e-38, %v2512_v35  ;;  %vm2511_vm11 = vcmp.eq.f32.partialorder %v2510_v55, 8.507059e+37 }
 0xe01   :  { %v4764_v52 = vpop.eup %4763 }
 0xe02   :  { %v2502_v53 = vmul.f32 %v4764_v52, %v2500_v34  ;;  %vm2507_vm8 = vweird.f32 %v4764_v52 }
 0xe03   :  { %vm2508_vm10 = vmor %vm2506_vm9, %vm2507_vm8 }
 0xe04   :  { %v2503_v28 = vsub.f32 1.0, %v2502_v53 }
 0xe06   :  { %v2504_v54 = vmul.f32 %v4764_v52, %v2503_v28 }
 0xe08   :  { %v2505_v42 = vadd.f32 %v4764_v52, %v2504_v54 }
 0xe0a   :  { %v2509_v39 = vsel %vm2508_vm10, %v4764_v52, %v2505_v42 }
 0xe0b   :  { %v2514_v56 = vsel %vm2511_vm11, %v2513_v19, %v2509_v39 }
 0xe0c   :  { %v2517_v40 = vmul.f32 %v2514_v56, %v2460_v32 }
 0xe51   :  { %v2520_v61 = vpop.permute.xlu2 %2519 }
 0xe52   :  { %v2522_v29 = vmul.f32 %v2520_v61, %v2514_v56 }
 0xe54   :  { %2524 = vrot.lane.b32.xlu0 %v2522_v29, %s4857_s29  ;;  %v2723_v29 = vpop.f32.mrf.mxu1 }
 0xec6   :  { %v2525_v57 = vpop.permute.xlu0 %2524 }
 0xec7   :  { %v2527_v44 = vadd.f32 %v2525_v57, %v2517_v40 }
 0xec9   :  { %4765 = vtanh.f32 %v2527_v44 }
 0xecf   :  { %v4766_v23 = vpop.eup %4765 }
 0xed0   :  { %2530 = vrot.lane.b32.xlu1 %v4766_v23, %s4858_s30 }
 0xf42   :  { %v2531_v58 = vpop.permute.xlu1 %2530 }
 0xf43   :  { %v2533_v24 = vmul.f32 %v2531_v58, %v2514_v56 }
 0xf45   :  { %2535 = vrot.lane.b32.xlu2 %v2533_v24, %s4859_s6  ;;  %v2790_v24 = vlaneseq }
 0xf47   :  { %v2791_v59 = vshrl.u32 %v2790_v24, 7  ;;  %v2818_v27 = vand.u32 127, %v2790_v24 }
 0xf9f   :  { %v2536_v60 = vpop.permute.xlu2 %2535 }
 0xfa0   :  { %2538 = vst.msk [vmem:[#allocation2 + $0xa] sm:$0x3] %vm2207_vm5, %v2536_v60  ;;  %4407 = vmatmul.msk.f32.vlgmr.msrb.gmra.mxu2 %vm2113_vm0, %v2536_v60  ;;  %v2797_v60 = vand.u32 1, %v2791_v59 }
 0xfa8   :  { %4415 = vmatmul.msk.f32.vlgmr.msra.gmra.mxu2 %vm2113_vm0, %v5092_v4 }
0x1023   :  { %v2560_v63 = vpop.f32.mrf.mxu2 }
0x1024   :  { %v2561_v0 = vadd.f32 %v2560_v63, %v2539_v3  ;;  %v2823_v3 = vand.u32 1, %v2818_v27  ;;  %v2792_v63 = vadd.s32 8, %v2791_v59  ;;  %v3016_v59 = vld [vmem:[%s5379_s4 + $0xb0] sm:$0xff] }
0x1026   :  { %4767 = vtanh.f32 %v2561_v0  ;;  %v4408_v1 = vmul.f32 -1.442695, %v2561_v0 }
0x1028   :  { %4769 = vpow2.f32 %v4408_v1 }
0x102b   :  { %v2748_v40 = vpop.f32.mrf.mxu2 }
0x102c   :  { %v4768_v12 = vpop.eup %4767 }
0x102d   :  { %2585 = vrot.lane.b32.xlu0 %v4768_v12, %s4856_s28 }
0x102e   :  { %v4770_v2 = vpop.eup %4769 }
0x102f   :  { %v2566_v5 = vadd.f32 1.0, %v4770_v2  ;;  %v2804_v2 = vand.u32 1, %v2792_v63 }
0x1031   :  { %4771 = vrcp.f32 %v2566_v5  ;;  %v2578_v11 = vand.u32 2147483648, %v2566_v5  ;;  %vm2572_vm13 = vweird.f32 %v2566_v5  ;;  %v2576_v62 = vand.u32 2147483647, %v2566_v5 }
0x1032   :  { %vm2832_vm7 = vcmp.eq.s32.totalorder %v2804_v2, %v2823_v3 }
0x1033   :  { %v2579_v15 = vor.u32 1.1754944e-38, %v2578_v11  ;;  %vm2577_vm15 = vcmp.eq.f32.partialorder %v2576_v62, 8.507059e+37 }
0x1037   :  { %v4772_v7 = vpop.eup %4771 }
0x1038   :  { %v2568_v18 = vmul.f32 %v4772_v7, %v2566_v5  ;;  %vm2573_vm12 = vweird.f32 %v4772_v7 }
0x1039   :  { %vm2574_vm14 = vmor %vm2572_vm13, %vm2573_vm12 }
0x103a   :  { %v2569_v43 = vsub.f32 1.0, %v2568_v18 }
0x103c   :  { %v2570_v8 = vmul.f32 %v4772_v7, %v2569_v43 }
0x103e   :  { %v2571_v10 = vadd.f32 %v4772_v7, %v2570_v8 }
0x1040   :  { %v2575_v13 = vsel %vm2574_vm14, %v4772_v7, %v2571_v10 }
0x1041   :  { %v2580_v9 = vsel %vm2577_vm15, %v2579_v15, %v2575_v13  ;;  %vm3022_vm15 = vcmask 523264  }
0x1042   :  { %v2583_v16 = vmul.f32 %v2580_v9, %v2527_v44  ;;  %v2698_v44 = vpop.f32.mrf.mxu0 }
0x109f   :  { %v2586_v14 = vpop.permute.xlu0 %2585 }
0x10a0   :  { %v2588_v20 = vmul.f32 %v2586_v14, %v2580_v9 }
0x10a2   :  { %2590 = vrot.lane.b32.xlu1 %v2588_v20, %s4857_s29 }
0x1114   :  { %v2591_v17 = vpop.permute.xlu1 %2590 }
0x1115   :  { %v2593_v22 = vadd.f32 %v2591_v17, %v2583_v16  ;;  %v2886_v16 = vld [vmem:[%s5379_s4 + $0x60] sm:$0xff] }
0x1116   :  { %2908 = vmatpush.msra.mxu1 %v2886_v16 }
0x1117   :  { %4773 = vtanh.f32 %v2593_v22 }
0x111d   :  { %v4774_v21 = vpop.eup %4773 }
0x111e   :  { %2596 = vrot.lane.b32.xlu2 %v4774_v21, %s4858_s30 }
0x1178   :  { %v2597_v25 = vpop.permute.xlu2 %2596 }
0x1179   :  { %v2599_v26 = vmul.f32 %v2597_v25, %v2580_v9 }
0x117b   :  { %2601 = vrot.lane.b32.xlu0 %v2599_v26, %s4859_s6 }
0x11ed   :  { %v2602_v30 = vpop.permute.xlu0 %2601 }
0x11ee   :  { %2604 = vst.msk [vmem:[#allocation2 + $0xc] sm:$0x3] %vm2207_vm5, %v2602_v30  ;;  %4409 = vmatmul.msk.f32.vlgmr.msra.gmra.mxu3 %vm2113_vm0, %v2602_v30 }
0x1271   :  { %v2626_v32 = vpop.f32.mrf.mxu3 }
0x1272   :  { %v2627_v33 = vadd.f32 %v2626_v32, %v2605_v31 }
0x1274   :  { %4775 = vtanh.f32 %v2627_v33  ;;  %v4410_v38 = vmul.f32 -1.442695, %v2627_v33 }
0x1276   :  { %4777 = vpow2.f32 %v4410_v38 }
0x127a   :  { %v4776_v37 = vpop.eup %4775 }
0x127b   :  { %2651 = vrot.lane.b32.xlu1 %v4776_v37, %s4856_s28 }
0x127c   :  { %v4778_v41 = vpop.eup %4777 }
0x127d   :  { %v2632_v45 = vadd.f32 1.0, %v4778_v41 }
0x127f   :  { %4779 = vrcp.f32 %v2632_v45  ;;  %v2644_v50 = vand.u32 2147483648, %v2632_v45  ;;  %vm2638_vm2 = vweird.f32 %v2632_v45  ;;  %v2642_v6 = vand.u32 2147483647, %v2632_v45 }
0x1281   :  { %v2645_v34 = vor.u32 1.1754944e-38, %v2644_v50  ;;  %vm2643_vm4 = vcmp.eq.f32.partialorder %v2642_v6, 8.507059e+37 }
0x1285   :  { %v4780_v36 = vpop.eup %4779 }
0x1286   :  { %v2634_v47 = vmul.f32 %v4780_v36, %v2632_v45  ;;  %vm2639_vm1 = vweird.f32 %v4780_v36 }
0x1287   :  { %vm2640_vm3 = vmor %vm2638_vm2, %vm2639_vm1 }
0x1288   :  { %v2635_v46 = vsub.f32 1.0, %v2634_v47  ;;  %v4860_v47 = vmov 16.0  }
0x128a   :  { %v2636_v48 = vmul.f32 %v4780_v36, %v2635_v46 }
0x128c   :  { %v2637_v49 = vadd.f32 %v4780_v36, %v2636_v48 }
0x128e   :  { %v2641_v51 = vsel %vm2640_vm3, %v4780_v36, %v2637_v49 }
0x128f   :  { %v2646_v53 = vsel %vm2643_vm4, %v2645_v34, %v2641_v51 }
0x1290   :  { %v2649_v54 = vmul.f32 %v2646_v53, %v2593_v22 }
0x12ed   :  { %v2652_v52 = vpop.permute.xlu1 %2651 }
0x12ee   :  { %v2654_v28 = vmul.f32 %v2652_v52, %v2646_v53 }
0x12f0   :  { %2656 = vrot.lane.b32.xlu2 %v2654_v28, %s4857_s29 }
0x134a   :  { %v2657_v42 = vpop.permute.xlu2 %2656 }
0x134b   :  { %v2659_v35 = vadd.f32 %v2657_v42, %v2649_v54 }
0x134d   :  { %4781 = vtanh.f32 %v2659_v35 }
0x1353   :  { %v4782_v55 = vpop.eup %4781 }
0x1354   :  { %2662 = vrot.lane.b32.xlu0 %v4782_v55, %s4858_s30 }
0x13c6   :  { %v2663_v39 = vpop.permute.xlu0 %2662 }
0x13c7   :  { %v2665_v19 = vmul.f32 %v2663_v39, %v2646_v53 }
0x13c9   :  { %2667 = vrot.lane.b32.xlu1 %v2665_v19, %s4859_s6  ;;  %v2978_v19 = vld [vmem:[%s5379_s4 + $0x80] sm:$0xff] }
0x13ca   :  { %3001 = vmatpush.msrb.mxu2 %v2978_v19 }
0x143b   :  { %v2668_v61 = vpop.permute.xlu1 %2667 }
0x143c   :  { %2670 = vst.msk [vmem:[#allocation2 + $0xe] sm:$0x3] %vm2207_vm5, %v2668_v61  ;;  %vm2831_vm5 = vcmp.eq.s32.totalorder %v2797_v60, %v2823_v3  ;;  %v2977_v61 = vld [vmem:[%s5379_s4 + $0x78] sm:$0xff]  ;;  %v3015_v3 = vld [vmem:[%s5379_s4 + $0xa8] sm:$0xff] }
0x143d   :  { %3002 = vmatpush.msrb.mxu2 %v2977_v61  ;;  %v3107_v61 = vld [vmem:[%s5379_s4 + $0xf0] sm:$0xff] }
0x1443   :  { %v5142_v56 = vld [vmem:[#allocation2 + $0x8] sm:$0xff] }
0x1444   :  { %4412 = vmatmul.msk.f32.gmra.mxu0 %vm2113_vm0, %v5142_v56  ;;  %4414 = vmatmul.msk.f32.gmra.mxu1 %vm2113_vm0, %v5142_v56 }
0x1445   :  { %4416 = vmatmul.msk.f32.gmra.mxu2 %vm2113_vm0, %v5142_v56 }
0x14c1   :  { %v2726_v57 = vpop.f32.mrf.mxu1  ;;  %v2701_v58 = vpop.f32.mrf.mxu0 }
0x14c2   :  { %4417 = vmatpush.xpose.msk.msrb.mxu3 %vm2754_vm6, %v2726_v57  ;;  %v3019_v57 = vld [vmem:[%s5379_s4 + $0xc8] sm:$0xff] }
0x14c6   :  { %4418 = vmatpush.xpose.msk.msrb.mxu3 %vm2754_vm6, %v2723_v29 }
0x14c8   :  { %v2751_v23 = vpop.f32.mrf.mxu2 }
0x14c9   :  { %2877 = vmatpush.msra.mxu0 %v2751_v23  ;;  %4419 = vmatmul.msk.f32.vlgmr.msrb.gmra.mxu3 %vm2754_vm6, %v2698_v44  ;;  %v3018_v44 = vld [vmem:[%s5379_s4 + $0xc0] sm:$0xff]  ;;  %v3017_v23 = vld [vmem:[%s5379_s4 + $0xb8] sm:$0xff] }
0x14ca   :  { %3037 = vmatpush.msra.mxu3 %v3019_v57 }
0x14cb   :  { %2878 = vmatpush.msra.mxu0 %v2748_v40 }
0x14cc   :  { %3038 = vmatpush.msra.mxu3 %v3018_v44  ;;  %v3148_v44 = vld [vmem:[%s5379_s4 + $0x138] sm:$0xff] }
0x14cd   :  { %3130 = vmatpush.msrb.mxu0 %v3107_v61  ;;  %3165 = vmatpush.msrb.mxu1 %v3148_v44 }
0x14ce   :  { %3039 = vmatpush.msra.mxu3 %v3017_v23  ;;  %v3147_v23 = vld [vmem:[%s5379_s4 + $0x130] sm:$0xff] }
0x14cf   :  { %3166 = vmatpush.msrb.mxu1 %v3147_v23 }
0x14d0   :  { %3040 = vmatpush.msra.mxu3 %v3016_v59 }
0x14d1   :  { %4420 = vmatmul.msk.f32.gmra.mxu3 %vm2754_vm6, %v2701_v58 }
0x14d2   :  { %3041 = vmatpush.msra.mxu3 %v3015_v3 }
0x154c   :  { %v2784_v0 = vpop.f32.mrf.mxu3 }
0x154d   :  { %v2833_v12 = vsel %vm2831_vm5, %v2784_v0, -1e+30 }
0x154e   :  { %v2835_v1 = vsel %vm2113_vm0, %v2833_v12, -inf }
0x154f   :  { %2836 = vmax.xlane.f32.xlu2 %v2835_v1 }
0x1554   :  { %v2787_v5 = vpop.f32.mrf.mxu3 }
0x1555   :  { %v2834_v7 = vsel %vm2832_vm7, %v2787_v5, -1e+30  ;;  %vm3321_vm7 = vcmask 80896  }
0x1556   :  { %v2838_v18 = vsel %vm2113_vm0, %v2834_v7, -inf }
0x1557   :  { %2839 = vmax.xlane.f32.xlu0 %v2838_v18  ;;  %v4707_v18 = vld [vmem:[%s5379_s4 + $0x68] ss:$0 sm:$0xff] }
0x15c2   :  { %v2837_v43 = vpop.xlane.xlu2 %2836 }
0x15c3   :  { %v2841_v8 = vsub.f32 %v2833_v12, %v2837_v43 }
0x15c5   :  { %v2843_v10 = vmul.f32 1.442695, %v2841_v8 }
0x15c7   :  { %4783 = vpow2.f32 %v2843_v10 }
0x15ca   :  { %v2840_v11 = vpop.xlane.xlu0 %2839 }
0x15cb   :  { %v2842_v62 = vsub.f32 %v2834_v7, %v2840_v11  ;;  %v4708_v11 = vld [vmem:[%s5379_s4 + $0x70] ss:$0 sm:$0xff] }
0x15cd   :  { %v4784_v13 = vpop.eup %4783  ;;  %v2845_v15 = vmul.f32 1.442695, %v2842_v62 }
0x15ce   :  { %v2847_v14 = vsel %vm2113_vm0, %v4784_v13, 0.0 }
0x15cf   :  { %4785 = vpow2.f32 %v2845_v15  ;;  %2848 = vadd.xlane.f32.xlu1 %v2847_v14 }
0x15d5   :  { %v4786_v9 = vpop.eup %4785 }
0x15d6   :  { %v2850_v20 = vsel %vm2113_vm0, %v4786_v9, 0.0 }
0x15d7   :  { %2851 = vadd.xlane.f32.xlu2 %v2850_v20 }
0x1642   :  { %v2849_v17 = vpop.xlane.xlu1 %2848 }
0x1643   :  { %4787 = vrcp.f32 %v2849_v17 }
0x1649   :  { %v4788_v22 = vpop.eup %4787 }
0x164a   :  { %v2855_v21 = vmul.f32 %v4788_v22, %v4784_v13  ;;  %v2852_v25 = vpop.xlane.xlu2 %2851 }
0x164b   :  { %4789 = vrcp.f32 %v2852_v25  ;;  %v3013_v25 = vld [vmem:[%s5379_s4 + $0x98] sm:$0xff] }
0x164c   :  { %4421 = vmatmul.msk.f32.vlgmr.msra.gmra.mxu0 %vm2113_vm0, %v2855_v21  ;;  %4791 = vrcp.f32 %v4860_v47  ;;  %v3014_v21 = vld [vmem:[%s5379_s4 + $0xa0] sm:$0xff] }
0x164d   :  { %3042 = vmatpush.msra.mxu3 %v3014_v21  ;;  %v3143_v21 = vld [vmem:[%s5379_s4 + $0x110] sm:$0xff] }
0x164f   :  { %3043 = vmatpush.msra.mxu3 %v3013_v25  ;;  %v3142_v25 = vld [vmem:[%s5379_s4 + $0x108] sm:$0xff] }
0x1651   :  { %v4790_v26 = vpop.eup %4789 }
0x1652   :  { %v2856_v30 = vmul.f32 %v4790_v26, %v4786_v9  ;;  %v4792_v46 = vpop.eup %4791  ;;  %v3012_v26 = vld [vmem:[%s5379_s4 + $0x90] sm:$0xff] }
0x1653   :  { %v2927_v48 = vmul.f32 16.0, %v4792_v46  ;;  %vm2931_vm8 = vweird.f32 %v4792_v46  ;;  %3044 = vmatpush.msra.mxu3 %v3012_v26  ;;  %v3141_v26 = vld [vmem:[%s5379_s4 + $0x100] sm:$0xff] }
0x1654   :  { %4422 = vmatmul.msk.f32.gmra.mxu0 %vm2113_vm0, %v2856_v30  ;;  %v4709_v30 = vld [vmem:[%s5379_s4 + $0x88] ss:$0 sm:$0xff] }
0x1655   :  { %v2928_v49 = vsub.f32 1.0, %v2927_v48 }
0x1657   :  { %v2929_v50 = vmul.f32 %v4792_v46, %v2928_v49 }
0x1659   :  { %v2930_v6 = vadd.f32 %v4792_v46, %v2929_v50 }
0x165b   :  { %v5169_v51 = vsel %vm2931_vm8, %v4792_v46, %v2930_v6  ;;  %vm3349_vm8 = vcmask 74752  }
0x16c9   :  { %v2880_v31 = vpop.f32.mrf.mxu0 }
0x16ca   :  { %4423 = vmatmul.msk.f32.vlgmr.msra.gmra.mxu1 %vm2754_vm6, %v2880_v31 }
0x16d1   :  { %v2883_v32 = vpop.f32.mrf.mxu0 }
0x16d2   :  { %4424 = vmatmul.msk.f32.gmra.mxu1 %vm2754_vm6, %v2883_v32 }
0x1747   :  { %v2910_v33 = vpop.f32.mrf.mxu1 }
0x1748   :  { %v2916_v37 = vadd.f32 %v2910_v33, %v5092_v4 }
0x174a   :  { %v2920_v38 = vsel %vm2113_vm0, %v2916_v37, 0.0 }
0x174b   :  { %2921 = vadd.xlane.f32.xlu2 %v2920_v38 }
0x174f   :  { %v2913_v41 = vpop.f32.mrf.mxu1 }
0x1750   :  { %v2917_v45 = vadd.f32 %v2913_v41, %v5142_v56 }
0x1752   :  { %v2923_v36 = vsel %vm2113_vm0, %v2917_v45, 0.0 }
0x1753   :  { %2924 = vadd.xlane.f32.xlu0 %v2923_v36 }
0x17be   :  { %v2922_v4 = vpop.xlane.xlu2 %2921 }
0x17bf   :  { %v2933_v34 = vmul.f32 %v5169_v51, %v2922_v4 }
0x17c1   :  { %v2935_v52 = vsub.f32 %v2916_v37, %v2933_v34 }
0x17c3   :  { %v2937_v53 = vmul.f32 %v2935_v52, %v2935_v52 }
0x17c5   :  { %v2939_v28 = vsel %vm2113_vm0, %v2937_v53, 0.0 }
0x17c6   :  { %v2925_v54 = vpop.xlane.xlu0 %2924  ;;  %2940 = vadd.xlane.f32.xlu1 %v2939_v28 }
0x17c7   :  { %v2934_v42 = vmul.f32 %v5169_v51, %v2925_v54 }
0x17c9   :  { %v2936_v35 = vsub.f32 %v2917_v45, %v2934_v42  ;;  %v4710_v45 = vld [vmem:[%s5379_s4 + $0xd0] ss:$0 sm:$0xff] }
0x17cb   :  { %v2938_v55 = vmul.f32 %v2936_v35, %v2936_v35 }
0x17cd   :  { %v2942_v39 = vsel %vm2113_vm0, %v2938_v55, 0.0 }
0x17ce   :  { %2943 = vadd.xlane.f32.xlu2 %v2942_v39 }
0x1839   :  { %v2941_v56 = vpop.xlane.xlu1 %2940 }
0x183a   :  { %v2945_v29 = vmul.f32 %v2941_v56, %v5169_v51  ;;  %v3106_v56 = vld [vmem:[%s5379_s4 + $0xe8] sm:$0xff] }
0x183b   :  { %3131 = vmatpush.msrb.mxu0 %v3106_v56  ;;  %v3225_v56 = vld [vmem:[%s5379_s4 + $0x1a0] sm:$0xff] }
0x183c   :  { %v2947_v40 = vadd.f32 1e-05, %v2945_v29 }
0x183e   :  { %4793 = vrsqrt.f32 %v2947_v40  ;;  %vm2955_vm10 = vweird.f32 %v2947_v40 }
0x1841   :  { %v2944_v58 = vpop.xlane.xlu2 %2943 }
0x1842   :  { %v2946_v24 = vmul.f32 %v2944_v58, %v5169_v51  ;;  %v3146_v58 = vld [vmem:[%s5379_s4 + $0x128] sm:$0xff] }
0x1843   :  { %3167 = vmatpush.msrb.mxu1 %v3146_v58 }
0x1844   :  { %v4794_v27 = vpop.eup %4793  ;;  %v2948_v60 = vadd.f32 1e-05, %v2946_v24 }
0x1845   :  { %v2950_v63 = vmul.f32 %v4794_v27, %v2947_v40  ;;  %vm2956_vm9 = vweird.f32 %v4794_v27 }
0x1846   :  { %4795 = vrsqrt.f32 %v2948_v60  ;;  %vm2957_vm11 = vmor %vm2955_vm10, %vm2956_vm9  ;;  %vm2965_vm13 = vweird.f32 %v2948_v60 }
0x1847   :  { %v2951_v0 = vmul.f32 %v4794_v27, %v2950_v63  ;;  %v3144_v63 = vld [vmem:[%s5379_s4 + $0x118] sm:$0xff] }
0x1849   :  { %v2952_v12 = vmul.f32 0.5, %v2951_v0 }
0x184b   :  { %v2953_v1 = vsub.f32 1.5, %v2952_v12 }
0x184c   :  { %v4796_v2 = vpop.eup %4795 }
0x184d   :  { %v2954_v5 = vmul.f32 %v4794_v27, %v2953_v1  ;;  %v2960_v7 = vmul.f32 %v4796_v2, %v2948_v60  ;;  %vm2966_vm12 = vweird.f32 %v4796_v2 }
0x184e   :  { %vm2967_vm14 = vmor %vm2965_vm13, %vm2966_vm12 }
0x184f   :  { %v2958_v43 = vsel %vm2957_vm11, %v4794_v27, %v2954_v5  ;;  %v2961_v8 = vmul.f32 %v4796_v2, %v2960_v7  ;;  %v3145_v27 = vld [vmem:[%s5379_s4 + $0x120] sm:$0xff] }
0x1850   :  { %v2969_v10 = vmul.f32 %v2958_v43, %v2935_v52  ;;  %3168 = vmatpush.msrb.mxu1 %v3145_v27 }
0x1851   :  { %v2962_v62 = vmul.f32 0.5, %v2961_v8 }
0x1852   :  { %v2972_v13 = vmul.f32 %v4707_v18, %v2969_v10  ;;  %3169 = vmatpush.msrb.mxu1 %v3144_v63  ;;  %v3288_v63 = vld [vmem:[%s5379_s4 + $0x200] sm:$0xff] }
0x1853   :  { %v2963_v15 = vsub.f32 1.5, %v2962_v62 }
0x1854   :  { %v2975_v14 = vadd.f32 %v4708_v11, %v2972_v13  ;;  %3170 = vmatpush.msrb.mxu1 %v3143_v21 }
0x1855   :  { %v2964_v9 = vmul.f32 %v4796_v2, %v2963_v15 }
0x1856   :  { %4425 = vmatmul.msk.f32.vlgmr.msrb.gmra.mxu2 %vm2113_vm0, %v2975_v14  ;;  %3171 = vmatpush.msrb.mxu1 %v3142_v25 }
0x1857   :  { %v2968_v20 = vsel %vm2967_vm14, %v4796_v2, %v2964_v9 }
0x1858   :  { %v2970_v16 = vmul.f32 %v2968_v20, %v2936_v35  ;;  %3172 = vmatpush.msrb.mxu1 %v3141_v26 }
0x185a   :  { %v2973_v17 = vmul.f32 %v4707_v18, %v2970_v16  ;;  %v4711_v18 = vld [vmem:[%s5379_s4 + $0xd8] ss:$0 sm:$0xff] }
0x185c   :  { %v2976_v22 = vadd.f32 %v4708_v11, %v2973_v17  ;;  %v4712_v11 = vld [vmem:[%s5379_s4 + $0xe0] ss:$0 sm:$0xff] }
0x185e   :  { %4426 = vmatmul.msk.f32.gmra.mxu2 %vm2113_vm0, %v2976_v22 }
0x18d9   :  { %v3004_v31 = vpop.f32.mrf.mxu2 }
0x18da   :  { %v3005_v32 = vadd.f32 %v4709_v30, %v3004_v31  ;;  %v3188_v31 = vld [vmem:[%s5379_s4 + $0x178] sm:$0xff] }
0x18dc   :  { %v3010_v33 = vmax.f32 %v3005_v32, 0.0  ;;  %v3187_v32 = vld [vmem:[%s5379_s4 + $0x170] sm:$0xff] }
0x18de   :  { %4427 = vmatmul.msk.f32.vlgmr.msra.gmra.mxu3 %vm3022_vm15, %v3010_v33  ;;  %v3186_v33 = vld [vmem:[%s5379_s4 + $0x168] sm:$0xff] }
0x18e1   :  { %v3007_v37 = vpop.f32.mrf.mxu2 }
0x18e2   :  { %v3008_v38 = vadd.f32 %v4709_v30, %v3007_v37  ;;  %v3189_v30 = vld [vmem:[%s5379_s4 + $0x180] sm:$0xff] }
0x18e3   :  { %3206 = vmatpush.msra.mxu2 %v3189_v30  ;;  %v3185_v37 = vld [vmem:[%s5379_s4 + $0x160] sm:$0xff] }
0x18e4   :  { %v3011_v41 = vmax.f32 %v3008_v38, 0.0  ;;  %v4713_v38 = vld [vmem:[%s5379_s4 + $0xf8] ss:$0 sm:$0xff] }
0x18e5   :  { %3207 = vmatpush.msra.mxu2 %v3188_v31  ;;  %v4717_v31 = vld [vmem:[%s5379_s4 + $0x218] ss:$0 sm:$0xff] }
0x18e6   :  { %4428 = vmatmul.msk.f32.gmra.mxu3 %vm3022_vm15, %v3011_v41 }
0x18e7   :  { %3208 = vmatpush.msra.mxu2 %v3187_v32 }
0x18e9   :  { %3209 = vmatpush.msra.mxu2 %v3186_v33 }
0x18eb   :  { %3210 = vmatpush.msra.mxu2 %v3185_v37 }
0x1961   :  { %v3046_v36 = vpop.f32.mrf.mxu3 }
0x1962   :  { %v3047_v47 = vadd.f32 %v4710_v45, %v3046_v36 }
0x1964   :  { %v3052_v46 = vadd.f32 %v3047_v47, %v2975_v14 }
0x1966   :  { %v3056_v48 = vsel %vm2113_vm0, %v3052_v46, 0.0 }
0x1967   :  { %3057 = vadd.xlane.f32.xlu0 %v3056_v48 }
0x1969   :  { %v3049_v49 = vpop.f32.mrf.mxu3 }
0x196a   :  { %v3050_v50 = vadd.f32 %v4710_v45, %v3049_v49  ;;  %v3184_v49 = vld [vmem:[%s5379_s4 + $0x158] sm:$0xff] }
0x196b   :  { %3211 = vmatpush.msra.mxu2 %v3184_v49 }
0x196c   :  { %v3053_v6 = vadd.f32 %v3050_v50, %v2976_v22  ;;  %v3183_v50 = vld [vmem:[%s5379_s4 + $0x150] sm:$0xff] }
0x196d   :  { %3212 = vmatpush.msra.mxu2 %v3183_v50 }
0x196e   :  { %v3059_v4 = vsel %vm2113_vm0, %v3053_v6, 0.0 }
0x196f   :  { %3060 = vadd.xlane.f32.xlu1 %v3059_v4  ;;  %v3230_v4 = vld [vmem:[%s5379_s4 + $0x1c8] sm:$0xff] }
0x1970   :  { %3247 = vmatpush.msrb.mxu3 %v3230_v4 }
0x19da   :  { %v3058_v34 = vpop.xlane.xlu0 %3057 }
0x19db   :  { %v3062_v52 = vmul.f32 %v3058_v34, %v5169_v51  ;;  %v3229_v34 = vld [vmem:[%s5379_s4 + $0x1c0] sm:$0xff] }
0x19dc   :  { %3248 = vmatpush.msrb.mxu3 %v3229_v34 }
0x19dd   :  { %v3064_v53 = vsub.f32 %v3052_v46, %v3062_v52  ;;  %v3228_v52 = vld [vmem:[%s5379_s4 + $0x1b8] sm:$0xff] }
0x19de   :  { %3249 = vmatpush.msrb.mxu3 %v3228_v52 }
0x19df   :  { %v3066_v28 = vmul.f32 %v3064_v53, %v3064_v53 }
0x19e1   :  { %v3068_v54 = vsel %vm2113_vm0, %v3066_v28, 0.0  ;;  %v3226_v28 = vld [vmem:[%s5379_s4 + $0x1a8] sm:$0xff] }
0x19e2   :  { %3069 = vadd.xlane.f32.xlu2 %v3068_v54  ;;  %v3061_v42 = vpop.xlane.xlu1 %3060  ;;  %v4714_v54 = vld [vmem:[%s5379_s4 + $0x140] ss:$0 sm:$0xff] }
0x19e3   :  { %v3063_v35 = vmul.f32 %v3061_v42, %v5169_v51 }
0x19e5   :  { %v3065_v55 = vsub.f32 %v3053_v6, %v3063_v35  ;;  %v3182_v6 = vld [vmem:[%s5379_s4 + $0x148] sm:$0xff] }
0x19e6   :  { %3213 = vmatpush.msra.mxu2 %v3182_v6 }
0x19e7   :  { %v3067_v39 = vmul.f32 %v3065_v55, %v3065_v55 }
0x19e9   :  { %v3071_v19 = vsel %vm2113_vm0, %v3067_v39, 0.0 }
0x19ea   :  { %3072 = vadd.xlane.f32.xlu0 %v3071_v19 }
0x1a55   :  { %v3070_v29 = vpop.xlane.xlu2 %3069 }
0x1a56   :  { %v3074_v40 = vmul.f32 %v3070_v29, %v5169_v51  ;;  %v3224_v29 = vld [vmem:[%s5379_s4 + $0x198] sm:$0xff] }
0x1a58   :  { %v3076_v57 = vadd.f32 1e-05, %v3074_v40  ;;  %v3223_v40 = vld [vmem:[%s5379_s4 + $0x190] sm:$0xff] }
0x1a5a   :  { %4797 = vrsqrt.f32 %v3076_v57  ;;  %vm3084_vm2 = vweird.f32 %v3076_v57 }
0x1a5d   :  { %v3073_v24 = vpop.xlane.xlu0 %3072 }
0x1a5e   :  { %v3075_v59 = vmul.f32 %v3073_v24, %v5169_v51 }
0x1a60   :  { %v4798_v60 = vpop.eup %4797  ;;  %v3077_v3 = vadd.f32 1e-05, %v3075_v59 }
0x1a61   :  { %v3079_v0 = vmul.f32 %v4798_v60, %v3076_v57  ;;  %vm3085_vm1 = vweird.f32 %v4798_v60  ;;  %v4715_v57 = vld [vmem:[%s5379_s4 + $0x188] ss:$0 sm:$0xff] }
0x1a62   :  { %4799 = vrsqrt.f32 %v3077_v3  ;;  %vm3086_vm3 = vmor %vm3084_vm2, %vm3085_vm1  ;;  %vm3094_vm6 = vweird.f32 %v3077_v3 }
0x1a63   :  { %v3080_v12 = vmul.f32 %v4798_v60, %v3079_v0  ;;  %v3287_v0 = vld [vmem:[%s5379_s4 + $0x1f8] sm:$0xff] }
0x1a65   :  { %v3081_v1 = vmul.f32 0.5, %v3080_v12  ;;  %v3286_v12 = vld [vmem:[%s5379_s4 + $0x1f0] sm:$0xff] }
0x1a67   :  { %v3082_v2 = vsub.f32 1.5, %v3081_v1  ;;  %v3285_v1 = vld [vmem:[%s5379_s4 + $0x1e8] sm:$0xff] }
0x1a68   :  { %v4800_v51 = vpop.eup %4799 }
0x1a69   :  { %v3083_v5 = vmul.f32 %v4798_v60, %v3082_v2  ;;  %v3089_v7 = vmul.f32 %v4800_v51, %v3077_v3  ;;  %vm3095_vm4 = vweird.f32 %v4800_v51  ;;  %v3289_v3 = vld [vmem:[%s5379_s4 + $0x208] sm:$0xff]  ;;  %v3284_v2 = vld [vmem:[%s5379_s4 + $0x1e0] sm:$0xff] }
0x1a6a   :  { %vm3096_vm5 = vmor %vm3094_vm6, %vm3095_vm4 }
0x1a6b   :  { %v3087_v43 = vsel %vm3086_vm3, %v4798_v60, %v3083_v5  ;;  %v3090_v8 = vmul.f32 %v4800_v51, %v3089_v7  ;;  %v3290_v60 = vld [vmem:[%s5379_s4 + $0x210] sm:$0xff]  ;;  %v3318_v5 = vld [vmem:[%s5379_s4 + $0x228] sm:$0x3]  ;;  %v3317_v7 = vld [vmem:[%s5379_s4 + $0x220] sm:$0xff] }
0x1a6c   :  { %v3098_v10 = vmul.f32 %v3087_v43, %v3064_v53  ;;  %v3227_v53 = vld [vmem:[%s5379_s4 + $0x1b0] sm:$0xff]  ;;  %3304 = vmatpush.msra.mxu0 %v3290_v60 }
0x1a6d   :  { %v3091_v62 = vmul.f32 0.5, %v3090_v8  ;;  %3250 = vmatpush.msrb.mxu3 %v3227_v53 }
0x1a6e   :  { %v3101_v13 = vmul.f32 %v4711_v18, %v3098_v10  ;;  %3305 = vmatpush.msra.mxu0 %v3289_v3 }
0x1a6f   :  { %v3092_v15 = vsub.f32 1.5, %v3091_v62  ;;  %3251 = vmatpush.msrb.mxu3 %v3226_v28 }
0x1a70   :  { %v3104_v14 = vadd.f32 %v4712_v11, %v3101_v13  ;;  %3306 = vmatpush.msra.mxu0 %v3288_v63 }
0x1a71   :  { %v3093_v9 = vmul.f32 %v4800_v51, %v3092_v15  ;;  %3252 = vmatpush.msrb.mxu3 %v3225_v56 }
0x1a72   :  { %4429 = vmatmul.msk.f32.vlgmr.msrb.gmra.mxu0 %vm2113_vm0, %v3104_v14 }
0x1a73   :  { %v3097_v20 = vsel %vm3096_vm5, %v4800_v51, %v3093_v9  ;;  %3253 = vmatpush.msrb.mxu3 %v3224_v29  ;;  %3307 = vmatpush.msra.mxu0 %v3287_v0  ;;  %v3283_v51 = vld [vmem:[%s5379_s4 + $0x1d8] sm:$0xff] }
0x1a74   :  { %v3099_v16 = vmul.f32 %v3097_v20, %v3065_v55 }
0x1a75   :  { %3254 = vmatpush.msrb.mxu3 %v3223_v40  ;;  %3308 = vmatpush.msra.mxu0 %v3286_v12 }
0x1a76   :  { %v3102_v17 = vmul.f32 %v4711_v18, %v3099_v16  ;;  %v4716_v18 = vld [vmem:[%s5379_s4 + $0x1d0] ss:$0 sm:$0xff] }
0x1a77   :  { %3309 = vmatpush.msra.mxu0 %v3285_v1 }
0x1a78   :  { %v3105_v22 = vadd.f32 %v4712_v11, %v3102_v17 }
0x1a79   :  { %3310 = vmatpush.msra.mxu0 %v3284_v2 }
0x1a7a   :  { %4430 = vmatmul.msk.f32.gmra.mxu0 %vm2113_vm0, %v3105_v22  ;;  %vm3325_vm0 = vcmask 1041408  }
0x1a7b   :  { %3311 = vmatpush.msra.mxu0 %v3283_v51  ;;  %4438 = vmatpush.msk.msra.mxu1 %vm3325_vm0, %v3318_v5 }
0x1a7d   :  { %3344 = vmatpush.msra.mxu1 %v3317_v7 }
0x1aef   :  { %v3133_v41 = vpop.f32.mrf.mxu0 }
0x1af0   :  { %v3134_v45 = vadd.f32 %v4713_v38, %v3133_v41 }
0x1af2   :  { %v3139_v36 = vmax.f32 %v3134_v45, 0.0 }
0x1af4   :  { %4431 = vmatmul.msk.f32.vlgmr.msrb.gmra.mxu1 %vm3022_vm15, %v3139_v36 }
0x1af7   :  { %v3136_v47 = vpop.f32.mrf.mxu0 }
0x1af8   :  { %v3137_v46 = vadd.f32 %v4713_v38, %v3136_v47  ;;  %v4718_v38 = vld [vmem:[%s5379_s4 + $0x230] ss:$0 sm:$0xff] }
0x1afa   :  { %v3140_v48 = vmax.f32 %v3137_v46, 0.0 }
0x1afc   :  { %4432 = vmatmul.msk.f32.gmra.mxu1 %vm3022_vm15, %v3140_v48 }
0x1b71   :  { %v3174_v42 = vpop.f32.mrf.mxu1 }
0x1b72   :  { %v3175_v35 = vadd.f32 %v4714_v54, %v3174_v42 }
0x1b74   :  { %v3180_v55 = vmax.f32 %v3175_v35, 0.0 }
0x1b76   :  { %4433 = vmatmul.msk.f32.vlgmr.msra.gmra.mxu2 %vm3022_vm15, %v3180_v55 }
0x1b79   :  { %v3177_v39 = vpop.f32.mrf.mxu1 }
0x1b7a   :  { %v3178_v19 = vadd.f32 %v4714_v54, %v3177_v39 }
0x1b7c   :  { %v3181_v61 = vmax.f32 %v3178_v19, 0.0 }
0x1b7e   :  { %4434 = vmatmul.msk.f32.gmra.mxu2 %vm3022_vm15, %v3181_v61 }
0x1bf9   :  { %v3215_v44 = vpop.f32.mrf.mxu2 }
0x1bfa   :  { %v3216_v23 = vadd.f32 %v4715_v57, %v3215_v44 }
0x1bfc   :  { %v3221_v58 = vmax.f32 %v3216_v23, 0.0 }
0x1bfe   :  { %4435 = vmatmul.msk.f32.vlgmr.msrb.gmra.mxu3 %vm3022_vm15, %v3221_v58 }
0x1c01   :  { %v3218_v24 = vpop.f32.mrf.mxu2 }
0x1c02   :  { %v3219_v59 = vadd.f32 %v4715_v57, %v3218_v24 }
0x1c04   :  { %v3222_v27 = vmax.f32 %v3219_v59, 0.0 }
0x1c06   :  { %4436 = vmatmul.msk.f32.gmra.mxu3 %vm3022_vm15, %v3222_v27 }
0x1c81   :  { %v3256_v43 = vpop.f32.mrf.mxu3 }
0x1c82   :  { %v3257_v8 = vadd.f32 %v4716_v18, %v3256_v43 }
0x1c84   :  { %v3263_v10 = vrot.slane %v3257_v8, 2  ;;  %v3266_v62 = vrot.slane %v3257_v8, 4  ;;  %v3269_v15 = vrot.slane %v3257_v8, 6 }
0x1c86   :  { %v3265_v11 = vmax.f32 %v3257_v8, %v3263_v10 }
0x1c88   :  { %v3268_v13 = vmax.f32 %v3265_v11, %v3266_v62 }
0x1c89   :  { %v3259_v14 = vpop.f32.mrf.mxu3 }
0x1c8a   :  { %v3260_v9 = vadd.f32 %v4716_v18, %v3259_v14  ;;  %v3271_v20 = vmax.f32 %v3268_v13, %v3269_v15 }
0x1c8c   :  { %v3272_v16 = vmax.f32 %v3271_v20, %v3260_v9  ;;  %v3274_v17 = vrot.slane %v3260_v9, 2  ;;  %v3277_v21 = vrot.slane %v3260_v9, 4  ;;  %v3280_v26 = vrot.slane %v3260_v9, 6 }
0x1c8e   :  { %v3276_v22 = vmax.f32 %v3272_v16, %v3274_v17 }
0x1c90   :  { %v3279_v25 = vmax.f32 %v3276_v22, %v3277_v21 }
0x1c92   :  { %v3282_v30 = vmax.f32 %v3279_v25, %v3280_v26 }
0x1c94   :  { %4437 = vmatmul.msk.f32.vlgmr.msra.gmra.mxu0 %vm3022_vm15, %v3282_v30 }
0x1d11   :  { %v3313_v32 = vpop.f32.mrf.mxu0 }
0x1d12   :  { %v3314_v33 = vadd.f32 %v4717_v31, %v3313_v32 }
0x1d14   :  { %v3316_v37 = vmax.f32 %v3314_v33, 0.0 }
0x1d16   :  { %4439 = vmatmul.msk.f32.vlgmr.msra.gmra.mxu1 %vm3321_vm7, %v3316_v37 }
0x1d93   :  { %v3346_v41 = vpop.f32.mrf.mxu1 }
0x1d94   :  { %v3347_v45 = vadd.f32 %v4718_v38, %v3346_v41 }
0x1d96   :  { %3350 = vst.msk [vmem:[#allocation6] sm:$0x3] %vm3349_vm8, %v3347_v45 }
0x1d97   :  { %3361 = dma.vmem_to_hbm [thread:$0]  %s3357_s3, 32, %s3359_s24, [#allocation5]  }
0x1d98   :  { %4851 = dma.done.wait [#allocation5], 32  }
0x1d99   :  { %4852 = vsyncadd [#allocation5], 4294967264 }
0x1d9a   :  { %3366 = vsyncpa [#allocation4], 1 }
0x1d9b   :  { %3367 = vsyncpa [#allocation5], 1 }

</bundles_post_ra>
